<compile_context>
chip_gen: v5e
topology: v5e:2x2
jax: 0.10.0
libtpu: 0.0.40
codegen_flags: <defaults>
</compile_context>

<pallas_src>
import functools

import jax
import jax.numpy as jnp
from jax import lax
from jax.experimental import pallas as pl
from jax.experimental.pallas import tpu as pltpu


def _round_up(x, m):
    return ((x + m - 1) // m) * m


def _vmem_bytes(shape, dtype):
    """VMEM footprint of a buffer with lane (128) / sublane padding."""
    itemsize = jnp.dtype(dtype).itemsize
    s = list(shape)
    if len(s) >= 1:
        s[-1] = _round_up(s[-1], 128)
    if len(s) >= 2:
        s[-2] = _round_up(s[-2], 8 * (4 // itemsize))
    n = 1
    for d in s:
        n *= d
    return n * itemsize


# ---------------------------------------------------------------------------
# Pass 1: fused-K conv (single MXU matmul over 9 lane-packed taps)
#         + per-(image, row-block) sum / sum-of-squares BN partial stats.
# ---------------------------------------------------------------------------
def _conv_stats_kernel(x_ref, w_ref, y_ref, stats_ref, slab_ref, *, wp, w_img,
                       m_img, tm):
    hb = pl.program_id(1)
    base = pl.multiple_of(hb * tm, 8)

    # One aligned dynamic copy of the halo slab covering all 9 taps of this tile.
    slab_ref[...] = x_ref[pl.ds(base, slab_ref.shape[0]), :]

    # Lane-pack the 9 shifted tap views into a single (tm, 9*cin_pad) bf16 LHS
    # and contract once on the MXU (K = 9*cin_pad): no per-tap RMW passes over
    # the f32 output tile, 9x larger K per MXU pass.
    taps = []
    for dy in range(3):
        for dx in range(3):
            off = (dy + 1) * wp + (dx - 1)            # static row shift, >= wp-1
            taps.append(slab_ref[off:off + tm, :])    # (tm, cin_pad) bf16
    lhs = jnp.concatenate(taps, axis=1)               # (tm, 9*cin_pad)
    y = jnp.dot(lhs, w_ref[...], preferred_element_type=jnp.float32)

    # In-kernel validity mask (drops W-pad / M-pad rows) -- two iota compares
    # on the VPU instead of a DMA'd (m_pad, 1) mask stream.
    rows = base + lax.broadcasted_iota(jnp.int32, (tm, 1), 0)
    col = rows % wp
    maskf = ((col >= 1) & (col <= w_img) & (rows < m_img)).astype(jnp.float32)

    # BN partial statistics from the f32 accumulator (before the bf16 store).
    # NOTE: var = E[y^2] - E[y]^2 can cancel for |mean| >> std; fine at the
    # tolerances used here.
    ym = y * maskf
    stats_ref[0:1, :] = jnp.sum(ym, axis=0, keepdims=True)
    stats_ref[1:2, :] = jnp.sum(ym * y, axis=0, keepdims=True)

    # Single bf16 writeback of the conv tile.
    y_ref[...] = y.astype(y_ref.dtype)


# ---------------------------------------------------------------------------
# Pass 2: folded BatchNorm (y * scale + bias) + LeakyReLU(0.1), bf16 in,
#         final network dtype out.
# ---------------------------------------------------------------------------
def _bn_act_kernel(y_ref, scale_ref, bias_ref, o_ref, *, slope):
    z = y_ref[...].astype(jnp.float32) * scale_ref[...] + bias_ref[...]
    o_ref[...] = jnp.where(z >= 0, z, slope * z).astype(o_ref.dtype)


def conv_bn_leakyrelu(x_nchw, w1, w3, gamma, beta, *, stride=1, eps=1e-5,
                      slope=0.1, block_rows=512):
    """MixConv2d(k=(1,3), stride=1) + BatchNorm2d (batch stats) + LeakyReLU(0.1)."""
    if stride != 1:
        # TODO(synk): stride > 1 breaks the flattened-row-shift formulation;
        #             only the stride=1 configuration is implemented here.
        raise NotImplementedError("fused Pallas path supports stride=1 only")

    N, Cin, H, W = x_nchw.shape
    C1, C2 = w1.shape[0], w3.shape[0]
    Cout = C1 + C2
    out_dtype = x_nchw.dtype

    Hp, Wp = H + 4, W + 2                  # 2 pad rows top/bottom, 1 col left/right
    cin_pad = _round_up(Cin, 8)
    cout_pad = _round_up(Cout, 128)        # lane-dense stores / MXU-wide N dim
    K = 9 * cin_pad                        # fused contraction dim (tap-major, cin-minor)

    # Tile the extended output rows (M = H * Wp per image).
    m_img = H * Wp
    n_blk = pl.cdiv(m_img, block_rows)
    tm = _round_up(pl.cdiv(m_img, n_blk), 16)
    m_pad = tm * n_blk
    slab_len = _round_up(tm + 3 * Wp + 2, 8)
    lx = _round_up(max(Hp * Wp, (m_pad - tm) + slab_len), 8)

    # ---- glue: NHWC, pad, flatten, bf16 ----
    x = jnp.transpose(x_nchw, (0, 2, 3, 1)).astype(jnp.bfloat16)
    x = jnp.pad(x, ((0, 0), (2, 2), (1, 1), (0, cin_pad - Cin)))
    x = x.reshape(N, Hp * Wp, cin_pad)
    if lx > Hp * Wp:
        x = jnp.pad(x, ((0, 0), (0, lx - Hp * Wp), (0, 0)))

    # ---- glue: packed (9*cin_pad, cout_pad) weight; 1x1 branch -> centre tap ----
    w3_t = jnp.transpose(w3, (2, 3, 1, 0)).reshape(9, Cin, C2).astype(jnp.float32)
    w_comb = jnp.zeros((9, cin_pad, cout_pad), jnp.float32)
    w_comb = w_comb.at[:, :Cin, C1:C1 + C2].set(w3_t)
    w_comb = w_comb.at[4, :Cin, :C1].set(
        jnp.transpose(w1[:, :, 0, 0], (1, 0)).astype(jnp.float32))
    w_comb = w_comb.reshape(K, cout_pad).astype(jnp.bfloat16)

    # ---- VMEM budget for pass 1 (double-buffered blocks + scratch + temps) ----
    est1 = (2 * (_vmem_bytes((lx, cin_pad), jnp.bfloat16)
                 + _vmem_bytes((K, cout_pad), jnp.bfloat16)
                 + _vmem_bytes((tm, cout_pad), jnp.bfloat16)
                 + _vmem_bytes((2, cout_pad), jnp.float32))
            + _vmem_bytes((slab_len, cin_pad), jnp.bfloat16)
            + _vmem_bytes((tm, K), jnp.bfloat16)                 # packed-tap LHS
            + 2 * _vmem_bytes((tm, cout_pad), jnp.float32))      # f32 conv result
    vlim1 = int(min(max(2 * est1 + (4 << 20), 32 << 20), 48 << 20))

    kernel1 = functools.partial(_conv_stats_kernel, wp=Wp, w_img=W,
                                m_img=m_img, tm=tm)
    y_ext, stats = pl.pallas_call(
        kernel1,
        out_shape=(jax.ShapeDtypeStruct((N, m_pad, cout_pad), jnp.bfloat16),
                   jax.ShapeDtypeStruct((N, n_blk, 2, cout_pad), jnp.float32)),
        grid_spec=pltpu.PrefetchScalarGridSpec(
            num_scalar_prefetch=0,
            grid=(N, n_blk),
            in_specs=[
                pl.BlockSpec((None, lx, cin_pad), lambda n, hb: (n, 0, 0)),
                pl.BlockSpec((K, cout_pad), lambda n, hb: (0, 0)),
            ],
            out_specs=[
                pl.BlockSpec((None, tm, cout_pad), lambda n, hb: (n, hb, 0)),
                pl.BlockSpec((None, None, 2, cout_pad),
                             lambda n, hb: (n, hb, 0, 0)),
            ],
            scratch_shapes=[pltpu.VMEM((slab_len, cin_pad), jnp.bfloat16)]),
        compiler_params=pltpu.CompilerParams(
            dimension_semantics=("parallel", "parallel"),
            vmem_limit_bytes=vlim1),
    )(x, w_comb)

    # ---- fold BatchNorm into per-channel scale / bias (tiny wrapper math) ----
    cnt = jnp.float32(N * H * W)
    s0 = jnp.sum(stats[:, :, 0, :], axis=(0, 1))
    s1 = jnp.sum(stats[:, :, 1, :], axis=(0, 1))
    mean = s0 / cnt
    var = jnp.maximum(s1 / cnt - mean * mean, 0.0)
    rstd = lax.rsqrt(var + eps)
    gamma_p = jnp.zeros((cout_pad,), jnp.float32).at[:Cout].set(
        gamma.astype(jnp.float32))
    beta_p = jnp.zeros((cout_pad,), jnp.float32).at[:Cout].set(
        beta.astype(jnp.float32))
    scale = (gamma_p * rstd).reshape(1, cout_pad)
    bias = (beta_p - mean * gamma_p * rstd).reshape(1, cout_pad)

    # ---- pass 2: normalize + LeakyReLU, large lane-dense row tiles ----
    total_blocks = N * n_blk
    g = 1
    for d in range(total_blocks, 0, -1):
        if total_blocks % d == 0 and d * tm <= 2048:
            g = d
            break
    tile2 = g * tm
    y_flat = y_ext.reshape(N * m_pad, cout_pad)

    est2 = 2 * (_vmem_bytes((tile2, cout_pad), jnp.bfloat16)
                + 2 * _vmem_bytes((1, cout_pad), jnp.float32)
                + _vmem_bytes((tile2, cout_pad), out_dtype))
    vlim2 = int(min(max(2 * est2 + (4 << 20), 32 << 20), 48 << 20))

    kernel2 = functools.partial(_bn_act_kernel, slope=slope)
    out_flat = pl.pallas_call(
        kernel2,
        out_shape=jax.ShapeDtypeStruct((N * m_pad, cout_pad), out_dtype),
        grid=((N * m_pad) // tile2,),
        in_specs=[
            pl.BlockSpec((tile2, cout_pad), lambda i: (i, 0)),
            pl.BlockSpec((1, cout_pad), lambda i: (0, 0)),
            pl.BlockSpec((1, cout_pad), lambda i: (0, 0)),
        ],
        out_specs=pl.BlockSpec((tile2, cout_pad), lambda i: (i, 0)),
        compiler_params=pltpu.CompilerParams(
            dimension_semantics=("parallel",),
            vmem_limit_bytes=vlim2),
    )(y_flat, scale, bias)

    # ---- strip padding, back to NCHW (dtype already final) ----
    out = out_flat.reshape(N, m_pad, cout_pad)[:, :m_img, :Cout]
    out = out.reshape(N, H, Wp, Cout)[:, :, 1:1 + W, :]
    return jnp.transpose(out, (0, 3, 1, 2))


def _reference(x_nchw, w1, w3, gamma, beta, *, stride=1, eps=1e-5, slope=0.1):
    dn = ('NCHW', 'OIHW', 'NCHW')
    y1 = lax.conv_general_dilated(x_nchw, w1, (stride, stride), ((0, 0), (0, 0)),
                                  dimension_numbers=dn,
                                  precision=lax.Precision.HIGHEST)
    y3 = lax.conv_general_dilated(x_nchw, w3, (stride, stride), ((1, 1), (1, 1)),
                                  dimension_numbers=dn,
                                  precision=lax.Precision.HIGHEST)
    y = jnp.concatenate([y1, y3], axis=1)
    mean = jnp.mean(y, axis=(0, 2, 3), keepdims=True)
    var = jnp.mean(jnp.square(y - mean), axis=(0, 2, 3), keepdims=True)
    y = (y - mean) / jnp.sqrt(var + eps)
    y = y * gamma[None, :, None, None] + beta[None, :, None, None]
    return jnp.where(y >= 0, y, slope * y)


if __name__ == "__main__":
    key = jax.random.PRNGKey(0)
    k_x, k_w1, k_w3, k_g, k_b = jax.random.split(key, 5)

    N, Cin, H, W = 2, 4, 16, 16
    Cout = 8
    C1, C2 = Cout // 2, Cout - Cout // 2   # MixConv2d equal-channel split over k=(1, 3)

    x = jax.random.normal(k_x, (N, Cin, H, W), jnp.float32)
    w1 = jax.random.normal(k_w1, (C1, Cin, 1, 1), jnp.float32) * 0.5
    w3 = jax.random.normal(k_w3, (C2, Cin, 3, 3), jnp.float32) * 0.2
    gamma = 1.0 + 0.1 * jax.random.normal(k_g, (Cout,), jnp.float32)
    beta = 0.1 * jax.random.normal(k_b, (Cout,), jnp.float32)

    out = conv_bn_leakyrelu(x, w1, w3, gamma, beta, stride=1)
    out = jax.block_until_ready(out)

    # Reference on bf16-rounded operands (kernel feeds the MXU bf16, accumulates f32).
    xq = x.astype(jnp.bfloat16).astype(jnp.float32)
    w1q = w1.astype(jnp.bfloat16).astype(jnp.float32)
    w3q = w3.astype(jnp.bfloat16).astype(jnp.float32)
    ref = _reference(xq, w1q, w3q, gamma, beta, stride=1)

    assert out.shape == (N, Cout, H, W), out.shape
    err = float(jnp.max(jnp.abs(out - ref)))
    assert jnp.allclose(out, ref, atol=1e-2, rtol=1e-2), err

    print("KERNEL_OK")
</pallas_src>

<mosaic_0001>
module attributes {stable_mosaic.version = 11 : i64} {
  func.func @_conv_stats_kernel(%arg0: i32, %arg1: i32, %arg2: memref<1x360x8xbf16, #tpu.memory_space<vmem>>, %arg3: memref<72x128xbf16, #tpu.memory_space<vmem>>, %arg4: memref<1x288x128xbf16, #tpu.memory_space<vmem>>, %arg5: memref<1x1x2x128xf32, #tpu.memory_space<vmem>>, %arg6: memref<344x8xbf16, #tpu.memory_space<vmem>>) attributes {dimension_semantics = [#tpu.dimension_semantics<parallel>, #tpu.dimension_semantics<parallel>], iteration_bounds = array<i64: 2, 1>, scalar_prefetch = 0 : i64, scratch_operands = 1 : i64, tpu.core_type = #tpu.core_type<tc>, window_params = [{transform_indices = @transform_0, window_bounds = array<i64: 1, 360, 8>}, {pipeline_mode = #tpu.pipeline_mode<synchronous>, transform_indices = @transform_1, window_bounds = array<i64: 72, 128>}, {transform_indices = @transform_2, window_bounds = array<i64: 1, 288, 128>}, {transform_indices = @transform_3, window_bounds = array<i64: 1, 1, 2, 128>}]} {
    %c288_i32 = arith.constant 288 : i32
    %0 = arith.muli %arg1, %c288_i32 : i32
    %1 = tpu.assume_multiple %0, 8 : i32
    %c0 = arith.constant 0 : index
    %2 = arith.index_cast %1 : i32 to index
    %c0_0 = arith.constant 0 : index
    %3 = vector.load %arg2[%c0, %2, %c0_0] : memref<1x360x8xbf16, #tpu.memory_space<vmem>>, vector<1x344x8xbf16>
    %4 = vector.shape_cast %3 : vector<1x344x8xbf16> to vector<344x8xbf16>
    %c0_1 = arith.constant 0 : index
    %c0_2 = arith.constant 0 : index
    %5 = vector.load %arg6[%c0_1, %c0_2] : memref<344x8xbf16, #tpu.memory_space<vmem>>, vector<344x8xbf16>
    tpu.vector_store %arg6[%c0_1, %c0_2], %4 {strides = array<i32>} : memref<344x8xbf16, #tpu.memory_space<vmem>>, vector<344x8xbf16>,
    %c17 = arith.constant 17 : index
    %c0_3 = arith.constant 0 : index
    %6 = vector.load %arg6[%c17, %c0_3] : memref<344x8xbf16, #tpu.memory_space<vmem>>, vector<288x8xbf16>
    %c18 = arith.constant 18 : index
    %c0_4 = arith.constant 0 : index
    %7 = vector.load %arg6[%c18, %c0_4] : memref<344x8xbf16, #tpu.memory_space<vmem>>, vector<288x8xbf16>
    %c19 = arith.constant 19 : index
    %c0_5 = arith.constant 0 : index
    %8 = vector.load %arg6[%c19, %c0_5] : memref<344x8xbf16, #tpu.memory_space<vmem>>, vector<288x8xbf16>
    %c35 = arith.constant 35 : index
    %c0_6 = arith.constant 0 : index
    %9 = vector.load %arg6[%c35, %c0_6] : memref<344x8xbf16, #tpu.memory_space<vmem>>, vector<288x8xbf16>
    %c36 = arith.constant 36 : index
    %c0_7 = arith.constant 0 : index
    %10 = vector.load %arg6[%c36, %c0_7] : memref<344x8xbf16, #tpu.memory_space<vmem>>, vector<288x8xbf16>
    %c37 = arith.constant 37 : index
    %c0_8 = arith.constant 0 : index
    %11 = vector.load %arg6[%c37, %c0_8] : memref<344x8xbf16, #tpu.memory_space<vmem>>, vector<288x8xbf16>
    %c53 = arith.constant 53 : index
    %c0_9 = arith.constant 0 : index
    %12 = vector.load %arg6[%c53, %c0_9] : memref<344x8xbf16, #tpu.memory_space<vmem>>, vector<288x8xbf16>
    %c54 = arith.constant 54 : index
    %c0_10 = arith.constant 0 : index
    %13 = vector.load %arg6[%c54, %c0_10] : memref<344x8xbf16, #tpu.memory_space<vmem>>, vector<288x8xbf16>
    %c55 = arith.constant 55 : index
    %c0_11 = arith.constant 0 : index
    %14 = vector.load %arg6[%c55, %c0_11] : memref<344x8xbf16, #tpu.memory_space<vmem>>, vector<288x8xbf16>
    %15 = tpu.concatenate %6, %7, %8, %9, %10, %11, %12, %13, %14 in 1 : vector<288x8xbf16>, vector<288x8xbf16>, vector<288x8xbf16>, vector<288x8xbf16>, vector<288x8xbf16>, vector<288x8xbf16>, vector<288x8xbf16>, vector<288x8xbf16>, vector<288x8xbf16> -> vector<288x72xbf16>
    %c0_12 = arith.constant 0 : index
    %c0_13 = arith.constant 0 : index
    %16 = vector.load %arg3[%c0_12, %c0_13] : memref<72x128xbf16, #tpu.memory_space<vmem>>, vector<72x128xbf16>
    %cst = arith.constant dense<0.000000e+00> : vector<288x128xf32>
    %17 = tpu.matmul %15, %16, %cst {dimension_numbers = #tpu.dot_dimension_numbers<[1], [0], [0], [1], [0, 0, 1, 1], [], []>} : vector<288x72xbf16>, vector<72x128xbf16>, vector<288x128xf32> -> vector<288x128xf32>
    %18 = tpu.iota {dimensions = array<i32: 0>} : vector<288x1xi32>
    %19 = vector.broadcast %1 : i32 to vector<288x1xi32>
    %20 = arith.addi %19, %18 : vector<288x1xi32>
    %c18_i32 = arith.constant 18 : i32
    %c0_i32 = arith.constant 0 : i32
    %21 = arith.cmpi eq, %c18_i32, %c0_i32 : i32
    %c1_i32 = arith.constant 1 : i32
    %22 = arith.select %21, %c1_i32, %c18_i32 : i32
    %23 = vector.broadcast %22 : i32 to vector<288x1xi32>
    %24 = arith.remsi %20, %23 : vector<288x1xi32>
    %c0_i32_14 = arith.constant 0 : i32
    %25 = vector.broadcast %c0_i32_14 : i32 to vector<288x1xi32>
    %26 = arith.cmpi ne, %24, %25 : vector<288x1xi32>
    %c0_i32_15 = arith.constant 0 : i32
    %27 = vector.broadcast %c0_i32_15 : i32 to vector<288x1xi32>
    %28 = arith.cmpi slt, %24, %27 : vector<288x1xi32>
    %c0_i32_16 = arith.constant 0 : i32
    %29 = arith.cmpi slt, %22, %c0_i32_16 : i32
    %30 = vector.broadcast %29 : i1 to vector<288x1xi1>
    %31 = vector.broadcast %30 : vector<288x1xi1> to vector<288x1xi1>
    %32 = arith.xori %28, %31 : vector<288x1xi1>
    %33 = arith.andi %32, %26 : vector<288x1xi1>
    %34 = vector.broadcast %22 : i32 to vector<288x1xi32>
    %35 = arith.addi %24, %34 : vector<288x1xi32>
    %36 = arith.select %33, %35, %24 : vector<288x1xi1>, vector<288x1xi32>
    %c1_i32_17 = arith.constant 1 : i32
    %37 = vector.broadcast %c1_i32_17 : i32 to vector<288x1xi32>
    %38 = arith.cmpi sge, %36, %37 : vector<288x1xi32>
    %c16_i32 = arith.constant 16 : i32
    %39 = vector.broadcast %c16_i32 : i32 to vector<288x1xi32>
    %40 = arith.cmpi sle, %36, %39 : vector<288x1xi32>
    %41 = arith.andi %38, %40 : vector<288x1xi1>
    %c288_i32_18 = arith.constant 288 : i32
    %42 = vector.broadcast %c288_i32_18 : i32 to vector<288x1xi32>
    %43 = arith.cmpi slt, %20, %42 : vector<288x1xi32>
    %44 = arith.andi %41, %43 : vector<288x1xi1>
    %45 = arith.extui %44 : vector<288x1xi1> to vector<288x1xi32>
    %46 = arith.sitofp %45 : vector<288x1xi32> to vector<288x1xf32>
    %47 = vector.broadcast %46 : vector<288x1xf32> to vector<288x128xf32>
    %48 = arith.mulf %17, %47 : vector<288x128xf32>
    %cst_19 = arith.constant dense<0.000000e+00> : vector<128xf32>
    %49 = vector.multi_reduction <add>, %48, %cst_19 [0] : vector<288x128xf32> to vector<128xf32>
    %50 = vector.shape_cast %49 : vector<128xf32> to vector<1x128xf32>
    %c0_20 = arith.constant 0 : index
    %c0_21 = arith.constant 0 : index
    %c0_22 = arith.constant 0 : index
    %c0_23 = arith.constant 0 : index
    %51 = vector.load %arg5[%c0_20, %c0_21, %c0_22, %c0_23] : memref<1x1x2x128xf32, #tpu.memory_space<vmem>>, vector<1x1x1x128xf32>
    %52 = vector.shape_cast %51 : vector<1x1x1x128xf32> to vector<1x128xf32>
    %53 = vector.shape_cast %50 : vector<1x128xf32> to vector<1x1x1x128xf32>
    tpu.vector_store %arg5[%c0_20, %c0_21, %c0_22, %c0_23], %53 {strides = array<i32>} : memref<1x1x2x128xf32, #tpu.memory_space<vmem>>, vector<1x1x1x128xf32>,
    %54 = arith.mulf %48, %17 : vector<288x128xf32>
    %cst_24 = arith.constant dense<0.000000e+00> : vector<128xf32>
    %55 = vector.multi_reduction <add>, %54, %cst_24 [0] : vector<288x128xf32> to vector<128xf32>
    %56 = vector.shape_cast %55 : vector<128xf32> to vector<1x128xf32>
    %c0_25 = arith.constant 0 : index
    %c0_26 = arith.constant 0 : index
    %c1 = arith.constant 1 : index
    %c0_27 = arith.constant 0 : index
    %57 = vector.load %arg5[%c0_25, %c0_26, %c1, %c0_27] : memref<1x1x2x128xf32, #tpu.memory_space<vmem>>, vector<1x1x1x128xf32>
    %58 = vector.shape_cast %57 : vector<1x1x1x128xf32> to vector<1x128xf32>
    %59 = vector.shape_cast %56 : vector<1x128xf32> to vector<1x1x1x128xf32>
    tpu.vector_store %arg5[%c0_25, %c0_26, %c1, %c0_27], %59 {strides = array<i32>} : memref<1x1x2x128xf32, #tpu.memory_space<vmem>>, vector<1x1x1x128xf32>,
    %60 = arith.truncf %17 : vector<288x128xf32> to vector<288x128xbf16>
    %c0_28 = arith.constant 0 : index
    %c0_29 = arith.constant 0 : index
    %c0_30 = arith.constant 0 : index
    %61 = vector.load %arg4[%c0_28, %c0_29, %c0_30] : memref<1x288x128xbf16, #tpu.memory_space<vmem>>, vector<1x288x128xbf16>
    %62 = vector.shape_cast %61 : vector<1x288x128xbf16> to vector<288x128xbf16>
    %63 = vector.shape_cast %60 : vector<288x128xbf16> to vector<1x288x128xbf16>
    tpu.vector_store %arg4[%c0_28, %c0_29, %c0_30], %63 {strides = array<i32>} : memref<1x288x128xbf16, #tpu.memory_space<vmem>>, vector<1x288x128xbf16>,
    return
  }
  func.func @transform_0(%arg0: i32, %arg1: i32) -> (i32, i32, i32) {
    %c0_i32 = arith.constant 0 : i32
    %c0_i32_0 = arith.constant 0 : i32
    %c0_i32_1 = arith.constant 0 : i32
    return %arg0, %c0_i32, %c0_i32_0 : i32, i32, i32
  }
  func.func @transform_1(%arg0: i32, %arg1: i32) -> (i32, i32) {
    %c0_i32 = arith.constant 0 : i32
    %c0_i32_0 = arith.constant 0 : i32
    %c0_i32_1 = arith.constant 0 : i32
    return %c0_i32, %c0_i32_0 : i32, i32
  }
  func.func @transform_2(%arg0: i32, %arg1: i32) -> (i32, i32, i32) {
    %c0_i32 = arith.constant 0 : i32
    %c0_i32_0 = arith.constant 0 : i32
    return %arg0, %arg1, %c0_i32 : i32, i32, i32
  }
  func.func @transform_3(%arg0: i32, %arg1: i32) -> (i32, i32, i32, i32) {
    %c0_i32 = arith.constant 0 : i32
    %c0_i32_0 = arith.constant 0 : i32
    %c0_i32_1 = arith.constant 0 : i32
    return %arg0, %arg1, %c0_i32, %c0_i32_0 : i32, i32, i32, i32
  }
}

</mosaic_0001>

<bundles_post_ra>
// kernel: tpu_custom_call.1
= control target key start
LH: loop header
LB: loop body
LE: loop exit
PB: predicated region body
PF: predicated region fallthrough
CT: control target
= control target key end

     0   :  { %9 = vsyncpa [#allocation4], 0  ;;  %s6961_s0 = inlined_call_operand.vmem [shape: bf16[2,360,8], index: 0, kind: input, shape index: {}]   ;;  %s6962_s1 = inlined_call_operand.vmem [shape: bf16[72,128], index: 1, kind: input, shape index: {}]   ;;  %s6963_s2 = inlined_call_operand.hbm [shape: bf16[2,288,128], index: 2, kind: output, shape index: {0}]   ;;  %s6964_s3 = inlined_call_operand.hbm [shape: f32[2,1,2,128], index: 3, kind: output, shape index: {1}]  }
   0x1   :  { %11 = vsyncpa [#allocation4 + $0x1], 0 }
   0x2   :  { %12 = vsyncpa [#allocation6], 0 }
   0x3   :  { %14 = vsyncpa [#allocation6 + $0x1], 0  ;;  %s4333_s12 = smov 0   ;;  %s4335_s13 = smov 0  }
   0x4   :  { %s4337_s14 = smov 0   ;;  %s4339_s15 = smov 0  }
   0x5   :  { %s4341_s16 = smov 0   ;;  %s4343_s17 = smov 0  }
   0x6 LB: > { %s3798_s18 = sadd.s32 4294967295, %s4300_s17   ;;  %s3799_s19 = sadd.s32 4294967294, %s4300_s17   ;;  %s4300_s17 = sphi %s4343_s17, %s20_s17   ;;  %s4296_s16 = sphi %s4341_s16, %s7115_s16   ;;  %s4292_s15 = sphi %s4339_s15, %s7114_s15   ;;  %s4288_s14 = sphi %s4337_s14, %s7113_s14   ;;  %s4284_s13 = sphi %s4335_s13, %s7112_s13   ;;  %s4280_s12 = sphi %s4333_s12, %s7111_s12  }
   0x7   : > { %s32_s20 = sadd.s32 1, %s4296_s16  ;;  %s88_s21 = sadd.s32 1, %s4288_s14 }
   0x8   : > { %p34_p0 = scmp.ge.s32.totalorder %s32_s20, 2  ;;  %p98_p1 = scmp.ne.s32.totalorder %s4288_s14, %s4284_s13 }
   0x9   : > { %p99_p2 = scmp.eq.s32.totalorder %s3798_s18, 1  ;;  %p104_p3 = scmp.ne.s32.totalorder %s4284_s13, %s4280_s12 }
   0xa   : > { %s7117_s20 = smov (%p34_p0, %s32_s20), 0  ;;  %p105_p5 = scmp.eq.s32.totalorder %s3799_s19, 1 }
   0xb   : > { %p4373_p4 = por %p99_p2, %p98_p1  ;;  %s83_s23 = ssub.s32 %s4296_s16, %s7117_s20 }
   0xc   : > { %p3802_p6 = scmp.ge.s32.totalorder %s4300_s17, 1  ;;  %p86_p7 = scmp.eq.s32.totalorder %s83_s23, 0 }
   0xd   : > { %p4380_p8 = por %p105_p5, %p104_p3  ;;  %p162_p9 = scmp.lt.s32.totalorder %s4300_s17, 3 }
   0xe   : > { %s4386_s25 = scalar_select %p86_p7, %s4288_s14, %s88_s21  }
   0xf   : > { %p163_p10 = pnand %p3802_p6, %p162_p9 }
  0x11   : > { %166 = sbr.rel (%p163_p10) target bundleno = 794 (0x31a), region = 28 }
  0x16   : > { %p191_p11 = scmp.lt.s32.totalorder %s4292_s15, 1  ;;  %vm246_vm0 = vcmask 60416   ;;  %vm437_vm1 = vsmask.f32 7424  ;;  %s4302_s4 = smov 8   ;;  %vm629_vm2 = vcmask 1046528  }
  0x17   : > { %s4303_s5 = smov 16   ;;  %s4304_s6 = smov 24   ;;  %vm763_vm3 = vsmask.f32 6400  ;;  %vm895_vm4 = vcmask 1045504   ;;  %vm1161_vm6 = vcmask 1044480  }
  0x18   : > { %s192_s26 = scalar_select %p191_p11, %s4292_s15, 1  ;;  %vm1029_vm5 = vsmask.f32 5376  ;;  %vm1237_vm7 = vcmask 64512   ;;  %vm1277_vm8 = vcmask 130048   ;;  %vm7010_vm9 = vcmask 195584  }
  0x19   : > { %s4305_s7 = smov 32   ;;  %s4306_s8 = smov 40   ;;  %vm1770_vm10 = vcmask 1043456   ;;  %vm1355_vm11 = vcmask 261120   ;;  %vm1394_vm12 = vcmask 326656   ;;  %vm1433_vm13 = vcmask 392192  }
  0x1a   : > { %s4110_s27 = smul.u32 180, %s192_s26  ;;  %s4307_s9 = smov 48   ;;  %vm1472_vm14 = vcmask 457728   ;;  %vm1511_vm15 = vcmask 523264  }
  0x1b   : > { %s4308_s10 = smov 56   ;;  %s4309_s11 = smov 64  }
  0x1c   : > { %s4393_s30 = scalar_lea.vmem %s6961_s0, %s4110_s27 }
  0x1d   : > { %v209_v0 = vld [vmem:[%s4393_s30 + $0x18] sm:$0xf]  ;;  %v210_v1 = vld [vmem:[%s4393_s30 + $0x1c] sm:$0xf]  ;;  %v211_v2 = vld [vmem:[%s4393_s30 + $0x20] sm:$0xf] }
  0x1e   : > { %v212_v3 = vld [vmem:[%s4393_s30 + $0x24] sm:$0xf]  ;;  %253 = vst.msk [vmem:[#allocation2 + $0x18] sm:$0xf] %vm246_vm0, %v209_v0  ;;  %v207_v4 = vld [vmem:[%s4393_s30 + $0x10] sm:$0xf] }
  0x1f   : > { %254 = vst.msk [vmem:[#allocation2 + $0x1c] sm:$0xf] %vm246_vm0, %v210_v1  ;;  %v208_v5 = vld [vmem:[%s4393_s30 + $0x14] sm:$0xf]  ;;  %v213_v6 = vld [vmem:[%s4393_s30 + $0x28] sm:$0xf] }
  0x20   : > { %255 = vst.msk [vmem:[#allocation2 + $0x20] sm:$0xf] %vm246_vm0, %v211_v2  ;;  %v214_v7 = vld [vmem:[%s4393_s30 + $0x2c] sm:$0xf]  ;;  %v215_v8 = vld [vmem:[%s4393_s30 + $0x30] sm:$0xf] }
  0x21   : > { %256 = vst.msk [vmem:[#allocation2 + $0x24] sm:$0xf] %vm246_vm0, %v212_v3  ;;  %v216_v9 = vld [vmem:[%s4393_s30 + $0x34] sm:$0xf]  ;;  %v205_v10 = vld [vmem:[%s4393_s30 + $0x8] sm:$0xf] }
  0x22   : > { %251 = vst.msk [vmem:[#allocation2 + $0x10] sm:$0xf] %vm246_vm0, %v207_v4  ;;  %v206_v11 = vld [vmem:[%s4393_s30 + $0xc] sm:$0xf]  ;;  %v217_v13 = vld [vmem:[%s4393_s30 + $0x38] sm:$0xf] }
  0x23   : > { %252 = vst.msk [vmem:[#allocation2 + $0x14] sm:$0xf] %vm246_vm0, %v208_v5  ;;  %v218_v16 = vld [vmem:[%s4393_s30 + $0x3c] sm:$0xf]  ;;  %v219_v18 = vld [vmem:[%s4393_s30 + $0x40] sm:$0xf] }
  0x24   : > { %257 = vst.msk [vmem:[#allocation2 + $0x28] sm:$0xf] %vm246_vm0, %v213_v6  ;;  %v220_v20 = vld [vmem:[%s4393_s30 + $0x44] sm:$0xf]  ;;  %v221_v23 = vld [vmem:[%s4393_s30 + $0x48] sm:$0xf] }
  0x25   : > { %258 = vst.msk [vmem:[#allocation2 + $0x2c] sm:$0xf] %vm246_vm0, %v214_v7  ;;  %v222_v27 = vld [vmem:[%s4393_s30 + $0x4c] sm:$0xf]  ;;  %v223_v31 = vld [vmem:[%s4393_s30 + $0x50] sm:$0xf] }
  0x26   : > { %v4415_v12 = vld [vmem:[#allocation2 + $0x18] sm:$0xff]   ;;  %259 = vst.msk [vmem:[#allocation2 + $0x30] sm:$0xf] %vm246_vm0, %v215_v8  ;;  %v224_v33 = vld [vmem:[%s4393_s30 + $0x54] sm:$0xf] }
  0x27   : > { %v6965_v14 = vshll.u32 %v4415_v12, 16  ;;  %v6966_v15 = vshrl.u32 %v4415_v12, 16  ;;  %260 = vst.msk [vmem:[#allocation2 + $0x34] sm:$0xf] %vm246_vm0, %v216_v9  ;;  %v225_v40 = vld [vmem:[%s4393_s30 + $0x58] sm:$0xf] }
  0x28   : > { %v4423_v17 = vld [vmem:[#allocation2 + $0x20] sm:$0xff]  ;;  %249 = vst.msk [vmem:[#allocation2 + $0x8] sm:$0xf] %vm246_vm0, %v205_v10  ;;  %v226_v45 = vld [vmem:[%s4393_s30 + $0x5c] sm:$0xf] }
  0x29   : > { %v456_v19 = vrot.slane %v6965_v14, 1  ;;  %250 = vst.msk [vmem:[#allocation2 + $0xc] sm:$0xf] %vm246_vm0, %v206_v11  ;;  %v4432_v21 = vshll.u32 %v4423_v17, 16  ;;  %v4448_v30 = vshrl.u32 %v4423_v17, 16 }
  0x2a   : > { %v4434_v22 = vld [vmem:[#allocation2 + $0x10] sm:$0xff]   ;;  %261 = vst.msk [vmem:[#allocation2 + $0x38] sm:$0xf] %vm246_vm0, %v217_v13  ;;  %v227_v48 = vld [vmem:[%s4393_s30 + $0x60] sm:$0xf] }
  0x2b   : > { %v460_v24 = vor.u32 %v6966_v15, %v456_v19  ;;  %v446_v25 = vshll.u32 %v4434_v22, 16  ;;  %v450_v26 = vshrl.u32 %v4434_v22, 16  ;;  %262 = vst.msk [vmem:[#allocation2 + $0x3c] sm:$0xf] %vm246_vm0, %v218_v16  ;;  %v464_v28 = vrot.slane %v4432_v21, 1 }
  0x2c   : > { %v4445_v29 = vld [vmem:[#allocation2 + $0x28] sm:$0xff]  ;;  %263 = vst.msk [vmem:[#allocation2 + $0x40] sm:$0xf] %vm246_vm0, %v219_v18  ;;  %v228_v49 = vld [vmem:[%s4393_s30 + $0x64] sm:$0xf] }
  0x2d   : > { %v448_v32 = vrot.slane %v446_v25, 1  ;;  %264 = vst.msk [vmem:[#allocation2 + $0x44] sm:$0xf] %vm246_vm0, %v220_v20  ;;  %v465_v34 = vsel %vm437_vm1, %v460_v24, %v464_v28  ;;  %v4458_v36 = vshll.u32 %v4445_v29, 16  ;;  %v4461_v37 = vshrl.u32 %v4445_v29, 16 }
  0x2e   : > { %v4455_v35 = vld [vmem:[#allocation2 + $0x30] sm:$0xff]  ;;  %265 = vst.msk [vmem:[#allocation2 + $0x48] sm:$0xf] %vm246_vm0, %v221_v23  ;;  %592 = vrot.lane.b32.xlu1 %v465_v34, %s4302_s4  ;;  %v468_v43 = vor.u32 %v4448_v30, %v464_v28  ;;  %v229_v54 = vld [vmem:[%s4393_s30 + $0x68] sm:$0xf] }
  0x2f   : > { %v452_v38 = vor.u32 %v450_v26, %v448_v32  ;;  %v4075_v39 = vld [vmem:[#allocation2 + $0x8] sm:$0xe]  ;;  %266 = vst.msk [vmem:[#allocation2 + $0x4c] sm:$0xf] %vm246_vm0, %v222_v27  ;;  %v472_v41 = vrot.slane %v4458_v36, 1  ;;  %v4469_v42 = vshll.u32 %v4455_v35, 16 }
  0x30   : > { %v4074_v44 = vld [vmem:[#allocation2 + $0x8] sm:$0xf0]  ;;  %267 = vst.msk [vmem:[#allocation2 + $0x50] sm:$0xf] %vm246_vm0, %v223_v31  ;;  %v4485_v53 = vshrl.u32 %v4455_v35, 16 }
  0x31   : > { %v457_v46 = vsel %vm437_vm1, %v452_v38, %v456_v19  ;;  %v4474_v47 = vor.u32 %v4075_v39, %v4074_v44  ;;  %v476_v50 = vor.u32 %v4461_v37, %v472_v41  ;;  %v480_v51 = vrot.slane %v4469_v42, 1  ;;  %268 = vst.msk [vmem:[#allocation2 + $0x54] sm:$0xf] %vm246_vm0, %v224_v33  ;;  %v230_v57 = vld [vmem:[%s4393_s30 + $0x6c] sm:$0xf] }
  0x32   : > { %590 = vrot.lane.b32.xlu0 %v457_v46, %s4302_s4  ;;  %v4482_v52 = vld [vmem:[#allocation2 + $0x38] sm:$0xff]  ;;  %269 = vst.msk [vmem:[#allocation2 + $0x58] sm:$0xf] %vm246_vm0, %v225_v40  ;;  %v473_v59 = vsel %vm437_vm1, %v468_v43, %v472_v41  ;;  %v231_v62 = vld [vmem:[%s4393_s30 + $0x70] sm:$0xf] }
  0x33   : > { %v439_v55 = vshrl.u32 %v4474_v47, 16  ;;  %v441_v56 = vshll.u32 %v4474_v47, 16  ;;  %v481_v58 = vsel %vm437_vm1, %v476_v50, %v480_v51  ;;  %v4496_v60 = vshll.u32 %v4482_v52, 16  ;;  %270 = vst.msk [vmem:[#allocation2 + $0x5c] sm:$0xf] %vm246_vm0, %v226_v45 }
  0x34   : > { %v4498_v61 = vld [vmem:[#allocation2 + $0x40] sm:$0xff]  ;;  %596 = vrot.lane.b32.xlu2 %v481_v58, %s4302_s4  ;;  %271 = vst.msk [vmem:[#allocation2 + $0x60] sm:$0xf] %vm246_vm0, %v227_v48  ;;  %v232_v0 = vld [vmem:[%s4393_s30 + $0x74] sm:$0xf]  ;;  %v484_v1 = vor.u32 %v4485_v53, %v480_v51  ;;  %v4518_v7 = vshrl.u32 %v4482_v52, 16 }
  0x35   : > { %v443_v63 = vrot.slane %v441_v56, 1  ;;  %v488_v2 = vrot.slane %v4496_v60, 1  ;;  %v4510_v4 = vshll.u32 %v4498_v61, 16  ;;  %v4513_v5 = vshrl.u32 %v4498_v61, 16  ;;  %272 = vst.msk [vmem:[#allocation2 + $0x64] sm:$0xf] %vm246_vm0, %v228_v49 }
  0x36   : > { %v4507_v3 = vld [vmem:[#allocation2 + $0x48] sm:$0xff]  ;;  %594 = vrot.lane.b32.xlu1 %v473_v59, %s4302_s4  ;;  %273 = vst.msk [vmem:[#allocation2 + $0x68] sm:$0xf] %vm246_vm0, %v229_v54  ;;  %v233_v8 = vld [vmem:[%s4393_s30 + $0x78] sm:$0xf] }
  0x37   : > { %v444_v6 = vor.u32 %v443_v63, %v439_v55  ;;  %v496_v9 = vrot.slane %v4510_v4, 1  ;;  %v4524_v10 = vshll.u32 %v4507_v3, 16  ;;  %274 = vst.msk [vmem:[#allocation2 + $0x6c] sm:$0xf] %vm246_vm0, %v230_v57  ;;  %v234_v11 = vld [vmem:[%s4393_s30 + $0x7c] sm:$0xf]  ;;  %v489_v19 = vsel %vm437_vm1, %v484_v1, %v488_v2 }
  0x38   : > { %v4529_v16 = vld [vmem:[#allocation2 + $0x50] sm:$0xff]  ;;  %275 = vst.msk [vmem:[#allocation2 + $0x70] sm:$0xf] %vm246_vm0, %v231_v62  ;;  %v235_v18 = vld [vmem:[%s4393_s30 + $0x80] sm:$0xf]  ;;  %v4538_v24 = vshrl.u32 %v4507_v3, 16  ;;  %v492_v26 = vor.u32 %v4518_v7, %v488_v2 }
  0x39   : > { %v449_v13 = vsel %vm437_vm1, %v444_v6, %v448_v32  ;;  %v500_v20 = vor.u32 %v4513_v5, %v496_v9  ;;  %v504_v23 = vrot.slane %v4524_v10, 1  ;;  %276 = vst.msk [vmem:[#allocation2 + $0x74] sm:$0xf] %vm246_vm0, %v232_v0  ;;  %v236_v25 = vld [vmem:[%s4393_s30 + $0x84] sm:$0xf]  ;;  %v4544_v27 = vshll.u32 %v4529_v16, 16 }
  0x3a   : > { %588 = vrot.lane.b32.xlu0 %v449_v13, %s4302_s4  ;;  %v4546_v28 = vld [vmem:[#allocation2 + $0x58] sm:$0xff]  ;;  %277 = vst.msk [vmem:[#allocation2 + $0x78] sm:$0xf] %vm246_vm0, %v233_v8  ;;  %v237_v31 = vld [vmem:[%s4393_s30 + $0x88] sm:$0xf]  ;;  %v497_v45 = vsel %vm437_vm1, %v492_v26, %v496_v9  ;;  %v4575_v49 = vshrl.u32 %v4529_v16, 16 }
  0x3b   : > { %7013 = vst [vmem:[#allocation9_spill] sm:$0xff] %v4544_v27  ;;  %v505_v32 = vsel %vm437_vm1, %v500_v20, %v504_v23  ;;  %v238_v33 = vld [vmem:[%s4393_s30 + $0x8c] sm:$0xf]  ;;  %v239_v34 = vld [vmem:[%s4393_s30 + $0x90] sm:$0xf]  ;;  %v4558_v39 = vshll.u32 %v4546_v28, 16  ;;  %v508_v41 = vor.u32 %v4538_v24, %v504_v23 }
  0x3c   : > { %278 = vst.msk [vmem:[#allocation2 + $0x7c] sm:$0xf] %vm246_vm0, %v234_v11  ;;  %598 = vrot.lane.b32.xlu2 %v489_v19, %s4302_s4  ;;  %v4555_v38 = vld [vmem:[#allocation2 + $0x60] sm:$0xff]  ;;  %v4561_v40 = vshrl.u32 %v4546_v28, 16  ;;  %v512_v43 = vrot.slane %v4544_v27, 1 }
  0x3d   : > { %279 = vst.msk [vmem:[#allocation2 + $0x80] sm:$0xf] %vm246_vm0, %v235_v18  ;;  %v240_v44 = vld [vmem:[%s4393_s30 + $0x94] sm:$0xf]  ;;  %v520_v46 = vrot.slane %v4558_v39, 1  ;;  %v4572_v48 = vshll.u32 %v4555_v38, 16 }
  0x3e   : > { %280 = vst.msk [vmem:[#allocation2 + $0x84] sm:$0xf] %vm246_vm0, %v236_v25  ;;  %602 = vrot.lane.b32.xlu1 %v505_v32, %s4302_s4  ;;  %v4577_v50 = vld [vmem:[#allocation2 + $0x68] sm:$0xff]  ;;  %v241_v51 = vld [vmem:[%s4393_s30 + $0x98] sm:$0xf]  ;;  %v513_v57 = vsel %vm437_vm1, %v508_v41, %v512_v43  ;;  %v4590_v58 = vshrl.u32 %v4555_v38, 16  ;;  %v516_v62 = vor.u32 %v4575_v49, %v512_v43 }
  0x3f   : > { %7014 = vst [vmem:[#allocation10_spill] sm:$0xff] %v4575_v49  ;;  %v524_v54 = vor.u32 %v4561_v40, %v520_v46  ;;  %v528_v55 = vrot.slane %v4572_v48, 1  ;;  %v4593_v59 = vshll.u32 %v4577_v50, 16  ;;  %v4621_v23 = vshrl.u32 %v4577_v50, 16 }
  0x40   : > { %281 = vst.msk [vmem:[#allocation2 + $0x88] sm:$0xf] %vm246_vm0, %v237_v31  ;;  %v4584_v56 = vld [vmem:[#allocation2 + $0x70] sm:$0xff]  ;;  %v521_v18 = vsel %vm437_vm1, %v516_v62, %v520_v46  ;;  %v651_v14 = vrot.slane %v4555_v38, 1 }
  0x41   : > { %282 = vst.msk [vmem:[#allocation2 + $0x8c] sm:$0xf] %vm246_vm0, %v238_v33  ;;  %v4600_v0 = vshll.u32 %v4584_v56, 16  ;;  %v529_v1 = vsel %vm437_vm1, %v524_v54, %v528_v55  ;;  %v4605_v2 = vshrl.u32 %v4584_v56, 16  ;;  %v532_v9 = vor.u32 %v4590_v58, %v528_v55 }
  0x42   : > { %283 = vst.msk [vmem:[#allocation2 + $0x90] sm:$0xf] %vm246_vm0, %v239_v34  ;;  %600 = vrot.lane.b32.xlu0 %v497_v45, %s4302_s4  ;;  %v536_v11 = vrot.slane %v4593_v59, 1 }
  0x43   : > { %284 = vst.msk [vmem:[#allocation2 + $0x94] sm:$0xf] %vm246_vm0, %v240_v44  ;;  %v4597_v63 = vld [vmem:[#allocation2 + $0x78] sm:$0xff]  ;;  %v544_v6 = vrot.slane %v4600_v0, 1 }
  0x44   : > { %7015 = vst [vmem:[#allocation11_spill] sm:$0xff] %v4600_v0  ;;  %604 = vrot.lane.b32.xlu2 %v513_v57, %s4302_s4  ;;  %v4610_v8 = vshll.u32 %v4597_v63, 16  ;;  %v537_v32 = vsel %vm437_vm1, %v532_v9, %v536_v11  ;;  %v4633_v33 = vshrl.u32 %v4597_v63, 16  ;;  %v540_v44 = vor.u32 %v4621_v23, %v536_v11 }
  0x45   : > { %285 = vst.msk [vmem:[#allocation2 + $0x98] sm:$0xf] %vm246_vm0, %v241_v51  ;;  %v4614_v13 = vld [vmem:[#allocation2 + $0x80] sm:$0xff]  ;;  %v548_v19 = vor.u32 %v4605_v2, %v544_v6 }
  0x46   : > { %7016 = vst [vmem:[#allocation12_spill] sm:$0xff] %v4605_v2  ;;  %608 = vrot.lane.b32.xlu1 %v529_v1, %s4302_s4  ;;  %v552_v20 = vrot.slane %v4610_v8, 1  ;;  %v4636_v34 = vshll.u32 %v4614_v13, 16  ;;  %v545_v1 = vsel %vm437_vm1, %v540_v44, %v544_v6  ;;  %v4655_v9 = vshrl.u32 %v4614_v13, 16 }
  0x47   : > { %7017 = vst [vmem:[#allocation13_spill] sm:$0xff] %v4610_v8  ;;  %v1054_v2 = vrot.slane %v4513_v5, 2 }
  0x48   : > { %v4623_v25 = vld [vmem:[#allocation2 + $0x88] sm:$0xff]  ;;  %7020 = vst [vmem:[#allocation16_spill] sm:$0xff] %v4633_v33  ;;  %v553_v43 = vsel %vm437_vm1, %v548_v19, %v552_v20  ;;  %v556_v55 = vor.u32 %v4633_v33, %v552_v20  ;;  %v560_v57 = vrot.slane %v4636_v34, 1 }
  0x49   : > { %v4628_v31 = vshll.u32 %v4623_v25, 16  ;;  %7021 = vst [vmem:[#allocation17_spill] sm:$0xff] %v4636_v34  ;;  %v4642_v46 = vshrl.u32 %v4623_v25, 16 }
  0x4a   : > { %v4625_v26 = vld [vmem:[#allocation2 + $0x90] sm:$0xff]  ;;  %606 = vrot.lane.b32.xlu0 %v521_v18, %s4302_s4  ;;  %7024 = vst [vmem:[#allocation20_spill] sm:$0xff] %v4655_v9  ;;  %v561_v19 = vsel %vm437_vm1, %v556_v55, %v560_v57  ;;  %v630_v55 = vrot.slane %v4474_v47, 1  ;;  %v635_v47 = vrot.slane %v4423_v17, 1 }
  0x4b   : > { %7018 = vst [vmem:[#allocation14_spill] sm:$0xff] %v4625_v26  ;;  %v568_v45 = vrot.slane %v4628_v31, 1  ;;  %v4645_v51 = vshll.u32 %v4625_v26, 16  ;;  %v4662_v20 = vshrl.u32 %v4625_v26, 16 }
  0x4c   : > { %7019 = vst [vmem:[#allocation15_spill] sm:$0xff] %v4628_v31  ;;  %v326_v41 = vld [vmem:[#allocation2 + $0x98] sm:$0x1]  ;;  %610 = vrot.lane.b32.xlu2 %v537_v32, %s4302_s4  ;;  %v661_v31 = vrot.slane %v4623_v25, 1 }
  0x4d   : > { %7022 = vst [vmem:[#allocation18_spill] sm:$0xff] %v4642_v46  ;;  %v414_v54 = vunpack.c.l.b16 %v326_v41  ;;  %v572_v11 = vor.u32 %v4642_v46, %v568_v45  ;;  %v576_v18 = vrot.slane %v4645_v51, 1  ;;  %v564_v41 = vor.u32 %v4655_v9, %v560_v57  ;;  %v329_v9 = vld [vmem:[#allocation2 + $0x10] sm:$0xe] }
  0x4e   : > { %7023 = vst [vmem:[#allocation19_spill] sm:$0xff] %v4645_v51  ;;  %614 = vrot.lane.b32.xlu1 %v553_v43, %s4302_s4  ;;  %v709_v33 = vunpack.c.l.b16 %v329_v9 }
  0x4f   : > { %v4650_v62 = vpack.c.b16 %v414_v54, %v414_v54  ;;  %7025 = vst [vmem:[#allocation21_spill] sm:$0xff] %v4662_v20  ;;  %v577_v6 = vsel %vm437_vm1, %v572_v11, %v576_v18  ;;  %v580_v43 = vor.u32 %v4662_v20, %v576_v18  ;;  %v569_v54 = vsel %vm437_vm1, %v564_v41, %v568_v45 }
  0x50   : > { %v637_v45 = vrot.slane %v4445_v29, 1  ;;  %v657_v20 = vrot.slane %v4597_v63, 1 }
  0x51   : > { %v582_v32 = vshll.u32 %v4650_v62, 16  ;;  %v586_v18 = vshrl.u32 %v4650_v62, 16 }
  0x52   : > { %612 = vrot.lane.b32.xlu0 %v545_v1, %s4302_s4  ;;  %v631_v1 = vrot.slane %v4434_v22, 1  ;;  %v638_v41 = vsel %vm629_vm2, %v635_v47, %v637_v45 }
  0x53   : > { %v584_v44 = vrot.slane %v582_v32, 1 }
  0x54   : > { %616 = vrot.lane.b32.xlu2 %v561_v19, %s4302_s4  ;;  %v632_v11 = vsel %vm629_vm2, %v630_v55, %v631_v1  ;;  %v4679_v19 = vrot.slane %v4415_v12, 1 }
  0x55   : > { %v585_v57 = vsel %vm437_vm1, %v580_v43, %v584_v44  ;;  %v641_v44 = vrot.slane %v4482_v52, 1 }
  0x56   : > { %620 = vrot.lane.b32.xlu1 %v577_v6, %s4302_s4  ;;  %v634_v32 = vsel %vm629_vm2, %v631_v1, %v4679_v19  ;;  %v639_v6 = vrot.slane %v4455_v35, 1  ;;  %v636_v43 = vsel %vm629_vm2, %v4679_v19, %v635_v47  ;;  %v649_v47 = vrot.slane %v4546_v28, 1 }
  0x58   : > { %v640_v55 = vsel %vm629_vm2, %v637_v45, %v639_v6  ;;  %v4715_v51 = vsel %vm629_vm2, %v649_v47, %v651_v14 }
  0x5a   : > { %618 = vrot.lane.b32.xlu0 %v569_v54, %s4302_s4  ;;  %v643_v54 = vrot.slane %v4498_v61, 1 }
  0x5c   : > { %622 = vrot.lane.b32.xlu2 %v585_v57, %s4302_s4  ;;  %v644_v1 = vsel %vm629_vm2, %v641_v44, %v643_v54  ;;  %v645_v57 = vrot.slane %v4507_v3, 1 }
  0x5e   : > { %667 = vrot.lane.b32.xlu1 %v632_v11, %s4303_s5  ;;  %v642_v11 = vsel %vm629_vm2, %v639_v6, %v641_v44  ;;  %v653_v6 = vrot.slane %v4577_v50, 1  ;;  %v655_v44 = vrot.slane %v4584_v56, 1 }
  0x60   : > { %v4733_v46 = vsel %vm629_vm2, %v655_v44, %v657_v20 }
  0x61   : > { %7026 = vst [vmem:[#allocation22_spill] sm:$0xff] %v4733_v46 }
  0x62   : > { %624 = vrot.lane.b32.xlu0 %v586_v18, %s4302_s4  ;;  %v647_v18 = vrot.slane %v4529_v16, 1  ;;  %s4210_s4 = scalar_lea.hbm %s6963_s2, 288 }
  0x64   : > { %669 = vrot.lane.b32.xlu2 %v634_v32, %s4303_s5  ;;  %v646_v32 = vsel %vm629_vm2, %v643_v54, %v645_v57  ;;  %v650_v45 = vsel %vm629_vm2, %v647_v18, %v649_v47  ;;  %v648_v15 = vsel %vm629_vm2, %v645_v57, %v647_v18  ;;  %v4718_v54 = vsel %vm629_vm2, %v653_v6, %v655_v44  ;;  %v328_v47 = vld [vmem:[#allocation2 + $0x98] sm:$0x3] }
  0x65   : > { %v4726_v57 = vsel %vm629_vm2, %v651_v14, %v653_v6  ;;  %v659_v18 = vrot.slane %v4614_v13, 1  ;;  %v627_v34 = vunpack.c.l.b16 %v328_v47  ;;  %v4741_v14 = vrot.slane %v4625_v26, 1 }
  0x66   : > { %673 = vrot.lane.b32.xlu1 %v638_v41, %s4303_s5  ;;  %v3976_v6 = vunpack.c.h.b16 %v4434_v22  ;;  %v7001_v26 = vrot.slane %v4445_v29, 3 }
  0x67   : > { %v4736_v8 = vsel %vm629_vm2, %v659_v18, %v661_v31  ;;  %7028 = vst [vmem:[#allocation24_spill] sm:$0xff] %v4741_v14  ;;  %v4747_v44 = vsel %vm629_vm2, %v657_v20, %v659_v18  ;;  %v628_v47 = vpack.c.b16 %v627_v34, %v627_v34  ;;  %v4753_v27 = vsel %vm629_vm2, %v661_v31, %v4741_v14 }
  0x68   : > { %7027 = vst [vmem:[#allocation23_spill] sm:$0xff] %v4736_v8 }
  0x69   : > { %7029 = vst [vmem:[#allocation25_spill] sm:$0xff] %v4747_v44  ;;  %v665_v49 = vrot.slane %v628_v47, 1 }
  0x6a   : > { %671 = vrot.lane.b32.xlu0 %v636_v43, %s4303_s5  ;;  %7030 = vst [vmem:[#allocation26_spill] sm:$0xff] %v4753_v27 }
  0x6b   : > { %v666_v34 = vsel %vm629_vm2, %v4741_v14, %v665_v49  ;;  %v3980_v14 = vunpack.c.h.b16 %v4415_v12 }
  0x6c   : > { %675 = vrot.lane.b32.xlu2 %v640_v55, %s4303_s5 }
  0x6e   : > { %679 = vrot.lane.b32.xlu1 %v644_v1, %s4303_s5 }
  0x72   : > { %677 = vrot.lane.b32.xlu0 %v642_v11, %s4303_s5 }
  0x74   : > { %681 = vrot.lane.b32.xlu2 %v646_v32, %s4303_s5 }
  0x76   : > { %685 = vrot.lane.b32.xlu1 %v650_v45, %s4303_s5 }
  0x7a   : > { %683 = vrot.lane.b32.xlu0 %v648_v15, %s4303_s5 }
  0x7c   : > { %687 = vrot.lane.b32.xlu2 %v4715_v51, %s4303_s5 }
  0x7e   : > { %691 = vrot.lane.b32.xlu1 %v4718_v54, %s4303_s5 }
  0x82   : > { %689 = vrot.lane.b32.xlu0 %v4726_v57, %s4303_s5 }
  0x84   : > { %693 = vrot.lane.b32.xlu2 %v4733_v46, %s4303_s5  ;;  %v713_v46 = vpack.c.b16 %v3976_v6, %v709_v33  ;;  %v333_v33 = vld [vmem:[#allocation2 + $0x10] sm:$0xc] }
  0x86   : > { %697 = vrot.lane.b32.xlu1 %v4736_v8, %s4303_s5  ;;  %v716_v22 = vrot.slane %v713_v46, 1  ;;  %v761_v46 = vunpack.c.l.b16 %v333_v33 }
  0x88   : > { %v717_v20 = vsel %vm629_vm2, %v716_v22, %v4679_v19  ;;  %v339_v22 = vld [vmem:[#allocation2 + $0x18] sm:$0x8] }
  0x8a   : > { %695 = vrot.lane.b32.xlu0 %v4747_v44, %s4303_s5  ;;  %v335_v44 = vld [vmem:[#allocation2 + $0x18] sm:$0xc] }
  0x8c   : > { %699 = vrot.lane.b32.xlu2 %v4753_v27, %s4303_s5  ;;  %v776_v27 = vrot.slane %v4448_v30, 1 }
  0x8e   : > { %v4757_v9 = vpop.permute.xlu2 %596  ;;  %703 = vrot.lane.b32.xlu1 %v665_v49, %s4303_s5  ;;  %v762_v49 = vpack.c.b16 %v3976_v6, %v761_v46  ;;  %v7035_v46 = vshll.u32 %v4415_v12, 16 }
  0x8f   : > { %7031 = vst [vmem:[#allocation27_spill] sm:$0xff] %v4757_v9 }
  0x92   : > { %701 = vrot.lane.b32.xlu0 %v666_v34, %s4303_s5  ;;  %v768_v34 = vshll.u32 %v762_v49, 16 }
  0x94   : > { %722 = vrot.lane.b32.xlu2 %v717_v20, %s4304_s6  ;;  %v770_v6 = vrot.slane %v768_v34, 2 }
  0x96   : > { %v4766_v31 = vpop.permute.xlu2 %598  ;;  %726 = vrot.lane.b32.xlu1 %v638_v41, %s4304_s6  ;;  %v765_v41 = vshrl.u32 %v762_v49, 16 }
  0x9a   : > { %724 = vrot.lane.b32.xlu0 %v636_v43, %s4304_s6 }
  0x9c   : > { %728 = vrot.lane.b32.xlu2 %v640_v55, %s4304_s6  ;;  %v1027_v55 = vunpack.c.l.b16 %v339_v22 }
  0x9e   : > { %v4771_v18 = vpop.permute.xlu2 %604  ;;  %732 = vrot.lane.b32.xlu1 %v644_v1, %s4304_s6  ;;  %v767_v1 = vrot.slane %v765_v41, 1  ;;  %v1028_v8 = vpack.c.b16 %v3980_v14, %v1027_v55  ;;  %v896_v55 = vrot.slane %v762_v49, 2 }
  0xa0   : > { %v4774_v47 = vpop.permute.xlu1 %592  ;;  %v771_v41 = vor.u32 %v770_v6, %v767_v1  ;;  %v1034_v9 = vshll.u32 %v1028_v8, 16 }
  0xa1   : > { %7032 = vst [vmem:[#allocation28_spill] sm:$0xff] %v4774_v47 }
  0xa2   : > { %730 = vrot.lane.b32.xlu0 %v642_v11, %s4304_s6  ;;  %v7034_v11 = vshrl.u32 %v4415_v12, 16  ;;  %v1036_v6 = vrot.slane %v1034_v9, 3  ;;  %v788_v9 = vrot.slane %v4518_v7, 1 }
  0xa4   : > { %v4777_v19 = vpop.permute.xlu0 %590  ;;  %734 = vrot.lane.b32.xlu2 %v646_v32, %s4304_s6  ;;  %v772_v33 = vrot.slane %v7034_v11, 1  ;;  %v773_v32 = vrot.slane %v7035_v46, 2 }
  0xa5   : > { %7033 = vst [vmem:[#allocation29_spill] sm:$0xff] %v4777_v19  ;;  %v1031_v19 = vshrl.u32 %v1028_v8, 16 }
  0xa6   : > { %v4780_v43 = vpop.permute.xlu2 %610  ;;  %738 = vrot.lane.b32.xlu1 %v650_v45, %s4304_s6  ;;  %v777_v45 = vrot.slane %v4432_v21, 2  ;;  %v774_v34 = vor.u32 %v773_v32, %v772_v33  ;;  %v1038_v33 = vrot.slane %v4448_v30, 2 }
  0xa8   : > { %v4783_v20 = vpop.permute.xlu1 %594  ;;  %v4801_v46 = vor.u32 %v777_v45, %v776_v27  ;;  %v1033_v27 = vrot.slane %v1031_v19, 2 }
  0xaa   : > { %736 = vrot.lane.b32.xlu0 %v648_v15, %s4304_s6  ;;  %v975_v15 = vunpack.c.l.b16 %v335_v44  ;;  %v779_v44 = vsel %vm763_vm3, %v774_v34, %v4801_v46  ;;  %v1037_v49 = vor.u32 %v1036_v6, %v1033_v27 }
  0xac   : > { %v4793_v22 = vpop.permute.xlu0 %588  ;;  %740 = vrot.lane.b32.xlu2 %v4715_v51, %s4304_s6  ;;  %v979_v0 = vpack.c.b16 %v3980_v14, %v975_v15  ;;  %v775_v51 = vsel %vm763_vm3, %v771_v41, %v774_v34  ;;  %v1039_v14 = vrot.slane %v4432_v21, 3  ;;  %v784_v21 = vrot.slane %v4485_v53, 1 }
  0xad   : > { %v789_v41 = vrot.slane %v4496_v60, 2 }
  0xae   : > { %v4797_v11 = vpop.permute.xlu2 %616  ;;  %744 = vrot.lane.b32.xlu1 %v4718_v54, %s4304_s6  ;;  %v897_v54 = vrot.slane %v4415_v12, 2  ;;  %v982_v32 = vrot.slane %v979_v0, 2  ;;  %v1040_v15 = vor.u32 %v1039_v14, %v1038_v33  ;;  %v785_v0 = vrot.slane %v4469_v42, 2 }
  0xaf   : > { %v1162_v33 = vrot.slane %v1028_v8, 3  ;;  %v1163_v14 = vrot.slane %v4423_v17, 3  ;;  %v793_v8 = vrot.slane %v4510_v4, 2 }
  0xb0   : > { %v4803_v47 = vpop.permute.xlu1 %602  ;;  %v898_v12 = vsel %vm895_vm4, %v896_v55, %v897_v54  ;;  %v790_v55 = vor.u32 %v789_v41, %v788_v9  ;;  %v905_v9 = vrot.slane %v4482_v52, 2 }
  0xb2   : > { %742 = vrot.lane.b32.xlu0 %v4726_v57, %s4304_s6  ;;  %v899_v57 = vrot.slane %v4423_v17, 2 }
  0xb4   : > { %v4811_v1 = vpop.permute.xlu0 %600  ;;  %854 = vrot.lane.b32.xlu2 %v775_v51, %s4305_s7  ;;  %v983_v30 = vsel %vm895_vm4, %v982_v32, %v899_v57  ;;  %v1041_v51 = vsel %vm1029_vm5, %v1037_v49, %v1040_v15  ;;  %v900_v6 = vsel %vm895_vm4, %v897_v54, %v899_v57  ;;  %v6995_v49 = vrot.slane %v4445_v29, 2 }
  0xb5   : > { %v6996_v54 = vrot.slane %v4455_v35, 2 }
  0xb6   : > { %v4817_v45 = vpop.permute.xlu2 %622  ;;  %856 = vrot.lane.b32.xlu1 %v779_v44, %s4305_s7  ;;  %v4833_v44 = vor.u32 %v785_v0, %v784_v21  ;;  %v1164_v21 = vsel %vm1161_vm6, %v1162_v33, %v1163_v14  ;;  %v792_v0 = vrot.slane %v4513_v5, 1  ;;  %v1043_v33 = vrot.slane %v4458_v36, 3 }
  0xb7   : > { %v7003_v5 = vrot.slane %v4482_v52, 3 }
  0xb8   : > { %v4821_v19 = vpop.permute.xlu1 %608  ;;  %7036 = vst [vmem:[#allocation30_spill] sm:$0xff] %v4833_v44 }
  0xba   : > { %933 = vrot.lane.b32.xlu0 %v898_v12, %s4306_s8  ;;  %v791_v12 = vsel %vm763_vm3, %v4833_v44, %v790_v55 }
  0xbc   : > { %v4829_v34 = vpop.permute.xlu0 %606  ;;  %988 = vrot.lane.b32.xlu2 %v983_v30, %s4307_s9 }
  0xbe   : > { %v4835_v27 = vpop.permute.xlu2 %669  ;;  %1120 = vrot.lane.b32.xlu1 %v1041_v51, %s4308_s10  ;;  %v4860_v51 = vsel %vm895_vm4, %v899_v57, %v6995_v49 }
  0xbf   : > { %7037 = vst [vmem:[#allocation31_spill] sm:$0xff] %v4835_v27  ;;  %v4864_v27 = vor.u32 %v793_v8, %v792_v0  ;;  %v907_v0 = vrot.slane %v4498_v61, 2  ;;  %v1254_v8 = vsel %vm1237_vm7, %v4498_v61, %v4803_v47  ;;  %v1051_v47 = vrot.slane %v4496_v60, 3 }
  0xc0   : > { %v4840_v32 = vpop.permute.xlu1 %614  ;;  %v1166_v60 = vsel %vm1161_vm6, %v1163_v14, %v7001_v26  ;;  %v7004_v14 = vrot.slane %v4507_v3, 2 }
  0xc1   : > { %v795_v49 = vsel %vm763_vm3, %v790_v55, %v4864_v27  ;;  %v908_v55 = vsel %vm895_vm4, %v905_v9, %v907_v0 }
  0xc2   : > { %935 = vrot.lane.b32.xlu0 %v900_v6, %s4306_s8  ;;  %v1042_v6 = vrot.slane %v4461_v37, 2 }
  0xc4   : > { %v4846_v30 = vpop.permute.xlu0 %612  ;;  %862 = vrot.lane.b32.xlu2 %v791_v12, %s4305_s7  ;;  %v4875_v44 = vor.u32 %v1043_v33, %v1042_v6 }
  0xc6   : > { %v4854_v41 = vpop.permute.xlu2 %675  ;;  %1199 = vrot.lane.b32.xlu1 %v1164_v21, %s4309_s11  ;;  %v4873_v21 = vsel %vm895_vm4, %v6996_v54, %v905_v9  ;;  %v1045_v6 = vsel %vm1029_vm5, %v1040_v15, %v4875_v44 }
  0xc7   : > { %7038 = vst [vmem:[#allocation32_spill] sm:$0xff] %v4854_v41  ;;  %v1050_v41 = vrot.slane %v4518_v7, 2 }
  0xc8   : > { %v4866_v12 = vpop.permute.xlu1 %620  ;;  %7039 = vst [vmem:[#allocation33_spill] sm:$0xff] %v4873_v21 }
  0xca   : > { %990 = vrot.lane.b32.xlu0 %v4860_v51, %s4307_s9 }
  0xcc   : > { %v4877_v57 = vpop.permute.xlu0 %618  ;;  %941 = vrot.lane.b32.xlu2 %v4873_v21, %s4306_s8 }
  0xce   : > { %v682_v54 = vpop.permute.xlu2 %681  ;;  %864 = vrot.lane.b32.xlu1 %v795_v49, %s4305_s7  ;;  %v1055_v49 = vrot.slane %v4510_v4, 3 }
  0xcf   : > { %v4891_v33 = vsel %vm1277_vm8, %v1254_v8, %v682_v54  ;;  %v4905_v54 = vor.u32 %v1051_v47, %v1050_v41  ;;  %v1260_v8 = vsel %vm1237_vm7, %v4546_v28, %v4821_v19  ;;  %v1171_v41 = vrot.slane %v4498_v61, 3 }
  0xd0   : > { %v4894_v21 = vpop.permute.xlu1 %667  ;;  %v1056_v9 = vor.u32 %v1055_v49, %v1054_v2  ;;  %v1058_v2 = vrot.slane %v4538_v24, 2  ;;  %v1059_v19 = vrot.slane %v4524_v10, 3  ;;  %v780_v61 = vrot.slane %v4461_v37, 1 }
  0xd1   : > { %7040 = vst [vmem:[#allocation34_spill] sm:$0xff] %v4905_v54  ;;  %v1172_v49 = vsel %vm1161_vm6, %v7003_v5, %v1171_v41 }
  0xd2   : > { %1122 = vrot.lane.b32.xlu0 %v1045_v6, %s4308_s10 }
  0xd4   : > { %v4902_v15 = vpop.permute.xlu0 %624  ;;  %996 = vrot.lane.b32.xlu2 %v908_v55, %s4307_s9 }
  0xd6   : > { %v688_v7 = vpop.permute.xlu2 %687  ;;  %943 = vrot.lane.b32.xlu1 %v908_v55, %s4306_s8  ;;  %v1057_v55 = vsel %vm1029_vm5, %v4905_v54, %v1056_v9  ;;  %v4944_v54 = vsel %vm895_vm4, %v907_v0, %v7004_v14  ;;  %v1272_v14 = vsel %vm1237_vm7, %v4623_v25, %v4866_v12 }
  0xd7   : > { %v4915_v4 = vsel %vm1277_vm8, %v1260_v8, %v688_v7  ;;  %v781_v8 = vrot.slane %v4458_v36, 2  ;;  %v4935_v7 = vor.u32 %v1059_v19, %v1058_v2  ;;  %v1252_v2 = vsel %vm1237_vm7, %v4482_v52, %v4811_v1 }
  0xd8   : > { %v4919_v6 = vpop.permute.xlu1 %673 }
  0xd9   : > { %v4949_v36 = vor.u32 %v781_v8, %v780_v61  ;;  %v809_v61 = vrot.slane %v4572_v48, 2 }
  0xda   : > { %1201 = vrot.lane.b32.xlu0 %v1166_v60, %s4309_s11  ;;  %v1266_v60 = vsel %vm1237_vm7, %v4584_v56, %v4840_v32  ;;  %v1061_v32 = vsel %vm1029_vm5, %v1056_v9, %v4935_v7  ;;  %v1250_v9 = vsel %vm1237_vm7, %v4455_v35, %v4766_v31  ;;  %v7042_v31 = vrot.slane %v4507_v3, 3 }
  0xdc   : > { %v4927_v47 = vpop.permute.xlu0 %671  ;;  %1128 = vrot.lane.b32.xlu2 %v1057_v55, %s4308_s10  ;;  %v804_v55 = vrot.slane %v4561_v40, 1 }
  0xde   : > { %v694_v26 = vpop.permute.xlu2 %693  ;;  %1207 = vrot.lane.b32.xlu1 %v1172_v49, %s4309_s11  ;;  %v808_v49 = vrot.slane %v4590_v58, 1 }
  0xdf   : > { %v4947_v37 = vsel %vm1277_vm8, %v1266_v60, %v694_v26  ;;  %v805_v26 = vrot.slane %v4558_v39, 2  ;;  %v783_v60 = vsel %vm763_vm3, %v4801_v46, %v4949_v36 }
  0xe0   : > { %7041 = vst [vmem:[#allocation35_spill] sm:$0xff] %v4947_v37  ;;  %v680_v19 = vpop.permute.xlu1 %679  ;;  %v810_v5 = vor.u32 %v809_v61, %v808_v49  ;;  %v1174_v37 = vsel %vm1161_vm6, %v1171_v41, %v7042_v31  ;;  %v812_v41 = vrot.slane %v4621_v23, 1  ;;  %v4071_v61 = vld [vmem:[#allocation2 + $0x8] sm:$0xff]  }
  0xe1   : > { %v4960_v0 = vsel %vm1277_vm8, %v1252_v2, %v680_v19  ;;  %v4976_v19 = vor.u32 %v805_v26, %v804_v55  ;;  %v915_v55 = vrot.slane %v4555_v38, 2  ;;  %v1258_v26 = vsel %vm1237_vm7, %v4529_v16, %v4829_v34 }
  0xe2   : > { %998 = vrot.lane.b32.xlu0 %v4944_v54, %s4307_s9 }
  0xe3   : > { %v811_v25 = vsel %vm763_vm3, %v4976_v19, %v810_v5 }
  0xe4   : > { %v678_v8 = vpop.permute.xlu0 %677  ;;  %1130 = vrot.lane.b32.xlu2 %v1061_v32, %s4308_s10  ;;  %v913_v32 = vrot.slane %v4546_v28, 2 }
  0xe5   : > { %v4974_v2 = vsel %vm1277_vm8, %v1250_v9, %v678_v8  ;;  %v1240_v8 = vsel %vm1237_vm7, %v4071_v61, %v4793_v22 }
  0xe6   : > { %v700_v1 = vpop.permute.xlu2 %699  ;;  %858 = vrot.lane.b32.xlu1 %v783_v60, %s4305_s7  ;;  %v5007_v34 = vsel %vm895_vm4, %v913_v32, %v915_v55 }
  0xe7   : > { %v4986_v46 = vsel %vm1277_vm8, %v1272_v14, %v700_v1  ;;  %v813_v14 = vrot.slane %v4593_v59, 2  ;;  %v1256_v1 = vsel %vm1237_vm7, %v4507_v3, %v4771_v18  ;;  %v1279_v18 = vsel %vm1277_vm8, %v1240_v8, %v4894_v21 }
  0xe8   : > { %v686_v49 = vpop.permute.xlu1 %685  ;;  %v1074_v8 = vrot.slane %v4621_v23, 2  ;;  %v1046_v23 = vrot.slane %v4485_v53, 2  ;;  %v796_v53 = vrot.slane %v4538_v24, 1 }
  0xe9   : > { %v4997_v12 = vsel %vm1277_vm8, %v1258_v26, %v686_v49  ;;  %v5015_v60 = vor.u32 %v813_v14, %v812_v41  ;;  %v917_v26 = vrot.slane %v4577_v50, 2  ;;  %v1262_v41 = vsel %vm1237_vm7, %v4555_v38, %v4780_v43 }
  0xea   : > { %1209 = vrot.lane.b32.xlu0 %v1174_v37, %s4309_s11  ;;  %v1246_v43 = vsel %vm1237_vm7, %v4423_v17, %v4783_v20 }
  0xeb   : > { %v815_v22 = vsel %vm763_vm3, %v810_v5, %v5015_v60  ;;  %v918_v14 = vsel %vm895_vm4, %v915_v55, %v917_v26  ;;  %v1285_v55 = vsel %vm1277_vm8, %v1246_v43, %v4919_v6  ;;  %v1270_v6 = vsel %vm1237_vm7, %v4614_v13, %v4877_v57 }
  0xec   : > { %v684_v9 = vpop.permute.xlu0 %683  ;;  %872 = vrot.lane.b32.xlu2 %v811_v25, %s4305_s7  ;;  %v1264_v25 = vsel %vm1237_vm7, %v4577_v50, %v4846_v30  ;;  %v1071_v30 = vrot.slane %v4572_v48, 3  ;;  %v7043_v48 = vrot.slane %v4455_v35, 2 }
  0xed   : > { %v5011_v37 = vsel %vm1277_vm8, %v1256_v1, %v684_v9  ;;  %v1070_v9 = vrot.slane %v4590_v58, 2  ;;  %v7044_v58 = vrot.slane %v4445_v29, 2 }
  0xee   : > { %v723_v31 = vpop.permute.xlu2 %722  ;;  %951 = vrot.lane.b32.xlu1 %v5007_v34, %s4306_s8 }
  0xef   : > { %v5023_v49 = vsel %vm7010_vm9, %v1279_v18, %v723_v31  ;;  %v1047_v31 = vrot.slane %v4469_v42, 3  ;;  %v5065_v17 = vor.u32 %v1071_v30, %v1070_v9  ;;  %v797_v42 = vrot.slane %v4524_v10, 2 }
  0xf0   : > { %v692_v1 = vpop.permute.xlu1 %691 }
  0xf1   : > { %v5033_v21 = vsel %vm1277_vm8, %v1264_v25, %v692_v1  ;;  %v5088_v30 = vor.u32 %v797_v42, %v796_v53  ;;  %v4183_v42 = vld [vmem:[#allocation2 + $0x18] sm:$0xff]  }
  0xf2   : > { %937 = vrot.lane.b32.xlu0 %v4860_v51, %s4306_s8  ;;  %v1075_v51 = vrot.slane %v4593_v59, 3  ;;  %v5058_v59 = vsel %vm895_vm4, %v7044_v58, %v7043_v48  ;;  %v7048_v58 = vld [vmem:[#allocation12_spill] sm:$0xff] }
  0xf3   : > { %v799_v43 = vsel %vm763_vm3, %v4864_v27, %v5088_v30 }
  0xf4   : > { %v690_v61 = vpop.permute.xlu0 %689  ;;  %874 = vrot.lane.b32.xlu2 %v815_v22, %s4305_s7  ;;  %v1076_v20 = vor.u32 %v1075_v51, %v1074_v8  ;;  %v1167_v8 = vrot.slane %v4455_v35, 3 }
  0xf5   : > { %v5045_v5 = vsel %vm1277_vm8, %v1262_v41, %v690_v61  ;;  %v5077_v41 = vor.u32 %v1047_v31, %v1046_v23  ;;  %v1268_v61 = vsel %vm1237_vm7, %v4597_v63, %v4797_v11  ;;  %v1078_v23 = vrot.slane %v7048_v58, 2  ;;  %v7049_v31 = vld [vmem:[#allocation11_spill] sm:$0xff] }
  0xf6   : > { %v729_v18 = vpop.permute.xlu2 %728  ;;  %1006 = vrot.lane.b32.xlu1 %v918_v14, %s4307_s9  ;;  %v1077_v13 = vsel %vm1029_vm5, %v5065_v17, %v1076_v20  ;;  %v1079_v27 = vrot.slane %v7049_v31, 3 }
  0xf7   : > { %v5063_v25 = vsel %vm7010_vm9, %v1285_v55, %v729_v18  ;;  %v1049_v10 = vsel %vm1029_vm5, %v4875_v44, %v5077_v41  ;;  %v919_v44 = vrot.slane %v4584_v56, 2 }
  0xf8   : > { %v698_v1 = vpop.permute.xlu1 %697 }
  0xf9   : > { %v5073_v22 = vsel %vm1277_vm8, %v1270_v6, %v698_v1  ;;  %v7005_v1 = vrot.slane %v4555_v38, 3 }
  0xfa   : > { %992 = vrot.lane.b32.xlu0 %v5058_v59, %s4307_s9 }
  0xfc   : > { %v696_v9 = vpop.permute.xlu0 %695  ;;  %953 = vrot.lane.b32.xlu2 %v918_v14, %s4306_s8  ;;  %v1276_v14 = vsel %vm1237_vm7, %v4650_v62, %v4902_v15  ;;  %v7047_v62 = vrot.slane %v4445_v29, 3  ;;  %v5130_v29 = vsel %vm895_vm4, %v917_v26, %v919_v44 }
  0xfd   : > { %v5086_v57 = vsel %vm1277_vm8, %v1268_v61, %v696_v9  ;;  %v7051_v61 = vld [vmem:[#allocation28_spill] sm:$0xff] }
  0xfe   : > { %v735_v24 = vpop.permute.xlu2 %734  ;;  %1138 = vrot.lane.b32.xlu1 %v1077_v13, %s4308_s10  ;;  %v1168_v15 = vsel %vm1161_vm6, %v7047_v62, %v1167_v8  ;;  %v1244_v9 = vsel %vm1237_vm7, %v4183_v42, %v7051_v61  ;;  %v4184_v42 = vld [vmem:[#allocation2 + $0x28] sm:$0xff]  ;;  %v7055_v61 = vld [vmem:[#allocation27_spill] sm:$0xff] }
  0xff   : > { %v5096_v11 = vsel %vm7010_vm9, %v4960_v0, %v735_v24  ;;  %v7046_v0 = vld [vmem:[#allocation14_spill] sm:$0xff]  ;;  %v5138_v24 = vor.u32 %v1079_v27, %v1078_v23 }
 0x100   : > { %v704_v51 = vpop.permute.xlu1 %703  ;;  %v1274_v18 = vsel %vm1237_vm7, %v7046_v0, %v4817_v45  ;;  %v1181_v45 = vrot.slane %v4577_v50, 3  ;;  %v1283_v50 = vsel %vm1277_vm8, %v1244_v9, %v4927_v47  ;;  %v1248_v9 = vsel %vm1237_vm7, %v4184_v42, %v7055_v61 }
 0x101   : > { %v5107_v55 = vsel %vm1277_vm8, %v1276_v14, %v704_v51 }
 0x102   : > { %1124 = vrot.lane.b32.xlu0 %v1049_v10, %s4308_s10  ;;  %7045 = vst [vmem:[#allocation36_spill] sm:$0xff] %v5107_v55  ;;  %v1182_v26 = vsel %vm1161_vm6, %v7005_v1, %v1181_v45  ;;  %v242_v1 = vld [vmem:[%s4393_s30 + $0x9c] sm:$0xf] }
 0x103   : > { %286 = vst.msk [vmem:[#allocation2 + $0x9c] sm:$0xf] %vm246_vm0, %v242_v1  ;;  %v7076_v55 = vld [vmem:[#allocation26_spill] sm:$0xff] }
 0x104   : > { %v702_v48 = vpop.permute.xlu0 %701  ;;  %866 = vrot.lane.b32.xlu2 %v799_v43, %s4305_s7  ;;  %v7052_v43 = vld [vmem:[#allocation10_spill] sm:$0xff] }
 0x105   : > { %v5122_v6 = vsel %vm1277_vm8, %v1274_v18, %v702_v48  ;;  %v1062_v0 = vrot.slane %v7052_v43, 2  ;;  %v7053_v18 = vld [vmem:[#allocation9_spill] sm:$0xff]  ;;  %v911_v48 = vrot.slane %v4529_v16, 2 }
 0x106   : > { %7050 = vst [vmem:[#allocation14_spill] sm:$0xff] %v5122_v6  ;;  %v741_v53 = vpop.permute.xlu2 %740  ;;  %1203 = vrot.lane.b32.xlu1 %v1168_v15, %s4309_s11  ;;  %v1063_v47 = vrot.slane %v7053_v18, 3 }
 0x107   : > { %v5136_v13 = vsel %vm7010_vm9, %v4997_v12, %v741_v53  ;;  %v1081_v12 = vsel %vm1029_vm5, %v1076_v20, %v5138_v24  ;;  %v7054_v20 = vrot.slane %v4507_v3, 2 }
 0x108   : > { %v727_v10 = vpop.permute.xlu1 %726  ;;  %v5161_v15 = vor.u32 %v1063_v47, %v1062_v0  ;;  %v7007_v0 = vrot.slane %v4529_v16, 3 }
 0x109   : > { %v5148_v14 = vsel %vm7010_vm9, %v1283_v50, %v727_v10  ;;  %v5170_v27 = vsel %vm895_vm4, %v7054_v20, %v911_v48  ;;  %v1183_v50 = vrot.slane %v4584_v56, 3  ;;  %v7056_v10 = vld [vmem:[#allocation32_spill] sm:$0xff] }
 0x10a   : > { %1008 = vrot.lane.b32.xlu0 %v5130_v29, %s4307_s9 }
 0x10c   : > { %v5150_v51 = vpop.permute.xlu0 %724  ;;  %1217 = vrot.lane.b32.xlu2 %v1182_v26, %s4309_s11 }
 0x10e   : > { %v5158_v62 = vpop.permute.xlu2 %854  ;;  %1140 = vrot.lane.b32.xlu1 %v1081_v12, %s4308_s10  ;;  %v1065_v12 = vsel %vm1029_vm5, %v4935_v7, %v5161_v15  ;;  %v7057_v7 = vrot.slane %v4507_v3, 3 }
 0x110   : > { %v733_v23 = vpop.permute.xlu1 %732  ;;  %v1176_v42 = vsel %vm1161_vm6, %v7057_v7, %v7007_v0 }
 0x111   : > { %v5174_v53 = vsel %vm7010_vm9, %v4974_v2, %v733_v23  ;;  %v1184_v23 = vsel %vm1161_vm6, %v1181_v45, %v1183_v50  ;;  %v1558_v45 = vld [vmem:[%s6962_s1 + $0x20] sm:$0xf] }
 0x112   : > { %945 = vrot.lane.b32.xlu0 %v4944_v54, %s4306_s8  ;;  %v1287_v54 = vsel %vm1277_vm8, %v1248_v9, %v7056_v10  ;;  %v816_v9 = vrot.slane %v7048_v58, 1  ;;  %v817_v10 = vrot.slane %v7049_v31, 2  ;;  %v7058_v58 = vld [vmem:[#allocation30_spill] sm:$0xff] }
 0x113   : > { %v787_v31 = vsel %vm763_vm3, %v4949_v36, %v7058_v58  ;;  %v7060_v58 = vld [vmem:[#allocation34_spill] sm:$0xff] }
 0x114   : > { %v731_v26 = vpop.permute.xlu0 %730  ;;  %1000 = vrot.lane.b32.xlu2 %v5170_v27, %s4307_s9 }
 0x115   : > { %v5187_v2 = vsel %vm7010_vm9, %v1287_v54, %v731_v26  ;;  %v1705_v26 = vunpack.c.l.b16 %v1558_v45  ;;  %v3967_v45 = vld [vmem:[%s6962_s1 + $0x10] sm:$0xff] }
 0x116   : > { %v5190_v47 = vpop.permute.xlu2 %988  ;;  %1132 = vrot.lane.b32.xlu1 %v1065_v12, %s4308_s10  ;;  %v5216_v12 = vor.u32 %v817_v10, %v816_v9  ;;  %v801_v10 = vrot.slane %v7053_v18, 2 }
 0x118   : > { %v739_v20 = vpop.permute.xlu1 %738 }
 0x119   : > { %v5204_v61 = vsel %vm7010_vm9, %v5011_v37, %v739_v20 }
 0x11a   : > { %1219 = vrot.lane.b32.xlu0 %v1184_v23, %s4309_s11  ;;  %v1710_v23 = vpack.c.b16 %v1705_v26, %v1705_v26  ;;  %v7059_v26 = vld [vmem:[#allocation33_spill] sm:$0xff] }
 0x11c   : > { %v737_v54 = vpop.permute.xlu0 %736  ;;  %1211 = vrot.lane.b32.xlu2 %v1176_v42, %s4309_s11  ;;  %v1772_v7 = vsel %vm1770_vm10, %v1710_v23, 0 }
 0x11d   : > { %v5214_v3 = vsel %vm7010_vm9, %v4891_v33, %v737_v54  ;;  %v819_v33 = vsel %vm763_vm3, %v5015_v60, %v5216_v12  ;;  %1777 = vmatpush.bf16.msra.mxu0 %v1772_v7  ;;  %4094 = vmatpush.bf16.msra.mxu1 %v1772_v7  ;;  %v7006_v54 = vrot.slane %v4597_v63, 2 }
 0x11e   : > { %v5218_v37 = vpop.permute.xlu2 %862  ;;  %939 = vrot.lane.b32.xlu1 %v5058_v59, %s4306_s8  ;;  %v3968_v59 = vld [vmem:[%s6962_s1 + $0x18] sm:$0xff]  ;;  %4095 = vmatpush.bf16.msra.mxu2 %v1772_v7 }
 0x11f   : > { %4096 = vmatpush.bf16.msra.mxu3 %v1772_v7  ;;  %v5268_v23 = vsel %vm895_vm4, %v919_v44, %v7006_v54 }
 0x120   : > { %v745_v20 = vpop.permute.xlu1 %744 }
 0x121   : > { %v5231_v42 = vsel %vm7010_vm9, %v5045_v5, %v745_v20  ;;  %1778 = vmatpush.bf16.msra.mxu0 %v3968_v59  ;;  %v800_v5 = vrot.slane %v7052_v43, 1  ;;  %4097 = vmatpush.bf16.msra.mxu1 %v3968_v59  ;;  %v3966_v43 = vld [vmem:[%s6962_s1 + $0x8] sm:$0xff] }
 0x122   : > { %860 = vrot.lane.b32.xlu0 %v787_v31, %s4305_s7  ;;  %4098 = vmatpush.bf16.msra.mxu2 %v3968_v59  ;;  %v7061_v20 = vld [vmem:[#allocation16_spill] sm:$0xff] }
 0x123   : > { %4099 = vmatpush.bf16.msra.mxu3 %v3968_v59  ;;  %v5261_v18 = vor.u32 %v801_v10, %v800_v5  ;;  %v1082_v7 = vrot.slane %v7061_v20, 2  ;;  %v3965_v5 = vld [vmem:[%s6962_s1] sm:$0xff] }
 0x124   : > { %v743_v36 = vpop.permute.xlu0 %742  ;;  %876 = vrot.lane.b32.xlu2 %v819_v33, %s4305_s7  ;;  %v7062_v33 = vld [vmem:[#allocation13_spill] sm:$0xff] }
 0x125   : > { %v5239_v9 = vsel %vm7010_vm9, %v4915_v4, %v743_v36  ;;  %1779 = vmatpush.bf16.msra.mxu0 %v3967_v45  ;;  %4100 = vmatpush.bf16.msra.mxu1 %v3967_v45  ;;  %v803_v36 = vsel %vm763_vm3, %v5088_v30, %v5261_v18  ;;  %v1066_v30 = vrot.slane %v4561_v40, 2 }
 0x126   : > { %v5241_v60 = vpop.permute.xlu2 %941  ;;  %955 = vrot.lane.b32.xlu1 %v5130_v29, %s4306_s8  ;;  %v1053_v29 = vsel %vm1029_vm5, %v5077_v41, %v7060_v58  ;;  %v1083_v41 = vrot.slane %v7062_v33, 3  ;;  %4101 = vmatpush.bf16.msra.mxu2 %v3967_v45  ;;  %v1067_v58 = vrot.slane %v4558_v39, 3  ;;  %v5309_v39 = vsel %vm895_vm4, %v911_v48, %v913_v32  ;;  %v5321_v32 = vld [vmem:[#allocation2 + $0x58] sm:$0xff] }
 0x127   : > { %4102 = vmatpush.bf16.msra.mxu3 %v3967_v45  ;;  %v7063_v45 = vrot.slane %v4482_v52, 3  ;;  %v7068_v56 = vrot.slane %v5321_v32, 3 }
 0x128   : > { %v5251_v4 = vpop.permute.xlu1 %856  ;;  %v5280_v44 = vor.u32 %v1083_v41, %v1082_v7  ;;  %v5300_v35 = vor.u32 %v1067_v58, %v1066_v30  ;;  %v7064_v41 = vld [vmem:[#allocation20_spill] sm:$0xff] }
 0x129   : > { %1780 = vmatpush.bf16.msra.mxu0 %v3966_v43  ;;  %4103 = vmatpush.bf16.msra.mxu1 %v3966_v43 }
 0x12a   : > { %994 = vrot.lane.b32.xlu0 %v7059_v26, %s4307_s9  ;;  %4104 = vmatpush.bf16.msra.mxu2 %v3966_v43  ;;  %v1170_v26 = vsel %vm1161_vm6, %v1167_v8, %v7063_v45  ;;  %v1069_v40 = vsel %vm1029_vm5, %v5161_v15, %v5300_v35  ;;  %v7066_v45 = vld [vmem:[#allocation18_spill] sm:$0xff]  ;;  %v1357_v15 = vsel %vm1355_vm11, %v5023_v49, %v5158_v62  ;;  %v7069_v62 = vrot.slane %v4529_v16, 3 }
 0x12b   : > { %4105 = vmatpush.bf16.msra.mxu3 %v3966_v43  ;;  %v1085_v43 = vsel %vm1029_vm5, %v5138_v24, %v5280_v44  ;;  %v7008_v24 = vrot.slane %v4597_v63, 3  ;;  %v828_v28 = vrot.slane %v7066_v45, 1 }
 0x12c   : > { %v934_v31 = vpop.permute.xlu0 %933  ;;  %1126 = vrot.lane.b32.xlu2 %v1053_v29, %s4308_s10 }
 0x12d   : > { %1781 = vmatpush.bf16.msra.mxu0 %v3965_v5  ;;  %4106 = vmatpush.bf16.msra.mxu1 %v3965_v5  ;;  %v1396_v54 = vsel %vm1394_vm12, %v1357_v15, %v934_v31  ;;  %v7071_v15 = vld [vmem:[#allocation31_spill] sm:$0xff] }
 0x12e   : > { %v5273_v59 = vpop.permute.xlu2 %996  ;;  %1010 = vrot.lane.b32.xlu1 %v5268_v23, %s4307_s9  ;;  %4107 = vmatpush.bf16.msra.mxu2 %v3965_v5  ;;  %v1435_v31 = vsel %vm1433_vm13, %v1396_v54, %v5190_v47 }
 0x12f   : > { %4108 = vmatpush.bf16.msra.mxu3 %v3965_v5  ;;  %v7065_v5 = vld [vmem:[#allocation17_spill] sm:$0xff] }
 0x130   : > { %v1121_v10 = vpop.permute.xlu1 %1120 }
 0x132   : > { %868 = vrot.lane.b32.xlu0 %v803_v36, %s4305_s7  ;;  %v824_v36 = vrot.slane %v7064_v41, 1 }
 0x134   : > { %v936_v29 = vpop.permute.xlu0 %935  ;;  %1205 = vrot.lane.b32.xlu2 %v1170_v26, %s4309_s11  ;;  %v7067_v26 = vld [vmem:[#allocation15_spill] sm:$0xff] }
 0x135   : > { %v829_v30 = vrot.slane %v7067_v26, 2 }
 0x136   : > { %v5297_v52 = vpop.permute.xlu2 %1128  ;;  %1142 = vrot.lane.b32.xlu1 %v1085_v43, %s4308_s10  ;;  %v1186_v43 = vsel %vm1161_vm6, %v1183_v50, %v7008_v24  ;;  %v1178_v50 = vsel %vm1161_vm6, %v7069_v62, %v7068_v56  ;;  %v5370_v62 = vld [vmem:[#allocation2 + $0x88] sm:$0xff] }
 0x137   : > { %v5339_v48 = vor.u32 %v829_v30, %v828_v28  ;;  %v4186_v28 = vld [vmem:[#allocation2 + $0x10] sm:$0xff]  }
 0x138   : > { %v1200_v8 = vpop.permute.xlu1 %1199  ;;  %v7070_v30 = vld [vmem:[#allocation29_spill] sm:$0xff] }
 0x139   : > { %v1242_v16 = vsel %vm1237_vm7, %v4186_v28, %v7070_v30  ;;  %v821_v30 = vrot.slane %v7062_v33, 2  ;;  %vm1715_vm7 = vcmask 588800  }
 0x13a   : > { %947 = vrot.lane.b32.xlu0 %v5170_v27, %s4306_s8  ;;  %v825_v27 = vrot.slane %v7065_v5, 2 }
 0x13c   : > { %v991_v7 = vpop.permute.xlu0 %990  ;;  %1002 = vrot.lane.b32.xlu2 %v5309_v39, %s4307_s9  ;;  %v5337_v0 = vor.u32 %v825_v27, %v824_v36 }
 0x13e   : > { %v5327_v58 = vpop.permute.xlu2 %1130  ;;  %1134 = vrot.lane.b32.xlu1 %v1069_v40, %s4308_s10  ;;  %v1474_v40 = vsel %vm1472_vm14, %v1435_v31, %v1121_v10  ;;  %v831_v1 = vsel %vm763_vm3, %v5337_v0, %v5339_v48  ;;  %v5367_v10 = vld [vmem:[#allocation2 + $0x80] sm:$0xff] }
 0x13f   : > { %v1513_v27 = vsel %vm1511_vm15, %v1474_v40, %v1200_v8  ;;  %v7009_v8 = vrot.slane %v5367_v10, 2 }
 0x140   : > { %v5342_v49 = vpop.permute.xlu1 %864  ;;  %v1561_v54 = vshll.u32 %v1513_v27, 16 }
 0x142   : > { %1221 = vrot.lane.b32.xlu0 %v1186_v43, %s4309_s11  ;;  %v1281_v43 = vsel %vm1277_vm8, %v1242_v16, %v7071_v15  ;;  %v1563_v15 = vrot.slane %v1561_v54, 1 }
 0x143   : > { %v1320_v47 = vsel %vm7010_vm9, %v1281_v43, %v5150_v51  ;;  %v820_v51 = vrot.slane %v7061_v20, 1  ;;  %v1559_v20 = vshrl.u32 %v1513_v27, 16 }
 0x144   : > { %v1123_v36 = vpop.permute.xlu0 %1122  ;;  %1213 = vrot.lane.b32.xlu2 %v1178_v50, %s4309_s11  ;;  %v925_v50 = vrot.slane %v5370_v62, 2  ;;  %v1359_v31 = vsel %vm1355_vm11, %v1320_v47, %v5251_v4 }
 0x145   : > { %v1398_v28 = vsel %vm1394_vm12, %v1359_v31, %v936_v29  ;;  %v7073_v29 = vld [vmem:[#allocation22_spill] sm:$0xff]  ;;  %v5393_v31 = vor.u32 %v821_v30, %v820_v51  ;;  %v1564_v27 = vor.u32 %v1563_v15, %v1559_v20  ;;  %v1090_v20 = vrot.slane %v7066_v45, 2 }
 0x146   : > { %v5362_v56 = vpop.permute.xlu2 %872  ;;  %882 = vrot.lane.b32.xlu1 %v831_v1, %s4305_s7  ;;  %v7072_v1 = vld [vmem:[#allocation23_spill] sm:$0xff]  ;;  %v1437_v16 = vsel %vm1433_vm13, %v1398_v28, %v991_v7  ;;  %v5385_v4 = vsel %vm895_vm4, %v7009_v8, %v925_v50  ;;  %v7074_v28 = vld [vmem:[#allocation21_spill] sm:$0xff] }
 0x147   : > { %v1476_v43 = vsel %vm1472_vm14, %v1437_v16, %v1123_v36  ;;  %v5399_v36 = vld [vmem:[#allocation2 + $0x90] sm:$0xff]  ;;  %v7075_v16 = vld [vmem:[#allocation19_spill] sm:$0xff] }
 0x148   : > { %v944_v40 = vpop.permute.xlu1 %943  ;;  %v927_v54 = vrot.slane %v5399_v36, 2 }
 0x14a   : > { %750 = vrot.lane.b32.xlu0 %v7072_v1, %s4304_s6  ;;  %v832_v1 = vrot.slane %v7074_v28, 1 }
 0x14c   : > { %v1202_v24 = vpop.permute.xlu0 %1201  ;;  %746 = vrot.lane.b32.xlu2 %v7073_v29, %s4304_s6  ;;  %v833_v29 = vrot.slane %v7075_v16, 2 }
 0x14d   : > { %v5390_v47 = vsel %vm1511_vm15, %v1476_v43, %v1202_v24  ;;  %v1365_v24 = vsel %vm1355_vm11, %v5187_v2, %v5218_v37  ;;  %v823_v2 = vsel %vm763_vm3, %v5216_v12, %v5393_v31 }
 0x14e   : > { %v1565_v33 = vshll.u32 %v5390_v47, 16  ;;  %v5395_v7 = vpop.permute.xlu2 %874  ;;  %961 = vrot.lane.b32.xlu1 %v5385_v4, %s4306_s8  ;;  %v1404_v30 = vsel %vm1394_vm12, %v1365_v24, %v5241_v60  ;;  %v928_v60 = vsel %vm895_vm4, %v925_v50, %v927_v54  ;;  %v5424_v15 = vor.u32 %v833_v29, %v832_v1 }
 0x14f   : > { %v1443_v8 = vsel %vm1433_vm13, %v1404_v30, %v5273_v59  ;;  %v1095_v24 = vrot.slane %v7075_v16, 3 }
 0x150   : > { %v5407_v51 = vrot.slane %v1565_v33, 1  ;;  %v1208_v43 = vpop.permute.xlu1 %1207  ;;  %v1482_v37 = vsel %vm1472_vm14, %v1443_v8, %v5297_v52  ;;  %v1094_v33 = vrot.slane %v7074_v28, 2  ;;  %v835_v45 = vsel %vm763_vm3, %v5339_v48, %v5424_v15 }
 0x151   : > { %v1521_v12 = vsel %vm1511_vm15, %v1482_v37, %v1208_v43 }
 0x152   : > { %752 = vrot.lane.b32.xlu0 %v7076_v55, %s4304_s6  ;;  %v1568_v6 = vsel %vm437_vm1, %v1564_v27, %v5407_v51  ;;  %v1091_v55 = vrot.slane %v7067_v26, 3  ;;  %v1586_v8 = vshll.u32 %v1521_v12, 16  ;;  %v1096_v28 = vor.u32 %v1095_v24, %v1094_v33  ;;  %v5452_v27 = vld [vmem:[#allocation2 + $0x98] sm:$0xff] }
 0x153   : > { %3889 = vmatmul.msk.bf16.vlgmr.msra.gmra.mxu0 %vm1715_vm7, %v1568_v6  ;;  %v1367_v6 = vsel %vm1355_vm11, %v5174_v53, %v5342_v49  ;;  %v1590_v30 = vshrl.u32 %v1521_v12, 16  ;;  %v1086_v12 = vrot.slane %v7064_v41, 2  ;;  %v7077_v41 = vrot.slane %v5367_v10, 2 }
 0x154   : > { %v999_v59 = vpop.permute.xlu0 %998  ;;  %878 = vrot.lane.b32.xlu2 %v823_v2, %s4305_s7  ;;  %v1406_v26 = vsel %vm1394_vm12, %v1367_v6, %v944_v40  ;;  %v5442_v50 = vor.u32 %v1091_v55, %v1090_v20  ;;  %v5446_v53 = vrot.slane %v1586_v8, 1  ;;  %v807_v55 = vsel %vm763_vm3, %v5261_v18, %v4976_v19 }
 0x155   : > { %v1445_v1 = vsel %vm1433_vm13, %v1406_v26, %v999_v59  ;;  %v5467_v59 = vrot.slane %v5452_v27, 2  ;;  %v1087_v6 = vrot.slane %v7065_v5, 3  ;;  %v837_v19 = vshrl.u32 %v5452_v27, 16 }
 0x156   : > { %v5435_v52 = vpop.permute.xlu2 %953  ;;  %1016 = vrot.lane.b32.xlu1 %v928_v60, %s4307_s9  ;;  %v1484_v49 = vsel %vm1472_vm14, %v1445_v1, %v5327_v58  ;;  %v1097_v48 = vsel %vm1029_vm5, %v5442_v50, %v1096_v28  ;;  %v1592_v58 = vor.u32 %v1590_v30, %v5446_v53  ;;  %v840_v18 = vshll.u32 %v5452_v27, 16 }
 0x157   : > { %v5480_v24 = vsel %vm895_vm4, %v927_v54, %v5467_v59  ;;  %v7078_v5 = vrot.slane %v4597_v63, 2  ;;  %v5500_v8 = vor.u32 %v1087_v6, %v1086_v12  ;;  %v1187_v12 = vrot.slane %v5367_v10, 3 }
 0x158   : > { %v859_v16 = vpop.permute.xlu1 %858 }
 0x159   : > { %v5498_v54 = vsel %vm895_vm4, %v7078_v5, %v7077_v41  ;;  %v1089_v30 = vsel %vm1029_vm5, %v5280_v44, %v5500_v8  ;;  %v7079_v5 = vrot.slane %v4597_v63, 3 }
 0x15a   : > { %884 = vrot.lane.b32.xlu0 %v835_v45, %s4305_s7  ;;  %v1191_v45 = vrot.slane %v5399_v36, 3 }
 0x15c   : > { %v1210_v29 = vpop.permute.xlu0 %1209  ;;  %957 = vrot.lane.b32.xlu2 %v5268_v23, %s4306_s8 }
 0x15d   : > { %v5457_v40 = vsel %vm1511_vm15, %v1484_v49, %v1210_v29  ;;  %v1098_v49 = vrot.slane %v837_v19, 2  ;;  %v1099_v29 = vrot.slane %v840_v18, 3 }
 0x15e   : > { %v1593_v43 = vshll.u32 %v5457_v40, 16  ;;  %v5460_v2 = vpop.permute.xlu2 %866  ;;  %1148 = vrot.lane.b32.xlu1 %v1097_v48, %s4308_s10 }
 0x160   : > { %v5464_v37 = vrot.slane %v1593_v43, 1  ;;  %v5469_v20 = vpop.permute.xlu1 %951  ;;  %v243_v43 = vld [vmem:[%s4393_s30 + $0xa0] sm:$0xf] }
 0x161   : > { %287 = vst.msk [vmem:[#allocation2 + $0xa0] sm:$0xf] %vm246_vm0, %v243_v43 }
 0x162   : > { %963 = vrot.lane.b32.xlu0 %v928_v60, %s4306_s8  ;;  %v1596_v23 = vsel %vm437_vm1, %v1592_v58, %v5464_v37  ;;  %v1189_v60 = vrot.slane %v5370_v62, 3  ;;  %v244_v58 = vld [vmem:[%s4393_s30 + $0xa4] sm:$0xf] }
 0x163   : > { %3893 = vmatmul.msk.bf16.vlgmr.msra.gmra.mxu1 %vm1715_vm7, %v1596_v23  ;;  %v5514_v23 = vor.u32 %v1099_v29, %v1098_v49  ;;  %288 = vst.msk [vmem:[#allocation2 + $0xa4] sm:$0xf] %vm246_vm0, %v244_v58  ;;  %v1361_v49 = vsel %vm1355_vm11, %v5148_v14, %v859_v16  ;;  %v1193_v29 = vrot.slane %v5452_v27, 3 }
 0x164   : > { %v938_v33 = vpop.permute.xlu0 %937  ;;  %870 = vrot.lane.b32.xlu2 %v807_v55, %s4305_s7  ;;  %v1192_v36 = vsel %vm1161_vm6, %v1189_v60, %v1191_v45 }
 0x165   : > { %v1101_v44 = vsel %vm1029_vm5, %v1096_v28, %v5514_v23  ;;  %v1194_v14 = vsel %vm1161_vm6, %v1191_v45, %v1193_v29  ;;  %v245_v45 = vld [vmem:[%s4393_s30 + $0xa8] sm:$0xf]  ;;  %s5895_s30 = sand.u32 1, %s4284_s13  }
 0x166   : > { %v5489_v26 = vpop.permute.xlu2 %1217  ;;  %1018 = vrot.lane.b32.xlu1 %v5480_v24, %s4307_s9  ;;  %289 = vst.msk [vmem:[#allocation2 + $0xa8] sm:$0xf] %vm246_vm0, %v245_v45  ;;  %s3652_s23 = scalar_lea.sflag [#allocation4], %s5895_s30 }
 0x168   : > { %v1007_v1 = vpop.permute.xlu1 %1006 }
 0x16a   : > { %1012 = vrot.lane.b32.xlu0 %v5498_v54, %s4307_s9 }
 0x16c   : > { %v993_v48 = vpop.permute.xlu0 %992  ;;  %1227 = vrot.lane.b32.xlu2 %v1192_v36, %s4309_s11  ;;  %v1188_v36 = vsel %vm1161_vm6, %v7079_v5, %v1187_v12 }
 0x16e   : > { %v1001_v55 = vpop.permute.xlu2 %1000  ;;  %1144 = vrot.lane.b32.xlu1 %v1089_v30, %s4308_s10  ;;  %v1400_v30 = vsel %vm1394_vm12, %v1361_v49, %v938_v33  ;;  %v1569_v33 = vshrl.u32 %v5390_v47, 16  ;;  %v1375_v47 = vsel %vm1355_vm11, %v5136_v13, %v5362_v56  ;;  %v839_v56 = vrot.slane %v837_v19, 1 }
 0x16f   : > { %v1439_v28 = vsel %vm1433_vm13, %v1400_v30, %v993_v48  ;;  %v7080_v48 = vrot.slane %v4555_v38, 3  ;;  %v1073_v38 = vsel %vm1029_vm5, %v5300_v35, %v5065_v17  ;;  %v827_v35 = vsel %vm763_vm3, %v5393_v31, %v5337_v0  ;;  %v7083_v0 = vld [vmem:[#allocation24_spill] sm:$0xff] }
 0x170   : > { %v1139_v6 = vpop.permute.xlu1 %1138 }
 0x172   : > { %949 = vrot.lane.b32.xlu0 %v5309_v39, %s4306_s8 }
 0x174   : > { %v1125_v41 = vpop.permute.xlu0 %1124  ;;  %1150 = vrot.lane.b32.xlu2 %v1101_v44, %s4308_s10 }
 0x175   : > { %v1478_v43 = vsel %vm1472_vm14, %v1439_v28, %v1125_v41  ;;  %v7081_v41 = vrot.slane %v5321_v32, 3 }
 0x176   : > { %v1212_v39 = vpop.permute.xlu2 %1211  ;;  %1223 = vrot.lane.b32.xlu1 %v1188_v36, %s4309_s11 }
 0x177   : > { %v1180_v5 = vsel %vm1161_vm6, %v7081_v41, %v7080_v48 }
 0x178   : > { %v1204_v63 = vpop.permute.xlu1 %1203 }
 0x179   : > { %v5542_v16 = vsel %vm1511_vm15, %v1478_v43, %v1204_v63  ;;  %v842_v43 = vrot.slane %v840_v18, 2  ;;  %v718_v63 = vrot.slane %v5452_v27, 1 }
 0x17a   : > { %1004 = vrot.lane.b32.xlu0 %v5007_v34, %s4307_s9  ;;  %v1572_v58 = vshll.u32 %v5542_v16, 16  ;;  %v1571_v34 = vor.u32 %v1569_v33, %v5407_v51  ;;  %v1414_v51 = vsel %vm1394_vm12, %v1375_v47, %v5469_v20  ;;  %v1369_v20 = vsel %vm1355_vm11, %v5096_v11, %v5460_v2 }
 0x17b   : > { %v1453_v30 = vsel %vm1433_vm13, %v1414_v51, %v1007_v1  ;;  %v5586_v18 = vor.u32 %v842_v43, %v839_v56  ;;  %v719_v31 = vsel %vm629_vm2, %v7083_v0, %v718_v63  ;;  %v1377_v2 = vsel %vm1355_vm11, %v5239_v9, %v5395_v7 }
 0x17c   : > { %v1009_v44 = vpop.permute.xlu0 %1008  ;;  %1229 = vrot.lane.b32.xlu2 %v1194_v14, %s4309_s11  ;;  %v5553_v36 = vrot.slane %v1572_v58, 1  ;;  %v1492_v13 = vsel %vm1472_vm14, %v1453_v30, %v1139_v6  ;;  %v7082_v6 = vld [vmem:[#allocation25_spill] sm:$0xff]  ;;  %v1416_v58 = vsel %vm1394_vm12, %v1377_v2, %v5435_v52  ;;  %v1093_v0 = vsel %vm1029_vm5, %v5500_v8, %v5442_v50 }
 0x17d   : > { %v1531_v1 = vsel %vm1511_vm15, %v1492_v13, %v5489_v26  ;;  %v844_v48 = vsel %vm763_vm3, %v5424_v15, %v5586_v18  ;;  %v1455_v9 = vsel %vm1433_vm13, %v1416_v58, %v1009_v44  ;;  %v1576_v8 = vshrl.u32 %v5542_v16, 16 }
 0x17e   : > { %v5560_v49 = vpop.permute.xlu2 %876  ;;  %1215 = vrot.lane.b32.xlu1 %v1180_v5, %s4309_s11  ;;  %v1575_v32 = vsel %vm437_vm1, %v1571_v34, %v5553_v36  ;;  %v1621_v11 = vshll.u32 %v1531_v1, 16  ;;  %v5606_v5 = vld [vmem:[#allocation2 + $0xa0] sm:$0xff]  ;;  %v1597_v34 = vshrl.u32 %v5457_v40, 16 }
 0x17f   : > { %3890 = vmatmul.msk.bf16.gmra.mxu0 %vm1715_vm7, %v1575_v32  ;;  %v1103_v44 = vshrl.u32 %v5606_v5, 16  ;;  %v1106_v51 = vshll.u32 %v5606_v5, 16  ;;  %v1195_v2 = vrot.slane %v5606_v5, 3 }
 0x180   : > { %v1141_v28 = vpop.permute.xlu1 %1140  ;;  %v1599_v15 = vor.u32 %v1597_v34, %v5464_v37 }
 0x181   : > { %v1494_v52 = vsel %vm1472_vm14, %v1455_v9, %v1141_v28  ;;  %v332_v28 = vld [vmem:[#allocation2 + $0xa0] sm:$0x3] }
 0x182   : > { %1136 = vrot.lane.b32.xlu0 %v1073_v38, %s4308_s10  ;;  %v1625_v38 = vshrl.u32 %v1531_v1, 16  ;;  %v984_v1 = vrot.slane %v5606_v5, 2 }
 0x184   : > { %v946_v17 = vpop.permute.xlu0 %945  ;;  %748 = vrot.lane.b32.xlu2 %v7082_v6, %s4304_s6  ;;  %v1873_v6 = vlaneseq  ;;  %v985_v50 = vsel %vm895_vm4, %v5467_v59, %v984_v1 }
 0x185   : > { %v1408_v19 = vsel %vm1394_vm12, %v1369_v20, %v946_v17  ;;  %v1108_v20 = vrot.slane %v1106_v51, 3 }
 0x186   : > { %v5588_v14 = vpop.permute.xlu2 %1126  ;;  %880 = vrot.lane.b32.xlu1 %v827_v35, %s4305_s7  ;;  %v1447_v33 = vsel %vm1433_vm13, %v1408_v19, %v1001_v55  ;;  %v5613_v55 = vrot.slane %v1621_v11, 1  ;;  %v1105_v35 = vrot.slane %v1103_v44, 2 }
 0x188   : > { %v1133_v26 = vpop.permute.xlu1 %1132  ;;  %v1627_v13 = vor.u32 %v1625_v38, %v5613_v55  ;;  %v5648_v11 = vor.u32 %v1108_v20, %v1105_v35  ;;  %v340_v35 = vld [vmem:[#allocation2 + $0xa8] sm:$0xf] }
 0x189   : > { %v1486_v41 = vsel %vm1472_vm14, %v1447_v33, %v1133_v26 }
 0x18a   : > { %754 = vrot.lane.b32.xlu0 %v719_v31, %s4304_s6  ;;  %v5611_v7 = vsel %vm1511_vm15, %v1486_v41, %v1212_v39  ;;  %v5646_v31 = vshrl.u32 %v1873_v6, 7  ;;  %v338_v41 = vld [vmem:[#allocation2 + $0xa8] sm:$0x7]  ;;  %v1110_v16 = vsel %vm1029_vm5, %v5514_v23, %v5648_v11 }
 0x18b   : > { %v1600_v45 = vshll.u32 %v5611_v7, 16  ;;  %v978_v38 = vunpack.c.l.b16 %v338_v41 }
 0x18c   : > { %v1220_v47 = vpop.permute.xlu0 %1219  ;;  %886 = vrot.lane.b32.xlu2 %v844_v48, %s4305_s7  ;;  %v5696_v6 = vadd.s32 8, %v5646_v31 }
 0x18d   : > { %v5620_v32 = vsel %vm1511_vm15, %v1494_v52, %v1220_v47  ;;  %v5622_v40 = vrot.slane %v1600_v45, 1  ;;  %v1951_v45 = vshrl.u32 %v5646_v31, 16 }
 0x18e   : > { %v1628_v39 = vshll.u32 %v5620_v32, 16  ;;  %v1206_v30 = vpop.permute.xlu2 %1205  ;;  %965 = vrot.lane.b32.xlu1 %v5480_v24, %s4306_s8  ;;  %v712_v24 = vunpack.c.l.b16 %v332_v28  ;;  %v1980_v41 = vshrl.u32 %v5696_v6, 16 }
 0x18f   : > { %v1603_v56 = vsel %vm437_vm1, %v1599_v15, %v5622_v40  ;;  %v1578_v15 = vor.u32 %v1576_v8, %v5553_v36  ;;  %v5681_v44 = vmul.u32 14564, %v1951_v45 }
 0x190   : > { %v5629_v37 = vrot.slane %v1628_v39, 1  ;;  %v940_v43 = vpop.permute.xlu1 %939  ;;  %3894 = vmatmul.msk.bf16.gmra.mxu1 %vm1715_vm7, %v1603_v56  ;;  %v5651_v26 = vpack.c.b16 %v712_v24, %v712_v24 }
 0x191   : > { %v1959_v20 = vshll.u32 %v5681_v44, 16 }
 0x192   : > { %959 = vrot.lane.b32.xlu0 %v5498_v54, %s4306_s8  ;;  %v1631_v17 = vsel %vm437_vm1, %v1627_v13, %v5629_v37  ;;  %v334_v54 = vld [vmem:[#allocation2 + $0xa0] sm:$0x7]  ;;  %v846_v58 = vshrl.u32 %v5651_v26, 16  ;;  %v849_v52 = vshll.u32 %v5651_v26, 16  ;;  %v720_v13 = vrot.slane %v5651_v26, 1 }
 0x193   : > { %3898 = vmatmul.msk.bf16.vlgmr.msra.gmra.mxu2 %vm1715_vm7, %v1631_v17  ;;  %v893_v48 = vunpack.c.l.b16 %v334_v54  ;;  %v1190_v54 = vsel %vm1161_vm6, %v1187_v12, %v1189_v60  ;;  %v1979_v12 = vand.u32 65535, %v5696_v6 }
 0x194   : > { %v861_v19 = vpop.permute.xlu0 %860  ;;  %1014 = vrot.lane.b32.xlu2 %v5385_v4, %s4307_s9  ;;  %v1950_v4 = vand.u32 65535, %v5646_v31  ;;  %v5686_v56 = vrot.slane %v846_v58, 1  ;;  %v1159_v58 = vunpack.c.l.b16 %v340_v35  ;;  %v721_v62 = vsel %vm629_vm2, %v718_v63, %v720_v13 }
 0x195   : > { %v1363_v34 = vsel %vm1355_vm11, %v5063_v25, %v861_v19  ;;  %v1196_v25 = vsel %vm1161_vm6, %v1193_v29, %v1195_v2  ;;  %v5688_v23 = vpack.c.b16 %v893_v48, %v893_v48  ;;  %v851_v29 = vrot.slane %v849_v52, 2 }
 0x196   : > { %v5653_v33 = vpop.permute.xlu2 %1002  ;;  %1146 = vrot.lane.b32.xlu1 %v1093_v0, %s4308_s10  ;;  %v5669_v47 = vmul.u32 58254, %v1950_v4  ;;  %v1953_v39 = vmul.u32 14564, %v1950_v4  ;;  %v1402_v36 = vsel %vm1394_vm12, %v1363_v34, %v940_v43  ;;  %v1985_v35 = vmul.u32 58254, %v1980_v41 }
 0x197   : > { %v931_v8 = vrot.slane %v5688_v23, 2  ;;  %v852_v52 = vor.u32 %v851_v29, %v5686_v56 }
 0x198   : > { %v5665_v9 = vpop.permute.xlu1 %955  ;;  %v1957_v51 = vshll.u32 %v5669_v47, 16 }
 0x19a   : > { %1020 = vrot.lane.b32.xlu0 %v985_v50, %s4307_s9  ;;  %vm1961_vm0 = vc.u32 %v1953_v39, %v1957_v51  ;;  %v1963_v43 = vadd.s32 %v1957_v51, %v1953_v39  ;;  %v5709_v50 = vpack.c.b16 %v978_v38, %v978_v38  ;;  %v1984_v38 = vmul.u32 14564, %v1980_v41 }
 0x19c   : > { %v995_v28 = vpop.permute.xlu0 %994  ;;  %1152 = vrot.lane.b32.xlu2 %v1110_v16, %s4308_s10  ;;  %vm5721_vm8 = vc.u32 %v1963_v43, %v1959_v20  ;;  %v1115_v27 = vshll.u32 %v5709_v50, 16  ;;  %v1982_v16 = vmul.u32 14564, %v1979_v12  ;;  %v986_v29 = vrot.slane %v5709_v50, 2 }
 0x19d   : > { %v1441_v17 = vsel %vm1433_vm13, %v1402_v36, %v995_v28  ;;  %v932_v36 = vsel %vm895_vm4, %v5467_v59, %v931_v8  ;;  %v5736_v28 = vpack.c.b16 %v1159_v58, %v1159_v58 }
 0x19e   : > { %v1480_v24 = vsel %vm1472_vm14, %v1441_v17, %v5588_v14  ;;  %v5701_v0 = vpop.permute.xlu2 %1213  ;;  %1231 = vrot.lane.b32.xlu1 %v1196_v25, %s4309_s11  ;;  %v1956_v14 = vmul.u32 58254, %v1951_v45  ;;  %v1112_v45 = vshrl.u32 %v5709_v50, 16  ;;  %v1983_v25 = vmul.u32 58254, %v1979_v12 }
 0x19f   : > { %v5699_v19 = vsel %vm1511_vm15, %v1480_v24, %v1206_v30  ;;  %v4310_v30 = vmov 0   ;;  %v853_v24 = vsel %vm763_vm3, %v5586_v18, %v852_v52  ;;  %v1117_v59 = vrot.slane %v1115_v27, 3 }
 0x1a0   : > { %v1579_v4 = vshll.u32 %v5699_v19, 16  ;;  %v1962_v48 = vsel %vm1961_vm0, 1, %v4310_v30  ;;  %v5719_v10 = vpop.permute.xlu1 %1010  ;;  %v1966_v17 = vsel %vm5721_vm8, 1, %v4310_v30  ;;  %v1986_v20 = vshll.u32 %v1983_v25, 16 }
 0x1a1   : > { %v1964_v63 = vadd.s32 %v1962_v48, %v1956_v14  ;;  %v5746_v43 = vrot.slane %v1112_v45, 2  ;;  %v1987_v41 = vshrl.u32 %v1983_v25, 16  ;;  %v1960_v25 = vshrl.u32 %v5681_v44, 16 }
 0x1a2   : > { %1225 = vrot.lane.b32.xlu0 %v1190_v54, %s4309_s11  ;;  %v1581_v34 = vrot.slane %v1579_v4, 1  ;;  %v5749_v54 = vadd.s32 64, %v5646_v31  ;;  %v1958_v4 = vshrl.u32 %v5669_v47, 16  ;;  %vm1990_vm2 = vc.u32 %v1982_v16, %v1986_v20 }
 0x1a3   : > { %v1968_v58 = vadd.s32 %v1966_v17, %v1964_v63  ;;  %v1992_v48 = vadd.s32 %v1986_v20, %v1982_v16  ;;  %v1991_v60 = vsel %vm1990_vm2, 1, %v4310_v30  ;;  %v987_v47 = vsel %vm895_vm4, %v984_v1, %v986_v29 }
 0x1a4   : > { %v869_v39 = vpop.permute.xlu0 %868  ;;  %v1582_v51 = vsel %vm437_vm1, %v1578_v15, %v1581_v34  ;;  %756 = vrot.lane.b32.xlu2 %v721_v62, %s4304_s6  ;;  %v1988_v15 = vshll.u32 %v1984_v38, 16  ;;  %v1197_v62 = vrot.slane %v5736_v28, 3  ;;  %v2182_v18 = vand.u32 65535, %v5749_v54 }
 0x1a5   : > { %3891 = vmatmul.msk.bf16.gmra.mxu0 %vm1715_vm7, %v1582_v51  ;;  %v1993_v52 = vadd.s32 %v1991_v60, %v1985_v35  ;;  %v2183_v45 = vshrl.u32 %v5749_v54, 16  ;;  %v1118_v16 = vor.u32 %v1117_v59, %v5746_v43  ;;  %v1969_v51 = vadd.s32 %v1968_v58, %v1958_v4 }
 0x1a6   : > { %v5751_v14 = vpop.permute.xlu2 %746  ;;  %967 = vrot.lane.b32.xlu1 %v932_v36, %s4306_s8  ;;  %vm1994_vm3 = vc.u32 %v1992_v48, %v1988_v15  ;;  %v5766_v63 = vmul.u32 58254, %v2182_v18  ;;  %v1371_v17 = vsel %vm1355_vm11, %v5214_v3, %v869_v39  ;;  %v1198_v1 = vsel %vm1161_vm6, %v1195_v2, %v1197_v62 }
 0x1a7   : > { %v1995_v27 = vsel %vm1994_vm3, 1, %v4310_v30  ;;  %v5777_v20 = vmul.u32 14564, %v2183_v45  ;;  %v1989_v15 = vshrl.u32 %v1984_v38, 16  ;;  %v2185_v59 = vmul.u32 14564, %v2182_v18 }
 0x1a8   : > { %v1143_v12 = vpop.permute.xlu1 %1142  ;;  %v1997_v36 = vadd.s32 %v1995_v27, %v1993_v52  ;;  %v2189_v44 = vshll.u32 %v5766_v63, 16  ;;  %v1583_v4 = vshrl.u32 %v5699_v19, 16  ;;  %v1119_v5 = vsel %vm1029_vm5, %v5648_v11, %v1118_v16 }
 0x1a9   : > { %v1970_v2 = vadd.s32 %v1969_v51, %v1960_v25  ;;  %v1379_v38 = vsel %vm1355_vm11, %v5231_v42, %v5560_v49  ;;  %v2191_v48 = vshll.u32 %v5777_v20, 16  ;;  %v1604_v52 = vshrl.u32 %v5611_v7, 16 }
 0x1aa   : > { %888 = vrot.lane.b32.xlu0 %v853_v24, %s4305_s7  ;;  %v1998_v24 = vadd.s32 %v1997_v36, %v1987_v41  ;;  %v1585_v58 = vor.u32 %v1583_v4, %v1581_v34  ;;  %vm2193_vm4 = vc.u32 %v2185_v59, %v2189_v44  ;;  %v2195_v41 = vadd.s32 %v2189_v44, %v2185_v59 }
 0x1ab   : > { %v1418_v11 = vsel %vm1394_vm12, %v1379_v38, %v5665_v9  ;;  %v5800_v42 = vadd.s32 72, %v5646_v31  ;;  %v1971_v34 = vshrl.u32 %v1970_v2, 4  ;;  %v2188_v27 = vmul.u32 58254, %v2183_v45 }
 0x1ac   : > { %v948_v35 = vpop.permute.xlu0 %947  ;;  %1022 = vrot.lane.b32.xlu2 %v987_v47, %s4307_s9  ;;  %v1999_v18 = vadd.s32 %v1998_v24, %v1989_v15  ;;  %v1457_v49 = vsel %vm1433_vm13, %v1418_v11, %v5719_v10  ;;  %v1589_v9 = vsel %vm437_vm1, %v1585_v58, %v5446_v53  ;;  %v2194_v51 = vsel %vm2193_vm4, 1, %v4310_v30 }
 0x1ad   : > { %v1410_v3 = vsel %vm1394_vm12, %v1371_v17, %v948_v35  ;;  %v1496_v7 = vsel %vm1472_vm14, %v1457_v49, %v1143_v12  ;;  %v1632_v36 = vshrl.u32 %v5620_v32, 16  ;;  %vm2197_vm5 = vc.u32 %v2195_v41, %v2191_v48 }
 0x1ae   : > { %v5783_v39 = vpop.permute.xlu2 %878  ;;  %1233 = vrot.lane.b32.xlu1 %v1198_v1, %s4309_s11  ;;  %v1449_v19 = vsel %vm1433_vm13, %v1410_v3, %v5653_v33  ;;  %v1606_v53 = vor.u32 %v1604_v52, %v5622_v40  ;;  %v2211_v17 = vand.u32 65535, %v5800_v42  ;;  %v1972_v32 = vmul.u32 18, %v1971_v34 }
 0x1af   : > { %v2196_v26 = vadd.s32 %v2194_v51, %v2188_v27  ;;  %v2198_v24 = vsel %vm2197_vm5, 1, %v4310_v30  ;;  %v2190_v3 = vshrl.u32 %v5766_v63, 16  ;;  %v2192_v63 = vshrl.u32 %v5777_v20, 16 }
 0x1b0   : > { %v1135_v60 = vpop.permute.xlu1 %1134  ;;  %v1973_v4 = vsub.s32 %v5646_v31, %v1972_v32  ;;  %v2214_v58 = vmul.u32 14564, %v2211_v17  ;;  %v5866_v49 = vadd.s32 16, %v5646_v31 }
 0x1b1   : > { %v1488_v47 = vsel %vm1472_vm14, %v1449_v19, %v1135_v60 }
 0x1b2   : > { %1154 = vrot.lane.b32.xlu0 %v1119_v5, %s4308_s10  ;;  %v1527_v33 = vsel %vm1511_vm15, %v1488_v47, %v5701_v0  ;;  %v2000_v0 = vshrl.u32 %v1999_v18, 4  ;;  %v2200_v5 = vadd.s32 %v2198_v24, %v2196_v26  ;;  %vm2991_vm6 = vcmp.ne.s32.totalorder %v1973_v4, 0 }
 0x1b3   : > { %v1607_v16 = vshll.u32 %v1527_v33, 16  ;;  %v1611_v44 = vshrl.u32 %v1527_v33, 16  ;;  %vm3027_vm10 = vcmp.lt.s32.totalorder %v1973_v4, 0  ;;  %v2008_v27 = vand.u32 65535, %v5866_v49 }
 0x1b4   : > { %v1222_v25 = vpop.permute.xlu0 %1221  ;;  %758 = vrot.lane.b32.xlu2 %v720_v13, %s4304_s6  ;;  %v1634_v13 = vor.u32 %v1632_v36, %v5629_v37  ;;  %v2001_v40 = vmul.u32 18, %v2000_v0  ;;  %v2212_v37 = vshrl.u32 %v5800_v42, 16  ;;  %v2201_v18 = vadd.s32 %v2200_v5, %v2190_v3  ;;  %vm3063_vm2 = vmand %vm3027_vm10, %vm2991_vm6  ;;  %s4109_s6 = smul.u32 144, %s5895_s30 }
 0x1b5   : > { %v5815_v10 = vsel %vm1511_vm15, %v1496_v7, %v1222_v25  ;;  %3892 = vmatmul.msk.bf16.gmra.mxu0 %vm1715_vm7, %v1589_v9  ;;  %v1609_v12 = vrot.slane %v1607_v16, 1  ;;  %v2009_v9 = vshrl.u32 %v5866_v49, 16  ;;  %v2012_v51 = vmul.u32 58254, %v2008_v27 }
 0x1b6   : > { %v1635_v45 = vshll.u32 %v5815_v10, 16  ;;  %v5821_v35 = vpop.permute.xlu2 %957  ;;  %969 = vrot.lane.b32.xlu1 %v931_v8, %s4306_s8  ;;  %v5839_v8 = vmul.u32 58254, %v2211_v17  ;;  %v5850_v48 = vmul.u32 14564, %v2212_v37  ;;  %v2202_v28 = vadd.s32 %v2201_v18, %v2192_v63  ;;  %s4111_s8 = smul.u32 144, %s4292_s15 }
 0x1b7   : > { %v1610_v15 = vsel %vm437_vm1, %v1606_v53, %v1609_v12  ;;  %v5844_v38 = vor.u32 %v1611_v44, %v1609_v12  ;;  %v2217_v11 = vmul.u32 58254, %v2212_v37  ;;  %v2011_v0 = vmul.u32 14564, %v2008_v27 }
 0x1b8   : > { %v5827_v1 = vrot.slane %v1635_v45, 1  ;;  %v5831_v59 = vpop.permute.xlu1 %882  ;;  %3895 = vmatmul.msk.bf16.gmra.mxu1 %vm1715_vm7, %v1610_v15  ;;  %v2218_v60 = vshll.u32 %v5839_v8, 16  ;;  %v2203_v34 = vshrl.u32 %v2202_v28, 4  ;;  %v2013_v12 = vmul.u32 14564, %v2009_v9  ;;  %s6839_s18 = scalar_lea.hbm %s6963_s2, %s4111_s8 }
 0x1b9   : > { %v2015_v45 = vshll.u32 %v2012_v51, 16  ;;  %v2219_v32 = vshrl.u32 %v5839_v8, 16  ;;  %v4311_v24 = vmov 0.0   ;;  %v5883_v37 = vadd.s32 24, %v5646_v31  ;;  %s3673_s21 = sshll.u32 %s6839_s18, 4  ;;  %s6859_s21 = int_to_ptr.hbm [resolvable:$true] %s3673_s21 }
 0x1ba   : > { %890 = vrot.lane.b32.xlu0 %v5686_v56, %s4305_s7  ;;  %v1638_v23 = vsel %vm437_vm1, %v1634_v13, %v5827_v1  ;;  %v2002_v56 = vsub.s32 %v5696_v6, %v2001_v40  ;;  %v2220_v6 = vshll.u32 %v5850_v48, 16  ;;  %vm2222_vm3 = vc.u32 %v2214_v58, %v2218_v60  ;;  %s5931_s7 = scalar_lea.vmem [#allocation3], %s4109_s6  ;;  %s4204_s26 = sshra.s32 %s6859_s21, 4  ;;  %s4205_s26 = int_to_ptr.hbm [resolvable:$true] %s4204_s26 }
 0x1bb   : > { %3899 = vmatmul.msk.bf16.gmra.mxu2 %vm1715_vm7, %v1638_v23  ;;  %v2224_v41 = vadd.s32 %v2218_v60, %v2214_v58  ;;  %v2223_v47 = vsel %vm2222_vm3, 1, %v4310_v30  ;;  %v2204_v36 = vmul.u32 18, %v2203_v34  ;;  %v2014_v13 = vmul.u32 58254, %v2009_v9  ;;  %s3671_s19 = sshll.u32 %s5931_s7, 4  ;;  %s4206_s27 = scalar_lea.hbm %s4205_s26, 144  ;;  %s6854_s19 = int_to_ptr.vmem [resolvable:$true] %s3671_s19 }
 0x1bc   : > { %v751_v2 = vpop.permute.xlu0 %750  ;;  %1024 = vrot.lane.b32.xlu2 %v986_v29, %s4307_s9  ;;  %v3099_v29 = vadd.s32 18, %v1973_v4  ;;  %vm2992_vm0 = vcmp.ne.s32.totalorder %v2002_v56, 0  ;;  %vm3028_vm8 = vcmp.lt.s32.totalorder %v2002_v56, 0  ;;  %v3100_v52 = vadd.s32 18, %v2002_v56  ;;  %p4207_p12 = scmp.ne.s32.totalorder %s4205_s26, %s4206_s27  ;;  %p4211_p1 = scmp.lt.s32.totalorder %s4205_s26, %s6963_s2 }
 0x1bd   : > { %vm3064_vm4 = vmand %vm3028_vm8, %vm2992_vm0  ;;  %vm2226_vm5 = vc.u32 %v2224_v41, %v2220_v6  ;;  %v2225_v7 = vadd.s32 %v2223_v47, %v2217_v11  ;;  %v1346_v53 = vsel %vm7010_vm9, %v5086_v57, %v751_v2  ;;  %v2017_v15 = vshll.u32 %v2013_v12, 16  ;;  %p4212_p2 = scmp.lt.s32.totalorder %s4210_s4, %s4206_s27 }
 0x1be   : > { %v5853_v19 = vpop.permute.xlu2 %870  ;;  %1235 = vrot.lane.b32.xlu1 %v1197_v62, %s4309_s11  ;;  %v3135_v20 = vsel %vm3063_vm2, %v3099_v29, %v1973_v4  ;;  %v2227_v25 = vsel %vm2226_vm5, 1, %v4310_v30  ;;  %vm2019_vm3 = vc.u32 %v2011_v0, %v2015_v45  ;;  %v2021_v57 = vadd.s32 %v2015_v45, %v2011_v0  ;;  %p4208_p13 = pnand %p4207_p12, %p4373_p4 }
 0x1bf   : > { %vm3171_vm6 = vcmp.ge.s32.totalorder %v3135_v20, 1  ;;  %vm3207_vm10 = vcmp.le.s32.totalorder %v3135_v20, 16  ;;  %v2229_v26 = vadd.s32 %v2227_v25, %v2225_v7  ;;  %v2020_v23 = vsel %vm2019_vm3, 1, %v4310_v30  ;;  %p4213_p3 = por %p4212_p2, %p4211_p1 }
 0x1c0   : > { %v962_v50 = vpop.permute.xlu1 %961  ;;  %vm3243_vm2 = vmand %vm3171_vm6, %vm3207_vm10  ;;  %v1385_v8 = vsel %vm1355_vm11, %v1346_v53, %v5831_v59  ;;  %v5888_v3 = vsub.s32 %v5749_v54, %v2204_v36  ;;  %v2221_v5 = vshrl.u32 %v5850_v48, 16  ;;  %v2022_v2 = vadd.s32 %v2020_v23, %v2014_v13  ;;  %p4209_p0 = pneg %p4208_p13 }
 0x1c1   : > { %v3907_v40 = vsel %vm3243_vm2, 1.0, %v4311_v24  ;;  %v2230_v60 = vadd.s32 %v2229_v26, %v2219_v32  ;;  %vm2023_vm5 = vc.u32 %v2021_v57, %v2017_v15  ;;  %v2037_v63 = vand.u32 65535, %v5883_v37 }
 0x1c2   : > { %1156 = vrot.lane.b32.xlu0 %v5746_v43, %s4308_s10  ;;  %v3136_v43 = vsel %vm3064_vm4, %v3100_v52, %v2002_v56  ;;  %v1424_v56 = vsel %vm1394_vm12, %v1385_v8, %v962_v50  ;;  %v2016_v59 = vshrl.u32 %v2012_v51, 16  ;;  %v2024_v48 = vsel %vm2023_vm5, 1, %v4310_v30  ;;  %p4214_p5 = pnand %p4213_p3, %p4209_p0 }
 0x1c3   : > { %vm3172_vm0 = vcmp.ge.s32.totalorder %v3136_v43, 1  ;;  %vm3208_vm8 = vcmp.le.s32.totalorder %v3136_v43, 16  ;;  %v2026_v6 = vadd.s32 %v2024_v48, %v2022_v2  ;;  %v2038_v41 = vshrl.u32 %v5883_v37, 16 }
 0x1c4   : > { %v5862_v62 = vpop.permute.xlu0 %752  ;;  %vm5877_vm4 = vmand %vm3172_vm0, %vm3208_vm8  ;;  %v5903_v52 = vmul.u32 58254, %v2037_v63  ;;  %vm2999_vm6 = vcmp.ne.s32.totalorder %v5888_v3, 0  ;;  %v2018_v11 = vshrl.u32 %v2013_v12, 16  ;;  %v2040_v20 = vmul.u32 14564, %v2037_v63 }
 0x1c5   : > { %v3908_v54 = vsel %vm5877_vm4, 1.0, %v4311_v24  ;;  %v2231_v34 = vadd.s32 %v2230_v60, %v2221_v5  ;;  %v2027_v27 = vadd.s32 %v2026_v6, %v2016_v59  ;;  %v5908_v7 = vmul.u32 14564, %v2038_v41 }
 0x1c6   : > { %v1228_v33 = vpop.permute.xlu2 %1227  ;;  %vm3035_vm10 = vcmp.lt.s32.totalorder %v5888_v3, 0  ;;  %v2043_v51 = vmul.u32 58254, %v2038_v41  ;;  %v5917_v0 = vadd.s32 80, %v5646_v31  ;;  %v3107_v53 = vadd.s32 18, %v5888_v3 }
 0x1c7   : > { %v2028_v9 = vadd.s32 %v2027_v27, %v2018_v11  ;;  %v2046_v36 = vshll.u32 %v5908_v7, 16  ;;  %v2232_v13 = vshrl.u32 %v2231_v34, 4  ;;  %vm3071_vm2 = vmand %vm3035_vm10, %vm2999_vm6  ;;  %v2045_v59 = vshrl.u32 %v5903_v52, 16 }
 0x1c8   : > { %v1017_v16 = vpop.permute.xlu1 %1016  ;;  %v2240_v2 = vand.u32 65535, %v5917_v0  ;;  %v3143_v11 = vsel %vm3071_vm2, %v3107_v53, %v5888_v3  ;;  %v5964_v3 = vadd.s32 144, %v5646_v31 }
 0x1c9   : > { %v1463_v18 = vsel %vm1433_vm13, %v1424_v56, %v1017_v16  ;;  %v1348_v16 = vsel %vm7010_vm9, %v5073_v22, %v5862_v62  ;;  %v2029_v8 = vshrl.u32 %v2028_v9, 4  ;;  %vm3179_vm3 = vcmp.ge.s32.totalorder %v3143_v11, 1 }
 0x1ca   : > { %vm3215_vm10 = vcmp.le.s32.totalorder %v3143_v11, 16 }
 0x1cc   : > { %v885_v17 = vpop.permute.xlu0 %884 }
 0x1cd   : > { %v1387_v12 = vsel %vm1355_vm11, %v1348_v16, %v885_v17  ;;  %v2244_v16 = vmul.u32 58254, %v2240_v2 }
 0x1ce   : > { %v1151_v4 = vpop.permute.xlu2 %1150 }
 0x1cf   : > { %v2247_v53 = vshll.u32 %v2244_v16, 16 }
 0x1d0   : > { %v1783_v58 = vpop.f32.mrf.mxu0  ;;  %v1149_v29 = vpop.permute.xlu1 %1148 }
 0x1d1   : > { %v1502_v50 = vsel %vm1472_vm14, %v1463_v18, %v1149_v29  ;;  %v3423_v47 = vmul.f32 %v3907_v40, %v1783_v58 }
 0x1d2   : > { %v1541_v28 = vsel %vm1511_vm15, %v1502_v50, %v1228_v33  ;;  %v2044_v33 = vshll.u32 %v5903_v52, 16 }
 0x1d3   : > { %v1656_v25 = vshll.u32 %v1541_v28, 16  ;;  %v3501_v22 = vmul.f32 %v3423_v47, %v1783_v58  ;;  %v1660_v50 = vshrl.u32 %v1541_v28, 16 }
 0x1d4   : > { %v964_v43 = vpop.permute.xlu0 %963  ;;  %vm2048_vm0 = vc.u32 %v2040_v20, %v2044_v33  ;;  %v2050_v32 = vadd.s32 %v2044_v33, %v2040_v20  ;;  %v2030_v20 = vmul.u32 18, %v2029_v8  ;;  %v2243_v33 = vmul.u32 14564, %v2240_v2 }
 0x1d5   : > { %v1426_v62 = vsel %vm1394_vm12, %v1387_v12, %v964_v43  ;;  %v2049_v15 = vsel %vm2048_vm0, 1, %v4310_v30  ;;  %v5923_v40 = vrot.slane %v1656_v25, 1  ;;  %v2473_v8 = vshrl.u32 %v5964_v3, 16 }
 0x1d6   : > { %v1230_v45 = vpop.permute.xlu2 %1229  ;;  %v2051_v5 = vadd.s32 %v2049_v15, %v2043_v51  ;;  %vm2052_vm8 = vc.u32 %v2050_v32, %v2046_v36  ;;  %v2031_v36 = vsub.s32 %v5866_v49, %v2030_v20  ;;  %vm2251_vm6 = vc.u32 %v2243_v33, %v2247_v53 }
 0x1d7   : > { %v2053_v48 = vsel %vm2052_vm8, 1, %v4310_v30  ;;  %v1662_v52 = vor.u32 %v1660_v50, %v5923_v40 }
 0x1d8   : > { %v1785_v26 = vpop.f32.mrf.mxu0  ;;  %v1019_v57 = vpop.permute.xlu1 %1018  ;;  %v2055_v43 = vadd.s32 %v2053_v48, %v2051_v5  ;;  %vm2993_vm0 = vcmp.ne.s32.totalorder %v2031_v36, 0  ;;  %vm3029_vm8 = vcmp.lt.s32.totalorder %v2031_v36, 0  ;;  %v1639_v5 = vshrl.u32 %v5815_v10, 16 }
 0x1d9   : > { %v3424_v44 = vmul.f32 %v3908_v54, %v1785_v26  ;;  %v3984_v23 = vpack.c.bf16 %v1785_v26, %v1783_v58  ;;  %v1465_v17 = vsel %vm1433_vm13, %v1426_v62, %v1019_v57  ;;  %v2241_v58 = vshrl.u32 %v5917_v0, 16 }
 0x1da   : > { %v1504_v63 = vsel %vm1472_vm14, %v1465_v17, %v1151_v4  ;;  %v2233_v54 = vmul.u32 18, %v2232_v13  ;;  %v1342_v4 = vsel %vm7010_vm9, %v5033_v21, %v5751_v14  ;;  %v2056_v28 = vadd.s32 %v2055_v43, %v2045_v59 }
 0x1db   : > { %v5927_v56 = vadd.f32 %v3424_v44, %v3423_v47  ;;  %v3502_v60 = vmul.f32 %v3424_v44, %v1785_v26  ;;  %3985 = vst [vmem:[%s5931_s7] sm:$0xff] %v3984_v23   ;;  %v5941_v18 = vsel %vm1511_vm15, %v1504_v63, %v1230_v45  ;;  %v2047_v47 = vshrl.u32 %v5908_v7, 16 }
 0x1dc   : > { %v1013_v29 = vpop.permute.xlu0 %1012  ;;  %v1663_v41 = vshll.u32 %v5941_v18, 16  ;;  %v5958_v25 = vmul.u32 14564, %v2241_v58  ;;  %v2234_v14 = vsub.s32 %v5800_v42, %v2233_v54  ;;  %v1381_v7 = vsel %vm1355_vm11, %v1342_v4, %v5783_v39 }
 0x1dd   : > { %v5948_v6 = vadd.f32 %v3502_v60, %v3501_v22  ;;  %v2057_v12 = vadd.s32 %v2056_v28, %v2047_v47  ;;  %v2246_v45 = vmul.u32 58254, %v2241_v58  ;;  %v1420_v42 = vsel %vm1394_vm12, %v1381_v7, %v5821_v35 }
 0x1de   : > { %v5953_v34 = vpop.permute.xlu2 %748  ;;  %v5956_v27 = vrot.slane %v1663_v41, 1  ;;  %v2249_v32 = vshll.u32 %v5958_v25, 16  ;;  %v2472_v22 = vand.u32 65535, %v5964_v3  ;;  %vm3000_vm4 = vcmp.ne.s32.totalorder %v2234_v14, 0 }
 0x1df   : > { %vm3036_vm5 = vcmp.lt.s32.totalorder %v2234_v14, 0  ;;  %v2253_v62 = vadd.s32 %v2247_v53, %v2243_v33  ;;  %v3108_v26 = vadd.s32 18, %v2234_v14  ;;  %v2058_v49 = vshrl.u32 %v2057_v12, 4 }
 0x1e0   : > { %v5960_v21 = vpop.f32.mrf.mxu1  ;;  %v1145_v9 = vpop.permute.xlu1 %1144  ;;  %v1666_v51 = vsel %vm437_vm1, %v1662_v52, %v5956_v27  ;;  %v2252_v13 = vsel %vm2251_vm6, 1, %v4310_v30  ;;  %vm5981_vm9 = vmand %vm3036_vm5, %vm3000_vm4  ;;  %v2248_v23 = vshrl.u32 %v2244_v16, 16  ;;  %v5987_v17 = vmul.u32 58254, %v2472_v22 }
 0x1e1   : > { %3903 = vmatmul.msk.bf16.vlgmr.msra.gmra.mxu3 %vm1715_vm7, %v1666_v51  ;;  %v2254_v15 = vadd.s32 %v2252_v13, %v2246_v45  ;;  %vm2255_vm2 = vc.u32 %v2253_v62, %v2249_v32  ;;  %v1459_v2 = vsel %vm1433_vm13, %v1420_v42, %v1013_v29  ;;  %v5994_v58 = vadd.s32 88, %v5646_v31  ;;  %vm5998_vm4 = vmand %vm3179_vm3, %vm3215_vm10 }
 0x1e2   : > { %v2256_v57 = vsel %vm2255_vm2, 1, %v4310_v30  ;;  %v1498_v59 = vsel %vm1472_vm14, %v1459_v2, %v1145_v9  ;;  %v3101_v4 = vadd.s32 18, %v2031_v36  ;;  %v2059_v29 = vmul.u32 18, %v2058_v49  ;;  %vm3065_vm3 = vmand %vm3029_vm8, %vm2993_vm0 }
 0x1e3   : > { %v2258_v63 = vadd.s32 %v2256_v57, %v2254_v15  ;;  %v3144_v50 = vsel %vm5981_vm9, %v3108_v26, %v2234_v14  ;;  %v2250_v11 = vshrl.u32 %v5958_v25, 16  ;;  %v2475_v20 = vmul.u32 14564, %v2472_v22 }
 0x1e4   : > { %v5976_v39 = vpop.permute.xlu0 %949  ;;  %v6015_v52 = vmul.u32 14564, %v2473_v8  ;;  %v2479_v16 = vshll.u32 %v5987_v17, 16  ;;  %v1641_v28 = vor.u32 %v1639_v5, %v5827_v1  ;;  %v1373_v14 = vsel %vm1355_vm11, %v5204_v61, %v5853_v19 }
 0x1e5   : > { %v2259_v43 = vadd.s32 %v2258_v63, %v2248_v23  ;;  %v2269_v7 = vand.u32 65535, %v5994_v58  ;;  %v3915_v25 = vsel %vm5998_vm4, 1.0, %v4311_v24  ;;  %v3137_v51 = vsel %vm3065_vm3, %v3101_v4, %v2031_v36 }
 0x1e6   : > { %v5979_v35 = vpop.permute.xlu2 %886  ;;  %v2060_v12 = vsub.s32 %v5883_v37, %v2059_v29  ;;  %vm3180_vm9 = vcmp.ge.s32.totalorder %v3144_v50, 1  ;;  %vm3216_vm5 = vcmp.le.s32.totalorder %v3144_v50, 16  ;;  %v2270_v1 = vshrl.u32 %v5994_v58, 16 }
 0x1e7   : > { %v2260_v45 = vadd.s32 %v2259_v43, %v2250_v11  ;;  %v2481_v19 = vshll.u32 %v6015_v52, 16  ;;  %vm2483_vm6 = vc.u32 %v2475_v20, %v2479_v16  ;;  %v2485_v42 = vadd.s32 %v2479_v16, %v2475_v20  ;;  %vm6050_vm3 = vmand %vm3180_vm9, %vm3216_vm5 }
 0x1e8   : > { %v5991_v60 = vpop.f32.mrf.mxu1  ;;  %v1224_v48 = vpop.permute.xlu1 %1223  ;;  %vm3173_vm10 = vcmp.ge.s32.totalorder %v3137_v51, 1  ;;  %vm3209_vm0 = vcmp.le.s32.totalorder %v3137_v51, 16  ;;  %v2272_v36 = vmul.u32 14564, %v2269_v7  ;;  %v6036_v37 = vmul.u32 58254, %v2269_v7 }
 0x1e9   : > { %v4004_v10 = vpack.c.bf16 %v5991_v60, %v5960_v21  ;;  %v6008_v41 = vsel %vm1511_vm15, %v1498_v59, %v1224_v48  ;;  %v1412_v32 = vsel %vm1394_vm12, %v1373_v14, %v5976_v39  ;;  %vm2994_vm8 = vcmp.ne.s32.totalorder %v2060_v12, 0  ;;  %vm3245_vm5 = vmand %vm3173_vm10, %vm3209_vm0 }
 0x1ea   : > { %v1642_v47 = vshll.u32 %v6008_v41, 16  ;;  %v2478_v62 = vmul.u32 58254, %v2473_v8  ;;  %v6040_v26 = vmul.u32 14564, %v2270_v1  ;;  %v2261_v49 = vshrl.u32 %v2260_v45, 4 }
 0x1eb   : > { %4080 = vst [vmem:[%s5931_s7 + $0x20] sm:$0xff] %v4004_v10   ;;  %v2484_v13 = vsel %vm2483_vm6, 1, %v4310_v30  ;;  %v2276_v15 = vshll.u32 %v6036_v37, 16  ;;  %v6045_v44 = vadd.s32 152, %v5646_v31  ;;  %vm3030_vm2 = vcmp.lt.s32.totalorder %v2060_v12, 0 }
 0x1ec   : > { %v1005_v33 = vpop.permute.xlu0 %1004  ;;  %v6026_v9 = vrot.slane %v1642_v47, 1  ;;  %vm2487_vm4 = vc.u32 %v2485_v42, %v2481_v19  ;;  %v2275_v57 = vmul.u32 58254, %v2270_v1  ;;  %v2278_v5 = vshll.u32 %v6040_v26, 16  ;;  %vm3066_vm9 = vmand %vm3030_vm2, %vm2994_vm8 }
 0x1ed   : > { %v1451_v23 = vsel %vm1433_vm13, %v1412_v32, %v1005_v33  ;;  %vm2280_vm6 = vc.u32 %v2272_v36, %v2276_v15  ;;  %v2282_v2 = vadd.s32 %v2276_v15, %v2272_v36  ;;  %v2501_v63 = vand.u32 65535, %v6045_v44 }
 0x1ee   : > { %v6030_v53 = vpop.permute.xlu2 %1014  ;;  %v1645_v61 = vsel %vm437_vm1, %v1641_v28, %v6026_v9  ;;  %v3102_v59 = vadd.s32 18, %v2060_v12  ;;  %v2486_v10 = vadd.s32 %v2484_v13, %v2478_v62  ;;  %v2281_v48 = vsel %vm2280_vm6, 1, %v4310_v30 }
 0x1ef   : > { %3900 = vmatmul.msk.bf16.gmra.mxu2 %vm1715_vm7, %v1645_v61  ;;  %v2262_v29 = vmul.u32 18, %v2261_v49  ;;  %v2488_v50 = vsel %vm2487_vm4, 1, %v4310_v30  ;;  %v2502_v11 = vshrl.u32 %v6045_v44, 16  ;;  %v1667_v20 = vshrl.u32 %v5941_v18, 16 }
 0x1f0   : > { %v1216_v22 = vpop.permute.xlu1 %1215  ;;  %v3916_v47 = vsel %vm6050_vm3, 1.0, %v4311_v24  ;;  %v6072_v28 = vmul.f32 %v3915_v25, %v5960_v21  ;;  %v2283_v14 = vadd.s32 %v2281_v48, %v2275_v57  ;;  %vm2284_vm8 = vc.u32 %v2282_v2, %v2278_v5  ;;  %v7094_v2 = vld [vmem:[#allocation35_spill] sm:$0xff] }
 0x1f1   : > { %v6076_v33 = vmul.u32 58254, %v2501_v63  ;;  %v3138_v1 = vsel %vm3066_vm9, %v3102_v59, %v2060_v12  ;;  %v2480_v61 = vshrl.u32 %v5987_v17, 16  ;;  %v2490_v19 = vadd.s32 %v2488_v50, %v2486_v10 }
 0x1f2   : > { %v2263_v42 = vsub.s32 %v5917_v0, %v2262_v29  ;;  %v2277_v25 = vshrl.u32 %v6036_v37, 16  ;;  %v2285_v36 = vsel %vm2284_vm8, 1, %v4310_v30  ;;  %v6086_v51 = vmul.u32 14564, %v2502_v11 }
 0x1f3   : > { %v6089_v32 = vmul.f32 %v3916_v47, %v5991_v60  ;;  %v3909_v12 = vsel %vm3245_vm5, 1.0, %v4311_v24  ;;  %v2504_v62 = vmul.u32 14564, %v2501_v63  ;;  %v2482_v0 = vshrl.u32 %v6015_v52, 16 }
 0x1f4   : > { %v1137_v8 = vpop.permute.xlu0 %1136  ;;  %v2287_v37 = vadd.s32 %v2285_v36, %v2283_v14  ;;  %v2508_v49 = vshll.u32 %v6076_v33, 16  ;;  %v6099_v13 = vadd.s32 32, %v5646_v31  ;;  %vm3174_vm10 = vcmp.ge.s32.totalorder %v3138_v1, 1 }
 0x1f5   : > { %v1490_v54 = vsel %vm1472_vm14, %v1451_v23, %v1137_v8  ;;  %vm3210_vm0 = vcmp.le.s32.totalorder %v3138_v1, 16  ;;  %v2491_v23 = vadd.s32 %v2490_v19, %v2480_v61  ;;  %vm3001_vm2 = vcmp.ne.s32.totalorder %v2263_v42, 0 }
 0x1f6   : > { %v6059_v4 = vsel %vm1511_vm15, %v1490_v54, %v1216_v22  ;;  %v6069_v16 = vpop.permute.xlu2 %1152  ;;  %v2288_v39 = vadd.s32 %v2287_v37, %v2277_v25  ;;  %v2510_v8 = vshll.u32 %v6086_v51, 16  ;;  %vm3037_vm4 = vcmp.lt.s32.totalorder %v2263_v42, 0  ;;  %vm3246_vm9 = vmand %vm3174_vm10, %vm3210_vm0 }
 0x1f7   : > { %v1614_v43 = vshll.u32 %v6059_v4, 16  ;;  %v2507_v5 = vmul.u32 58254, %v2502_v11  ;;  %vm2512_vm3 = vc.u32 %v2504_v62, %v2508_v49  ;;  %v2514_v52 = vadd.s32 %v2508_v49, %v2504_v62  ;;  %vm3073_vm5 = vmand %vm3037_vm4, %vm3001_vm2 }
 0x1f8   : > { %v6080_v45 = vpop.permute.xlu1 %880  ;;  %vm7095_vm6 = vcmask 195584   ;;  %v6113_v10 = vmul.f32 %v6072_v28, %v5960_v21  ;;  %v3109_v50 = vadd.s32 18, %v2263_v42  ;;  %v2513_v47 = vsel %vm2512_vm3, 1, %v4310_v30 }
 0x1f9   : > { %v6078_v7 = vrot.slane %v1614_v43, 1  ;;  %v6106_v63 = vsel %vm7095_vm6, %v7094_v2, %v5953_v34  ;;  %v6120_v34 = vmul.f32 %v6089_v32, %v5991_v60  ;;  %vm2516_vm8 = vc.u32 %v2514_v52, %v2510_v8  ;;  %vm7096_vm10 = vmmov %vm7095_vm6 }
 0x1fa   : > { %v3910_v21 = vsel %vm3246_vm9, 1.0, %v4311_v24  ;;  %v2492_v14 = vadd.s32 %v2491_v23, %v2482_v0  ;;  %v2515_v1 = vadd.s32 %v2513_v47, %v2507_v5  ;;  %v2067_v61 = vshrl.u32 %v6099_v13, 16 }
 0x1fb   : > { %v1617_v22 = vsel %vm437_vm1, %v5844_v38, %v6078_v7  ;;  %v2279_v38 = vshrl.u32 %v6040_v26, 16  ;;  %v2066_v26 = vand.u32 65535, %v6099_v13  ;;  %v1618_v19 = vshrl.u32 %v6059_v4, 16 }
 0x1fc   : > { %3896 = vmatmul.msk.bf16.gmra.mxu1 %vm1715_vm7, %v1617_v22  ;;  %v755_v17 = vpop.permute.xlu0 %754  ;;  %v1788_v15 = vpop.f32.mrf.mxu0  ;;  %v2517_v60 = vsel %vm2516_vm8, 1, %v4310_v30  ;;  %v6133_v37 = vmul.u32 14564, %v2067_v61  ;;  %v2509_v4 = vshrl.u32 %v6076_v33, 16  ;;  %v6138_v8 = vadd.s32 40, %v5646_v31 }
 0x1fd   : > { %v3425_v57 = vmul.f32 %v3909_v12, %v1788_v15  ;;  %v2289_v11 = vadd.s32 %v2288_v39, %v2279_v38  ;;  %v2070_v22 = vmul.u32 58254, %v2066_v26  ;;  %v3145_v12 = vsel %vm3073_vm5, %v3109_v50, %v2263_v42 }
 0x1fe   : > { %v6115_v48 = vpop.permute.xlu2 %756  ;;  %v2069_v62 = vmul.u32 14564, %v2066_v26  ;;  %v1620_v23 = vor.u32 %v1618_v19, %v6078_v7  ;;  %v2519_v38 = vadd.s32 %v2517_v60, %v2515_v1  ;;  %v2493_v42 = vshrl.u32 %v2492_v14, 4 }
 0x1ff   : > { %v3460_v54 = vadd.f32 %v5927_v56, %v3425_v57  ;;  %v3503_v59 = vmul.f32 %v3425_v57, %v1788_v15  ;;  %v1646_v56 = vshrl.u32 %v6008_v41, 16  ;;  %v2290_v36 = vshrl.u32 %v2289_v11, 4 }
 0x200   : > { %v966_v29 = vpop.permute.xlu1 %965  ;;  %v2072_v57 = vmul.u32 58254, %v2067_v61  ;;  %v2073_v39 = vshll.u32 %v2070_v22, 16  ;;  %v1350_v2 = vsel %vm7096_vm10, %v4986_v46, %v755_v17  ;;  %vm3181_vm0 = vcmp.ge.s32.totalorder %v3145_v12, 1 }
 0x201   : > { %v3538_v43 = vadd.f32 %v5948_v6, %v3503_v59  ;;  %v6131_v6 = vor.u32 %v1646_v56, %v6026_v9  ;;  %v2291_v52 = vmul.u32 18, %v2290_v36  ;;  %v2075_v7 = vshll.u32 %v6133_v37, 16 }
 0x202   : > { %vm2077_vm2 = vc.u32 %v2069_v62, %v2073_v39  ;;  %v1624_v59 = vsel %vm437_vm1, %v1620_v23, %v5613_v55  ;;  %v2520_v11 = vadd.s32 %v2519_v38, %v2509_v4  ;;  %v2079_v47 = vadd.s32 %v2073_v39, %v2069_v62 }
 0x203   : > { %v2078_v26 = vsel %vm2077_vm2, 1, %v4310_v30  ;;  %v2095_v46 = vand.u32 65535, %v6138_v8  ;;  %v1389_v17 = vsel %vm1355_vm11, %v1350_v2, %v5979_v35  ;;  %vm3217_vm4 = vcmp.le.s32.totalorder %v3145_v12, 16 }
 0x204   : > { %v960_v25 = vpop.permute.xlu0 %959  ;;  %v1790_v41 = vpop.f32.mrf.mxu0  ;;  %v2080_v56 = vadd.s32 %v2078_v26, %v2072_v57  ;;  %v2292_v55 = vsub.s32 %v5994_v58, %v2291_v52  ;;  %v2074_v14 = vshrl.u32 %v2070_v22, 16  ;;  %vm2081_vm3 = vc.u32 %v2079_v47, %v2075_v7  ;;  %vm3253_vm6 = vmand %vm3181_vm0, %vm3217_vm4 }
 0x205   : > { %v3426_v0 = vmul.f32 %v3910_v21, %v1790_v41  ;;  %v3989_v49 = vpack.c.bf16 %v1790_v41, %v1788_v15  ;;  %v1428_v21 = vsel %vm1394_vm12, %v1389_v17, %v966_v29  ;;  %v6161_v1 = vmul.u32 58254, %v2095_v46  ;;  %v7099_v17 = vld [vmem:[#allocation14_spill] sm:$0xff] }
 0x206   : > { %v6152_v50 = vpop.permute.xlu2 %1022  ;;  %v1383_v61 = vsel %vm1355_vm11, %v6106_v63, %v6080_v45  ;;  %v1669_v58 = vor.u32 %v1667_v20, %v5956_v27  ;;  %v2082_v36 = vsel %vm2081_vm3, 1, %v4310_v30  ;;  %v2494_v60 = vmul.u32 18, %v2493_v42 }
 0x207   : > { %v6140_v5 = vadd.f32 %v3460_v54, %v3426_v0  ;;  %v3504_v9 = vmul.f32 %v3426_v0, %v1790_v41  ;;  %4077 = vst [vmem:[%s5931_s7 + $0x8] sm:$0xff] %v3989_v49   ;;  %v2511_v54 = vshrl.u32 %v6086_v51, 16  ;;  %v2096_v51 = vshrl.u32 %v6138_v8, 16 }
 0x208   : > { %v1147_v15 = vpop.permute.xlu1 %1146  ;;  %v1422_v29 = vsel %vm1394_vm12, %v1383_v61, %v960_v25  ;;  %v2084_v41 = vadd.s32 %v2082_v36, %v2080_v56  ;;  %vm3002_vm9 = vcmp.ne.s32.totalorder %v2292_v55, 0  ;;  %v2076_v45 = vshrl.u32 %v6133_v37, 16  ;;  %v7101_v36 = vld [vmem:[#allocation36_spill] sm:$0xff] }
 0x209   : > { %v6146_v33 = vadd.f32 %v3538_v43, %v3504_v9  ;;  %v2521_v22 = vadd.s32 %v2520_v11, %v2511_v54  ;;  %v2098_v63 = vmul.u32 14564, %v2095_v46  ;;  %v6176_v62 = vmul.u32 14564, %v2096_v51 }
 0x20a   : > { %vm3038_vm5 = vcmp.lt.s32.totalorder %v2292_v55, 0  ;;  %v2085_v27 = vadd.s32 %v2084_v41, %v2074_v14  ;;  %v2102_v20 = vshll.u32 %v6161_v1, 16  ;;  %v1461_v25 = vsel %vm1433_vm13, %v1422_v29, %v6030_v53 }
 0x20b   : > { %v6184_v12 = vsel %vm3253_vm6, 1.0, %v4311_v24  ;;  %v2101_v37 = vmul.u32 58254, %v2096_v51  ;;  %v1500_v23 = vsel %vm1472_vm14, %v1461_v25, %v1147_v15  ;;  %v3110_v38 = vadd.s32 18, %v2292_v55  ;;  %vm6192_vm8 = vmand %vm3038_vm5, %vm3002_vm9 }
 0x20c   : > { %3897 = vmatmul.msk.bf16.gmra.mxu1 %vm1715_vm7, %v1624_v59  ;;  %v1021_v43 = vpop.permute.xlu0 %1020  ;;  %v2086_v53 = vadd.s32 %v2085_v27, %v2076_v45  ;;  %v2104_v9 = vshll.u32 %v6176_v62, 16  ;;  %vm2106_vm10 = vc.u32 %v2098_v63, %v2102_v20  ;;  %v2108_v42 = vadd.s32 %v2102_v20, %v2098_v63 }
 0x20d   : > { %v1467_v35 = vsel %vm1433_vm13, %v1428_v21, %v1021_v43  ;;  %v6167_v19 = vpop.f32.mrf.mxu1  ;;  %v2107_v15 = vsel %vm2106_vm10, 1, %v4310_v30  ;;  %v6200_v59 = vadd.s32 48, %v5646_v31  ;;  %v6205_v11 = vsub.s32 %v5964_v3, %v2494_v60 }
 0x20e   : > { %v1506_v18 = vsel %vm1472_vm14, %v1467_v35, %v6069_v16  ;;  %v2522_v16 = vshrl.u32 %v2521_v22, 4  ;;  %v759_v52 = vpop.permute.xlu2 %758  ;;  %v2087_v56 = vshrl.u32 %v2086_v53, 4  ;;  %v2109_v46 = vadd.s32 %v2107_v15, %v2101_v37 }
 0x20f   : > { %vm7100_vm0 = vcmask 195584   ;;  %v6214_v51 = vsel %vm6192_vm8, %v3110_v38, %v2292_v55  ;;  %v2103_v14 = vshrl.u32 %v6161_v1, 16  ;;  %vm2110_vm2 = vc.u32 %v2108_v42, %v2104_v9 }
 0x210   : > { %v1232_v0 = vpop.permute.xlu1 %1231  ;;  %v1352_v43 = vsel %vm7100_vm0, %v7099_v17, %v6115_v48  ;;  %v2088_v35 = vmul.u32 18, %v2087_v56  ;;  %vm7102_vm4 = vmmov %vm7100_vm0  ;;  %v6226_v55 = vmul.u32 18, %v2522_v16  ;;  %v2111_v60 = vsel %vm2110_vm2, 1, %v4310_v30 }
 0x211   : > { %v6187_v49 = vsel %vm1511_vm15, %v1506_v18, %v1232_v0  ;;  %v6222_v29 = vsel %vm7102_vm4, %v7101_v36, %v759_v52  ;;  %v2124_v22 = vand.u32 65535, %v6200_v59  ;;  %v2105_v41 = vshrl.u32 %v6176_v62, 16 }
 0x212   : > { %v1670_v4 = vshll.u32 %v6187_v49, 16  ;;  %v2113_v45 = vadd.s32 %v2111_v60, %v2109_v46  ;;  %v1674_v63 = vshrl.u32 %v6187_v49, 16  ;;  %v2125_v18 = vshrl.u32 %v6200_v59, 16 }
 0x213   : > { %v6237_v27 = vmul.u32 58254, %v2124_v22  ;;  %v6243_v49 = vadd.s32 96, %v5646_v31 }
 0x214   : > { %v1226_v57 = vpop.permute.xlu0 %1225  ;;  %v1672_v2 = vrot.slane %v1670_v4, 1  ;;  %v2114_v37 = vadd.s32 %v2113_v45, %v2103_v14  ;;  %v6240_v62 = vmul.u32 14564, %v2125_v18  ;;  %v2130_v53 = vmul.u32 58254, %v2125_v18 }
 0x215   : > { %v1539_v7 = vsel %vm1511_vm15, %v1500_v23, %v1226_v57  ;;  %v6207_v47 = vpop.f32.mrf.mxu1  ;;  %v2131_v57 = vshll.u32 %v6237_v27, 16  ;;  %v2132_v46 = vshrl.u32 %v6237_v27, 16  ;;  %v2298_v14 = vand.u32 65535, %v6243_v49 }
 0x216   : > { %v1649_v54 = vshll.u32 %v1539_v7, 16  ;;  %v6202_v26 = vpop.f32.mrf.mxu2  ;;  %v4009_v21 = vpack.c.bf16 %v6207_v47, %v6167_v19  ;;  %v1673_v3 = vsel %vm437_vm1, %v1669_v58, %v1672_v2  ;;  %v2089_v58 = vsub.s32 %v6099_v13, %v2088_v35 }
 0x217   : > { %3904 = vmatmul.msk.bf16.gmra.mxu3 %vm1715_vm7, %v1673_v3  ;;  %v1653_v0 = vshrl.u32 %v1539_v7, 16  ;;  %v2127_v13 = vmul.u32 14564, %v2124_v22  ;;  %v2115_v16 = vadd.s32 %v2114_v37, %v2105_v41  ;;  %v1676_v9 = vor.u32 %v1674_v63, %v1672_v2 }
 0x218   : > { %v1651_v61 = vrot.slane %v1649_v54, 1  ;;  %4081 = vst [vmem:[%s5931_s7 + $0x28] sm:$0xff] %v4009_v21   ;;  %v968_v48 = vpop.permute.xlu1 %967  ;;  %vm2995_vm3 = vcmp.ne.s32.totalorder %v2089_v58, 0  ;;  %vm3031_vm6 = vcmp.lt.s32.totalorder %v2089_v58, 0  ;;  %v3103_v25 = vadd.s32 18, %v2089_v58 }
 0x219   : > { %vm3067_vm9 = vmand %vm3031_vm6, %vm2995_vm3  ;;  %v2116_v52 = vshrl.u32 %v2115_v16, 4  ;;  %v2133_v7 = vshll.u32 %v6240_v62, 16  ;;  %vm2135_vm0 = vc.u32 %v2127_v13, %v2131_v57  ;;  %v2137_v2 = vadd.s32 %v2131_v57, %v2127_v13 }
 0x21a   : > { %v1652_v1 = vsel %vm437_vm1, %v6131_v6, %v1651_v61  ;;  %v3139_v38 = vsel %vm3067_vm9, %v3103_v25, %v2089_v58  ;;  %v1655_v42 = vor.u32 %v1653_v0, %v1651_v61  ;;  %v2136_v21 = vsel %vm2135_vm0, 1, %v4310_v30 }
 0x21b   : > { %3901 = vmatmul.msk.bf16.gmra.mxu2 %vm1715_vm7, %v1652_v1  ;;  %vm3175_vm5 = vcmp.ge.s32.totalorder %v3139_v38, 1  ;;  %vm3211_vm8 = vcmp.le.s32.totalorder %v3139_v38, 16  ;;  %v2134_v3 = vshrl.u32 %v6240_v62, 16  ;;  %v2138_v35 = vadd.s32 %v2136_v21, %v2130_v53 }
 0x21c   : > { %v889_v20 = vpop.permute.xlu0 %888  ;;  %vm3247_vm10 = vmand %vm3175_vm5, %vm3211_vm8  ;;  %v2299_v36 = vshrl.u32 %v6243_v49, 16  ;;  %vm2139_vm2 = vc.u32 %v2137_v2, %v2133_v7  ;;  %v2301_v60 = vmul.u32 14564, %v2298_v14  ;;  %v6262_v22 = vmul.u32 58254, %v2298_v14 }
 0x21d   : > { %v1391_v6 = vsel %vm1355_vm11, %v1352_v43, %v889_v20  ;;  %v3911_v15 = vsel %vm3247_vm10, 1.0, %v4311_v24  ;;  %v2117_v43 = vmul.u32 18, %v2116_v52  ;;  %v2140_v45 = vsel %vm2139_vm2, 1, %v4310_v30 }
 0x21e   : > { %v1430_v23 = vsel %vm1394_vm12, %v1391_v6, %v968_v48  ;;  %v6246_v4 = vpop.f32.mrf.mxu2  ;;  %v6270_v20 = vadd.s32 56, %v5646_v31  ;;  %v2304_v37 = vmul.u32 58254, %v2299_v36  ;;  %v2305_v6 = vshll.u32 %v6262_v22, 16 }
 0x21f   : > { %v4029_v39 = vpack.c.bf16 %v6246_v4, %v6202_v26  ;;  %v1469_v54 = vsel %vm1433_vm13, %v1430_v23, %v6152_v50  ;;  %v2118_v50 = vsub.s32 %v6138_v8, %v2117_v43  ;;  %v2142_v8 = vadd.s32 %v2140_v45, %v2138_v35  ;;  %v1025_v35 = vpop.permute.xlu2 %1024 }
 0x220   : > { %v1234_v56 = vpop.permute.xlu1 %1233  ;;  %v2306_v57 = vshrl.u32 %v6262_v22, 16  ;;  %vm2309_vm10 = vc.u32 %v2301_v60, %v2305_v6  ;;  %v2154_v21 = vshrl.u32 %v6270_v20, 16  ;;  %vm3218_vm2 = vcmp.le.s32.totalorder %v6214_v51, 16 }
 0x221   : > { %4085 = vst [vmem:[%s5931_s7 + $0x48] sm:$0xff] %v4029_v39   ;;  %vm2996_vm4 = vcmp.ne.s32.totalorder %v2118_v50, 0  ;;  %vm3032_vm3 = vcmp.lt.s32.totalorder %v2118_v50, 0  ;;  %v3104_v0 = vadd.s32 18, %v2118_v50  ;;  %v2143_v23 = vadd.s32 %v2142_v8, %v2132_v46 }
 0x222   : > { %v1793_v17 = vpop.f32.mrf.mxu0  ;;  %vm3068_vm6 = vmand %vm3032_vm3, %vm2996_vm4  ;;  %v2310_v46 = vsel %vm2309_vm10, 1, %v4310_v30  ;;  %v2158_v22 = vmul.u32 14564, %v2154_v21 }
 0x223   : > { %v3427_v61 = vmul.f32 %v3911_v15, %v1793_v17  ;;  %v3140_v25 = vsel %vm3068_vm6, %v3104_v0, %v2118_v50  ;;  %v2312_v43 = vadd.s32 %v2310_v46, %v2304_v37 }
 0x224   : > { %v1155_v48 = vpop.permute.xlu0 %1154  ;;  %vm3176_vm9 = vcmp.ge.s32.totalorder %v3140_v25, 1  ;;  %vm3212_vm5 = vcmp.le.s32.totalorder %v3140_v25, 16  ;;  %v2162_v8 = vshll.u32 %v2158_v22, 16 }
 0x225   : > { %v3462_v1 = vadd.f32 %v6140_v5, %v3427_v61  ;;  %v3505_v58 = vmul.f32 %v3427_v61, %v1793_v17  ;;  %v1508_v41 = vsel %vm1472_vm14, %v1469_v54, %v1155_v48  ;;  %v6272_v5 = vmul.u32 14564, %v2299_v36  ;;  %vm3248_vm8 = vmand %vm3176_vm9, %vm3212_vm5 }
 0x226   : > { %v1547_v63 = vsel %vm1511_vm15, %v1508_v41, %v1234_v56  ;;  %v3912_v39 = vsel %vm3248_vm8, 1.0, %v4311_v24  ;;  %v2144_v56 = vadd.s32 %v2143_v23, %v2134_v3 }
 0x227   : > { %v3540_v18 = vadd.f32 %v6146_v33, %v3505_v58  ;;  %v1677_v27 = vshll.u32 %v1547_v63, 16  ;;  %v1681_v38 = vshrl.u32 %v1547_v63, 16  ;;  %v1659_v33 = vsel %vm437_vm1, %v1655_v42, %v5923_v40 }
 0x228   : > { %v970_v62 = vpop.permute.xlu1 %969  ;;  %v2307_v7 = vshll.u32 %v6272_v5, 16  ;;  %v2311_v40 = vadd.s32 %v2305_v6, %v2301_v60  ;;  %v2145_v14 = vshrl.u32 %v2144_v56, 4  ;;  %v2308_v61 = vshrl.u32 %v6272_v5, 16 }
 0x229   : > { %v1679_v13 = vrot.slane %v1677_v27, 1 }
 0x22a   : > { %v1795_v16 = vpop.f32.mrf.mxu0  ;;  %vm2313_vm0 = vc.u32 %v2311_v40, %v2307_v7 }
 0x22b   : > { %v3994_v53 = vpack.c.bf16 %v1795_v16, %v1793_v17  ;;  %3902 = vmatmul.msk.bf16.gmra.mxu2 %vm1715_vm7, %v1659_v33  ;;  %v1680_v52 = vsel %vm437_vm1, %v1676_v9, %v1679_v13  ;;  %v3428_v15 = vmul.f32 %v3912_v39, %v1795_v16  ;;  %v2153_v17 = vand.u32 65535, %v6270_v20 }
 0x22c   : > { %3905 = vmatmul.msk.bf16.gmra.mxu3 %vm1715_vm7, %v1680_v52  ;;  %v891_v54 = vpop.permute.xlu0 %890  ;;  %v2314_v60 = vsel %vm2313_vm0, 1, %v4310_v30  ;;  %v1683_v58 = vor.u32 %v1681_v38, %v1679_v13  ;;  %vm3009_vm0 = vcmp.ne.s32.totalorder %v6205_v11, 0 }
 0x22d   : > { %4078 = vst [vmem:[%s5931_s7 + $0x10] sm:$0xff] %v3994_v53   ;;  %v1393_v42 = vsel %vm1355_vm11, %v6222_v29, %v891_v54  ;;  %v6289_v9 = vadd.f32 %v3462_v1, %v3428_v15  ;;  %v3506_v2 = vmul.f32 %v3428_v15, %v1795_v16  ;;  %v2156_v36 = vmul.u32 14564, %v2153_v17 }
 0x22e   : > { %v1432_v3 = vsel %vm1394_vm12, %v1393_v42, %v970_v62  ;;  %v2157_v48 = vmul.u32 58254, %v2153_v17  ;;  %v2146_v29 = vmul.u32 18, %v2145_v14  ;;  %v2316_v41 = vadd.s32 %v2314_v60, %v2312_v43 }
 0x22f   : > { %v6293_v50 = vadd.f32 %v3540_v18, %v3506_v2  ;;  %v2159_v1 = vmul.u32 58254, %v2154_v21  ;;  %vm3182_vm11 = vcmp.ge.s32.totalorder %v6214_v51, 1  ;;  %v1471_v63 = vsel %vm1433_vm13, %v1432_v3, %v1025_v35 }
 0x230   : > { %v2160_v45 = vshll.u32 %v2157_v48, 16  ;;  %v2147_v27 = vsub.s32 %v6200_v59, %v2146_v29  ;;  %v6301_v18 = vadd.s32 160, %v5646_v31  ;;  %v1236_v25 = vpop.permute.xlu1 %1235  ;;  %v2317_v5 = vadd.s32 %v2316_v41, %v2306_v57 }
 0x231   : > { %v2161_v37 = vshrl.u32 %v2157_v48, 16  ;;  %v2163_v15 = vshrl.u32 %v2158_v22, 16  ;;  %v6315_v21 = vadd.s32 104, %v5646_v31  ;;  %v6343_v51 = vadd.s32 18, %v6205_v11 }
 0x232   : > { %v1798_v0 = vpop.f32.mrf.mxu0  ;;  %vm2164_vm12 = vc.u32 %v2156_v36, %v2160_v45  ;;  %v2166_v6 = vadd.s32 %v2160_v45, %v2156_v36  ;;  %vm2997_vm4 = vcmp.ne.s32.totalorder %v2147_v27, 0  ;;  %vm3033_vm3 = vcmp.lt.s32.totalorder %v2147_v27, 0 }
 0x233   : > { %v3105_v13 = vadd.s32 18, %v2147_v27  ;;  %v2165_v23 = vsel %vm2164_vm12, 1, %v4310_v30  ;;  %vm3069_vm6 = vmand %vm3033_vm3, %vm2997_vm4  ;;  %v2318_v16 = vadd.s32 %v2317_v5, %v2308_v61  ;;  %v2530_v53 = vand.u32 65535, %v6301_v18 }
 0x234   : > { %v1157_v62 = vpop.permute.xlu0 %1156  ;;  %v2167_v59 = vadd.s32 %v2165_v23, %v2159_v1  ;;  %vm2168_vm13 = vc.u32 %v2166_v6, %v2162_v8  ;;  %v2531_v56 = vshrl.u32 %v6301_v18, 16 }
 0x235   : > { %v1510_v38 = vsel %vm1472_vm14, %v1471_v63, %v1157_v62  ;;  %v3141_v33 = vsel %vm3069_vm6, %v3105_v13, %v2147_v27  ;;  %v2169_v57 = vsel %vm2168_vm13, 1, %v4310_v30  ;;  %v2319_v7 = vshrl.u32 %v2318_v16, 4  ;;  %v6312_v43 = vpop.f32.mrf.mxu1  ;;  %vm6331_vm14 = vmand %vm3182_vm11, %vm3218_vm2 }
 0x236   : > { %v1549_v39 = vsel %vm1511_vm15, %v1510_v38, %v1236_v25  ;;  %vm3177_vm9 = vcmp.ge.s32.totalorder %v3141_v33, 1  ;;  %vm3213_vm5 = vcmp.le.s32.totalorder %v3141_v33, 16  ;;  %v2171_v54 = vadd.s32 %v2169_v57, %v2167_v59 }
 0x237   : > { %v1684_v52 = vshll.u32 %v1549_v39, 16  ;;  %vm3249_vm8 = vmand %vm3177_vm9, %vm3213_vm5  ;;  %v6309_v46 = vmul.u32 58254, %v2530_v53  ;;  %v2320_v17 = vmul.u32 18, %v2319_v7  ;;  %v2533_v3 = vmul.u32 14564, %v2530_v53 }
 0x238   : > { %v3913_v40 = vsel %vm3249_vm8, 1.0, %v4311_v24  ;;  %v2172_v61 = vadd.s32 %v2171_v54, %v2161_v37  ;;  %v2535_v35 = vmul.u32 14564, %v2531_v56  ;;  %v2536_v45 = vmul.u32 58254, %v2531_v56 }
 0x239   : > { %v1686_v42 = vrot.slane %v1684_v52, 1  ;;  %v3429_v2 = vmul.f32 %v3913_v40, %v1798_v0  ;;  %v2321_v36 = vsub.s32 %v6243_v49, %v2320_v17  ;;  %v2537_v60 = vshll.u32 %v6309_v46, 16 }
 0x23a   : > { %v6317_v14 = vpop.f32.mrf.mxu0  ;;  %v2173_v1 = vadd.s32 %v2172_v61, %v2163_v15  ;;  %v2328_v37 = vshrl.u32 %v6315_v21, 16  ;;  %v6350_v6 = vsel %vm6331_vm14, 1.0, %v4311_v24  ;;  %v2538_v13 = vshrl.u32 %v6309_v46, 16 }
 0x23b   : > { %v3999_v48 = vpack.c.bf16 %v6317_v14, %v1798_v0  ;;  %v1687_v29 = vsel %vm437_vm1, %v1683_v58, %v1686_v42  ;;  %v6324_v22 = vadd.f32 %v6289_v9, %v3429_v2  ;;  %v3507_v41 = vmul.f32 %v3429_v2, %v1798_v0 }
 0x23c   : > { %3906 = vmatmul.msk.bf16.gmra.mxu3 %vm1715_vm7, %v1687_v29  ;;  %vm3003_vm15 = vcmp.ne.s32.totalorder %v2321_v36, 0  ;;  %vm3039_vm1 = vcmp.lt.s32.totalorder %v2321_v36, 0  ;;  %v2539_v58 = vshll.u32 %v2535_v35, 16  ;;  %v2327_v9 = vand.u32 65535, %v6315_v21 }
 0x23d   : > { %4079 = vst [vmem:[%s5931_s7 + $0x18] sm:$0xff] %v3999_v48   ;;  %v6338_v63 = vadd.f32 %v6293_v50, %v3507_v41  ;;  %v3111_v0 = vadd.s32 18, %v2321_v36  ;;  %v2174_v27 = vshrl.u32 %v2173_v1, 4  ;;  %vm2541_vm7 = vc.u32 %v2533_v3, %v2537_v60  ;;  %vm3075_vm10 = vmand %vm3039_vm1, %vm3003_vm15  ;;  %v6361_v7 = vpop.f32.mrf.mxu1 }
 0x23e   : > { %v6340_v8 = vpop.f32.mrf.mxu2  ;;  %v2542_v25 = vsel %vm2541_vm7, 1, %v4310_v30  ;;  %v2543_v5 = vadd.s32 %v2537_v60, %v2533_v3  ;;  %vm3045_vm11 = vcmp.lt.s32.totalorder %v6205_v11, 0  ;;  %v2330_v23 = vmul.u32 14564, %v2327_v9 }
 0x23f   : > { %v2175_v50 = vmul.u32 18, %v2174_v27  ;;  %v2544_v62 = vadd.s32 %v2542_v25, %v2536_v45  ;;  %v2331_v38 = vmul.u32 58254, %v2327_v9  ;;  %v2332_v16 = vmul.u32 14564, %v2328_v37 }
 0x240   : > { %vm2545_vm2 = vc.u32 %v2543_v5, %v2539_v58  ;;  %v6357_v59 = vsub.s32 %v6045_v44, %v6226_v55  ;;  %v3147_v33 = vsel %vm3075_vm10, %v3111_v0, %v2321_v36  ;;  %v2540_v53 = vshrl.u32 %v2535_v35, 16 }
 0x241   : > { %v2176_v39 = vsub.s32 %v6270_v20, %v2175_v50  ;;  %v2546_v57 = vsel %vm2545_vm2, 1, %v4310_v30  ;;  %v2333_v15 = vmul.u32 58254, %v2328_v37  ;;  %v2334_v54 = vshll.u32 %v2331_v38, 16  ;;  %vm3081_vm2 = vmand %vm3045_vm11, %vm3009_vm0 }
 0x242   : > { %v2548_v52 = vadd.s32 %v2546_v57, %v2544_v62  ;;  %v2336_v46 = vshll.u32 %v2332_v16, 16  ;;  %vm3183_vm3 = vcmp.ge.s32.totalorder %v3147_v33, 1  ;;  %vm3219_vm6 = vcmp.le.s32.totalorder %v3147_v33, 16 }
 0x243   : > { %vm2998_vm12 = vcmp.ne.s32.totalorder %v2176_v39, 0  ;;  %vm3034_vm4 = vcmp.lt.s32.totalorder %v2176_v39, 0  ;;  %v3106_v56 = vadd.s32 18, %v2176_v39  ;;  %vm2338_vm9 = vc.u32 %v2330_v23, %v2334_v54  ;;  %vm3255_vm1 = vmand %vm3183_vm3, %vm3219_vm6 }
 0x244   : > { %vm3070_vm13 = vmand %vm3034_vm4, %vm2998_vm12  ;;  %v2549_v44 = vadd.s32 %v2548_v52, %v2538_v13  ;;  %v2339_v20 = vsel %vm2338_vm9, 1, %v4310_v30  ;;  %v2340_v40 = vadd.s32 %v2334_v54, %v2330_v23  ;;  %v4014_v42 = vpack.c.bf16 %v6361_v7, %v6312_v43 }
 0x245   : > { %v3142_v55 = vsel %vm3070_vm13, %v3106_v56, %v2176_v39  ;;  %v2341_v2 = vadd.s32 %v2339_v20, %v2333_v15  ;;  %v3433_v61 = vmul.f32 %v6184_v12, %v6167_v19  ;;  %v2335_v3 = vshrl.u32 %v2331_v38, 16 }
 0x246   : > { %vm3178_vm5 = vcmp.ge.s32.totalorder %v3142_v55, 1  ;;  %vm3214_vm8 = vcmp.le.s32.totalorder %v3142_v55, 16  ;;  %v2550_v17 = vadd.s32 %v2549_v44, %v2540_v53  ;;  %vm2342_vm15 = vc.u32 %v2340_v40, %v2336_v46  ;;  %4082 = vst [vmem:[%s5931_s7 + $0x30] sm:$0xff] %v4014_v42   ;;  %v6369_v35 = vpop.f32.mrf.mxu2 }
 0x247   : > { %vm3250_vm14 = vmand %vm3178_vm5, %vm3214_vm8  ;;  %v6372_v36 = vadd.s32 168, %v5646_v31  ;;  %v2337_v60 = vshrl.u32 %v2332_v16, 16  ;;  %v2343_v41 = vsel %vm2342_vm15, 1, %v4310_v30  ;;  %vm3010_vm7 = vcmp.ne.s32.totalorder %v6357_v59, 0 }
 0x248   : > { %v3914_v48 = vsel %vm3250_vm14, 1.0, %v4311_v24  ;;  %v2551_v29 = vshrl.u32 %v2550_v17, 4  ;;  %v2345_v1 = vadd.s32 %v2343_v41, %v2341_v2  ;;  %vm3046_vm10 = vcmp.lt.s32.totalorder %v6357_v59, 0 }
 0x249   : > { %v3430_v12 = vmul.f32 %v3914_v48, %v6317_v14  ;;  %v2559_v45 = vand.u32 65535, %v6372_v36  ;;  %v2560_v49 = vshrl.u32 %v6372_v36, 16  ;;  %v3118_v58 = vadd.s32 18, %v6357_v59  ;;  %vm3082_vm0 = vmand %vm3046_vm10, %vm3010_vm7 }
 0x24a   : > { %v4034_v9 = vpack.c.bf16 %v6369_v35, %v6340_v8  ;;  %v3919_v0 = vsel %vm3255_vm1, 1.0, %v4311_v24  ;;  %v2346_v5 = vadd.s32 %v2345_v1, %v2335_v3  ;;  %v2552_v37 = vmul.u32 18, %v2551_v29 }
 0x24b   : > { %v3465_v27 = vadd.f32 %v6324_v22, %v3430_v12  ;;  %v3508_v25 = vmul.f32 %v3430_v12, %v6317_v14  ;;  %v2562_v50 = vmul.u32 14564, %v2559_v45  ;;  %v2563_v13 = vmul.u32 58254, %v2559_v45 }
 0x24c   : > { %v6393_v62 = vmul.u32 14564, %v2560_v49  ;;  %4086 = vst [vmem:[%s5931_s7 + $0x50] sm:$0xff] %v4034_v9   ;;  %v3434_v23 = vmul.f32 %v6350_v6, %v6207_v47  ;;  %v2347_v33 = vadd.s32 %v2346_v5, %v2337_v60  ;;  %v6402_v22 = vsel %vm3081_vm2, %v6343_v51, %v6205_v11 }
 0x24d   : > { %v3466_v38 = vadd.f32 %v3465_v27, %v6072_v28  ;;  %v3543_v16 = vadd.f32 %v6338_v63, %v3508_v25  ;;  %v3435_v14 = vmul.f32 %v3919_v0, %v6312_v43  ;;  %v2565_v39 = vmul.u32 58254, %v2560_v49 }
 0x24e   : > { %v2566_v57 = vshll.u32 %v2563_v13, 16  ;;  %v2348_v53 = vshrl.u32 %v2347_v33, 4  ;;  %v6412_v63 = vadd.s32 224, %v5646_v31  ;;  %v3511_v11 = vmul.f32 %v3433_v61, %v6167_v19 }
 0x24f   : > { %v3467_v6 = vadd.f32 %v3466_v38, %v6089_v32  ;;  %v3544_v28 = vadd.f32 %v3543_v16, %v6113_v10  ;;  %v6416_v51 = vsub.s32 %v6301_v18, %v2552_v37  ;;  %v2568_v52 = vshll.u32 %v6393_v62, 16 }
 0x250   : > { %vm2570_vm11 = vc.u32 %v2562_v50, %v2566_v57  ;;  %v3512_v15 = vmul.f32 %v3434_v23, %v6207_v47  ;;  %v6421_v54 = vsel %vm3082_vm0, %v3118_v58, %v6357_v59  ;;  %v3513_v56 = vmul.f32 %v3435_v14, %v6312_v43 }
 0x251   : > { %v3468_v32 = vadd.f32 %v3467_v6, %v3433_v61  ;;  %v3545_v10 = vadd.f32 %v3544_v28, %v6120_v34  ;;  %v2349_v46 = vmul.u32 18, %v2348_v53  ;;  %v2571_v44 = vsel %vm2570_vm11, 1, %v4310_v30 }
 0x252   : > { %v2572_v19 = vadd.s32 %v2566_v57, %v2562_v50  ;;  %v2573_v20 = vadd.s32 %v2571_v44, %v2565_v39  ;;  %v2762_v40 = vand.u32 65535, %v6412_v63  ;;  %vm3011_vm12 = vcmp.ne.s32.totalorder %v6416_v51, 0 }
 0x253   : > { %v3546_v55 = vadd.f32 %v3545_v10, %v3511_v11  ;;  %v3469_v18 = vadd.f32 %v3468_v32, %v3434_v23  ;;  %v2350_v47 = vsub.s32 %v6315_v21, %v2349_v46  ;;  %v2567_v59 = vshrl.u32 %v2563_v13, 16 }
 0x254   : > { %vm2574_vm4 = vc.u32 %v2572_v19, %v2568_v52  ;;  %v2763_v42 = vshrl.u32 %v6412_v63, 16  ;;  %v2569_v43 = vshrl.u32 %v6393_v62, 16  ;;  %v2765_v3 = vmul.u32 14564, %v2762_v40 }
 0x255   : > { %v3470_v34 = vadd.f32 %v3469_v18, %v3435_v14  ;;  %v3547_v17 = vadd.f32 %v3546_v55, %v3512_v15  ;;  %v2575_v2 = vsel %vm2574_vm4, 1, %v4310_v30  ;;  %vm3004_vm3 = vcmp.ne.s32.totalorder %v2350_v47, 0 }
 0x256   : > { %vm3040_vm6 = vcmp.lt.s32.totalorder %v2350_v47, 0  ;;  %v3112_v61 = vadd.s32 18, %v2350_v47  ;;  %v2577_v29 = vadd.s32 %v2575_v2, %v2573_v20  ;;  %v2766_v60 = vmul.u32 58254, %v2762_v40 }
 0x257   : > { %vm3076_vm13 = vmand %vm3040_vm6, %vm3004_vm3  ;;  %v3548_v48 = vadd.f32 %v3547_v17, %v3513_v56  ;;  %v2767_v41 = vmul.u32 14564, %v2763_v42  ;;  %vm3189_vm9 = vcmp.ge.s32.totalorder %v6402_v22, 1  ;;  %vm3225_vm5 = vcmp.le.s32.totalorder %v6402_v22, 16 }
 0x258   : > { %vm3047_vm8 = vcmp.lt.s32.totalorder %v6416_v51, 0  ;;  %v3148_v21 = vsel %vm3076_vm13, %v3112_v61, %v2350_v47  ;;  %v2768_v12 = vmul.u32 58254, %v2763_v42  ;;  %v6436_v1 = vadd.s32 232, %v5646_v31 }
 0x259   : > { %vm3184_vm14 = vcmp.ge.s32.totalorder %v3148_v21, 1  ;;  %vm3220_vm15 = vcmp.le.s32.totalorder %v3148_v21, 16  ;;  %v2578_v45 = vadd.s32 %v2577_v29, %v2567_v59  ;;  %v2769_v49 = vshll.u32 %v2766_v60, 16  ;;  %vm3083_vm0 = vmand %vm3047_vm8, %vm3011_vm12 }
 0x25a   : > { %v3119_v58 = vadd.s32 18, %v6416_v51  ;;  %vm3256_vm1 = vmand %vm3184_vm14, %vm3220_vm15  ;;  %v2770_v9 = vshrl.u32 %v2766_v60, 16  ;;  %v2771_v0 = vshll.u32 %v2767_v41, 16  ;;  %v2791_v27 = vand.u32 65535, %v6436_v1 }
 0x25b   : > { %v3920_v25 = vsel %vm3256_vm1, 1.0, %v4311_v24  ;;  %v2579_v5 = vadd.s32 %v2578_v45, %v2569_v43  ;;  %vm2773_vm7 = vc.u32 %v2765_v3, %v2769_v49  ;;  %v2775_v37 = vadd.s32 %v2769_v49, %v2765_v3  ;;  %vm3261_vm12 = vmand %vm3189_vm9, %vm3225_vm5 }
 0x25c   : > { %vm3190_vm10 = vcmp.ge.s32.totalorder %v6421_v54, 1  ;;  %v3436_v50 = vmul.f32 %v3920_v25, %v6361_v7  ;;  %v2774_v13 = vsel %vm2773_vm7, 1, %v4310_v30  ;;  %v2792_v62 = vshrl.u32 %v6436_v1, 16 }
 0x25d   : > { %v2794_v23 = vmul.u32 14564, %v2791_v27  ;;  %v2580_v38 = vshrl.u32 %v2579_v5, 4  ;;  %v2776_v16 = vadd.s32 %v2774_v13, %v2768_v12  ;;  %vm2777_vm2 = vc.u32 %v2775_v37, %v2771_v0 }
 0x25e   : > { %v2795_v33 = vmul.u32 58254, %v2791_v27  ;;  %v6445_v14 = vadd.f32 %v3470_v34, %v3436_v50  ;;  %v3514_v39 = vmul.f32 %v3436_v50, %v6361_v7  ;;  %v2778_v57 = vsel %vm2777_vm2, 1, %v4310_v30 }
 0x25f   : > { %v6449_v6 = vmul.u32 14564, %v2792_v62  ;;  %v2581_v28 = vmul.u32 18, %v2580_v38  ;;  %v2772_v53 = vshrl.u32 %v2767_v41, 16  ;;  %v2780_v11 = vadd.s32 %v2778_v57, %v2776_v16 }
 0x260   : > { %v2798_v52 = vshll.u32 %v2795_v33, 16  ;;  %vm3226_vm11 = vcmp.le.s32.totalorder %v6421_v54, 16  ;;  %v6456_v15 = vadd.f32 %v3548_v48, %v3514_v39  ;;  %v2797_v32 = vmul.u32 58254, %v2792_v62 }
 0x261   : > { %v2800_v7 = vshll.u32 %v6449_v6, 16  ;;  %v2582_v10 = vsub.s32 %v6372_v36, %v2581_v28  ;;  %v2781_v56 = vadd.s32 %v2780_v11, %v2770_v9  ;;  %v3155_v44 = vsel %vm3083_vm0, %v3119_v58, %v6416_v51  ;;  %vm3262_vm14 = vmand %vm3190_vm10, %vm3226_vm11 }
 0x262   : > { %vm2802_vm4 = vc.u32 %v2794_v23, %v2798_v52  ;;  %v2804_v46 = vadd.s32 %v2798_v52, %v2794_v23  ;;  %v6463_v55 = vadd.s32 176, %v5646_v31  ;;  %v6466_v18 = vadd.s32 112, %v5646_v31 }
 0x263   : > { %v2803_v19 = vsel %vm2802_vm4, 1, %v4310_v30  ;;  %vm3012_vm3 = vcmp.ne.s32.totalorder %v2582_v10, 0  ;;  %vm3048_vm6 = vcmp.lt.s32.totalorder %v2582_v10, 0  ;;  %v3120_v36 = vadd.s32 18, %v2582_v10 }
 0x264   : > { %v2782_v20 = vadd.s32 %v2781_v56, %v2772_v53  ;;  %vm3084_vm13 = vmand %vm3048_vm6, %vm3012_vm3  ;;  %v6472_v40 = vpop.f32.mrf.mxu3  ;;  %v2805_v51 = vadd.s32 %v2803_v19, %v2797_v32  ;;  %vm2806_vm8 = vc.u32 %v2804_v46, %v2800_v7  ;;  %v2588_v47 = vand.u32 65535, %v6463_v55 }
 0x265   : > { %v2589_v59 = vshrl.u32 %v6463_v55, 16  ;;  %v3156_v42 = vsel %vm3084_vm13, %v3120_v36, %v2582_v10  ;;  %v2799_v17 = vshrl.u32 %v2795_v33, 16  ;;  %v2807_v43 = vsel %vm2806_vm8, 1, %v4310_v30 }
 0x266   : > { %v2783_v34 = vshrl.u32 %v2782_v20, 4  ;;  %v3925_v22 = vsel %vm3261_vm12, 1.0, %v4311_v24  ;;  %vm3191_vm9 = vcmp.ge.s32.totalorder %v3155_v44, 1  ;;  %vm3227_vm5 = vcmp.le.s32.totalorder %v3155_v44, 16 }
 0x267   : > { %v2809_v2 = vadd.s32 %v2807_v43, %v2805_v51  ;;  %v2592_v3 = vmul.u32 58254, %v2588_v47  ;;  %v2593_v48 = vmul.u32 14564, %v2589_v59  ;;  %v2356_v29 = vand.u32 65535, %v6466_v18  ;;  %vm3263_vm7 = vmand %vm3191_vm9, %vm3227_vm5 }
 0x268   : > { %v2784_v61 = vmul.u32 18, %v2783_v34  ;;  %vm3192_vm15 = vcmp.ge.s32.totalorder %v3156_v42, 1  ;;  %vm3228_vm1 = vcmp.le.s32.totalorder %v3156_v42, 16  ;;  %v2591_v60 = vmul.u32 14564, %v2588_v47 }
 0x269   : > { %v2357_v41 = vshrl.u32 %v6466_v18, 16  ;;  %v2801_v12 = vshrl.u32 %v6449_v6, 16  ;;  %v2810_v45 = vadd.s32 %v2809_v2, %v2799_v17  ;;  %v2595_v49 = vshll.u32 %v2592_v3, 16  ;;  %vm3264_vm10 = vmand %vm3192_vm15, %vm3228_vm1 }
 0x26a   : > { %v2785_v21 = vsub.s32 %v6412_v63, %v2784_v61  ;;  %v6487_v54 = vmul.f32 %v3925_v22, %v6202_v26  ;;  %v3926_v58 = vsel %vm3262_vm14, 1.0, %v4311_v24  ;;  %v2594_v9 = vmul.u32 58254, %v2589_v59 }
 0x26b   : > { %v2597_v0 = vshll.u32 %v2593_v48, 16  ;;  %v2360_v25 = vmul.u32 58254, %v2356_v29  ;;  %v3927_v5 = vsel %vm3263_vm7, 1.0, %v4311_v24  ;;  %vm2599_vm4 = vc.u32 %v2591_v60, %v2595_v49 }
 0x26c   : > { %vm3019_vm2 = vcmp.ne.s32.totalorder %v2785_v21, 0  ;;  %vm3055_vm0 = vcmp.lt.s32.totalorder %v2785_v21, 0  ;;  %v3127_v27 = vadd.s32 18, %v2785_v21  ;;  %v6491_v63 = vpop.f32.mrf.mxu3  ;;  %v2601_v37 = vadd.s32 %v2595_v49, %v2591_v60 }
 0x26d   : > { %vm3091_vm11 = vmand %vm3055_vm0, %vm3019_vm2  ;;  %v2361_v50 = vmul.u32 14564, %v2357_v41  ;;  %v2811_v13 = vadd.s32 %v2810_v45, %v2801_v12  ;;  %v4054_v62 = vpack.c.bf16 %v6491_v63, %v6472_v40  ;;  %v2600_v23 = vsel %vm2599_vm4, 1, %v4310_v30 }
 0x26e   : > { %v2359_v38 = vmul.u32 14564, %v2356_v29  ;;  %v3928_v16 = vsel %vm3264_vm10, 1.0, %v4311_v24  ;;  %v3163_v33 = vsel %vm3091_vm11, %v3127_v27, %v2785_v21  ;;  %v2596_v39 = vshrl.u32 %v2592_v3, 16 }
 0x26f   : > { %v2602_v57 = vadd.s32 %v2600_v23, %v2594_v9  ;;  %4090 = vst [vmem:[%s5931_s7 + $0x70] sm:$0xff] %v4054_v62   ;;  %vm2603_vm12 = vc.u32 %v2601_v37, %v2597_v0  ;;  %v2362_v6 = vmul.u32 58254, %v2357_v41  ;;  %v2363_v28 = vshll.u32 %v2360_v25, 16 }
 0x270   : > { %v2365_v53 = vshll.u32 %v2361_v50, 16  ;;  %v6499_v11 = vmul.f32 %v3926_v58, %v6246_v4  ;;  %v6502_v52 = vmul.f32 %v3927_v5, %v6340_v8  ;;  %v2598_v32 = vshrl.u32 %v2593_v48, 16 }
 0x271   : > { %v2604_v7 = vsel %vm2603_vm12, 1, %v4310_v30  ;;  %v2812_v10 = vshrl.u32 %v2811_v13, 4  ;;  %vm2367_vm3 = vc.u32 %v2359_v38, %v2363_v28  ;;  %v2369_v46 = vadd.s32 %v2363_v28, %v2359_v38 }
 0x272   : > { %v2606_v56 = vadd.s32 %v2604_v7, %v2602_v57  ;;  %v6506_v44 = vmul.f32 %v3928_v16, %v6369_v35  ;;  %vm3199_vm6 = vcmp.ge.s32.totalorder %v3163_v33, 1  ;;  %vm3235_vm13 = vcmp.le.s32.totalorder %v3163_v33, 16  ;;  %v6508_v19 = vpop.f32.mrf.mxu2 }
 0x273   : > { %v2368_v36 = vsel %vm2367_vm3, 1, %v4310_v30  ;;  %v2364_v51 = vshrl.u32 %v2360_v25, 16  ;;  %vm2371_vm8 = vc.u32 %v2369_v46, %v2365_v53  ;;  %v6513_v59 = vmul.f32 %v6487_v54, %v6202_v26  ;;  %vm3271_vm9 = vmand %vm3199_vm6, %vm3235_vm13 }
 0x274   : > { %v2607_v20 = vadd.s32 %v2606_v56, %v2596_v39  ;;  %v2370_v47 = vadd.s32 %v2368_v36, %v2362_v6  ;;  %v2372_v42 = vsel %vm2371_vm8, 1, %v4310_v30  ;;  %v6517_v34 = vadd.s32 184, %v5646_v31 }
 0x275   : > { %v6520_v17 = vadd.s32 120, %v5646_v31  ;;  %v2813_v43 = vmul.u32 18, %v2812_v10  ;;  %v2366_v2 = vshrl.u32 %v2361_v50, 16  ;;  %v6524_v3 = vmul.f32 %v6499_v11, %v6246_v4 }
 0x276   : > { %v2608_v22 = vadd.s32 %v2607_v20, %v2598_v32  ;;  %v2374_v61 = vadd.s32 %v2372_v42, %v2370_v47  ;;  %v6528_v26 = vmul.f32 %v6502_v52, %v6340_v8  ;;  %v2617_v48 = vand.u32 65535, %v6517_v34 }
 0x277   : > { %v2618_v29 = vshrl.u32 %v6517_v34, 16  ;;  %v6536_v60 = vmul.f32 %v6506_v44, %v6369_v35  ;;  %v2385_v4 = vand.u32 65535, %v6520_v17  ;;  %v2386_v58 = vshrl.u32 %v6520_v17, 16 }
 0x278   : > { %v2609_v41 = vshrl.u32 %v2608_v22, 4  ;;  %v2375_v21 = vadd.s32 %v2374_v61, %v2364_v51  ;;  %v2620_v45 = vmul.u32 14564, %v2617_v48  ;;  %v2621_v8 = vmul.u32 58254, %v2617_v48 }
 0x279   : > { %v6539_v12 = vpop.f32.mrf.mxu1  ;;  %v2622_v49 = vmul.u32 14564, %v2618_v29  ;;  %v6543_v9 = vsel %vm3271_vm9, 1.0, %v4311_v24  ;;  %v6546_v0 = vsub.s32 %v6436_v1, %v2813_v43  ;;  %v2623_v5 = vmul.u32 58254, %v2618_v29 }
 0x27a   : > { %v2610_v27 = vmul.u32 18, %v2609_v41  ;;  %v2376_v35 = vadd.s32 %v2375_v21, %v2366_v2  ;;  %v6548_v25 = vpop.f32.mrf.mxu2  ;;  %v2624_v37 = vshll.u32 %v2621_v8, 16  ;;  %v2388_v13 = vmul.u32 14564, %v2385_v4 }
 0x27b   : > { %v2626_v50 = vshll.u32 %v2622_v49, 16  ;;  %v2625_v38 = vshrl.u32 %v2621_v8, 16  ;;  %v4039_v16 = vpack.c.bf16 %v6548_v25, %v6508_v19  ;;  %v2389_v1 = vmul.u32 58254, %v2385_v4 }
 0x27c   : > { %v2611_v62 = vsub.s32 %v6463_v55, %v2610_v27  ;;  %v2377_v23 = vshrl.u32 %v2376_v35, 4  ;;  %vm2628_vm5 = vc.u32 %v2620_v45, %v2624_v37  ;;  %v2630_v33 = vadd.s32 %v2624_v37, %v2620_v45 }
 0x27d   : > { %v2390_v39 = vmul.u32 14564, %v2386_v58  ;;  %4087 = vst [vmem:[%s5931_s7 + $0x58] sm:$0xff] %v4039_v16   ;;  %v2627_v28 = vshrl.u32 %v2622_v49, 16  ;;  %v2629_v53 = vsel %vm2628_vm5, 1, %v4310_v30  ;;  %v2392_v55 = vshll.u32 %v2389_v1, 16 }
 0x27e   : > { %vm3013_vm14 = vcmp.ne.s32.totalorder %v2611_v62, 0  ;;  %vm3049_vm15 = vcmp.lt.s32.totalorder %v2611_v62, 0  ;;  %v3121_v57 = vadd.s32 18, %v2611_v62  ;;  %v2378_v6 = vmul.u32 18, %v2377_v23 }
 0x27f   : > { %vm3085_vm1 = vmand %vm3049_vm15, %vm3013_vm14  ;;  %vm2632_vm7 = vc.u32 %v2630_v33, %v2626_v50  ;;  %v2631_v10 = vadd.s32 %v2629_v53, %v2623_v5  ;;  %v2391_v36 = vmul.u32 58254, %v2386_v58  ;;  %v2394_v20 = vshll.u32 %v2390_v39, 16 }
 0x280   : > { %v3157_v32 = vsel %vm3085_vm1, %v3121_v57, %v2611_v62  ;;  %v2379_v7 = vsub.s32 %v6466_v18, %v2378_v6  ;;  %v2633_v56 = vsel %vm2632_vm7, 1, %v4310_v30  ;;  %v2393_v42 = vshrl.u32 %v2389_v1, 16 }
 0x281   : > { %vm3193_vm10 = vcmp.ge.s32.totalorder %v3157_v32, 1  ;;  %vm3229_vm2 = vcmp.le.s32.totalorder %v3157_v32, 16  ;;  %v6557_v46 = vpop.f32.mrf.mxu1  ;;  %v2635_v47 = vadd.s32 %v2633_v56, %v2631_v10  ;;  %vm2396_vm3 = vc.u32 %v2388_v13, %v2392_v55 }
 0x282   : > { %vm3265_vm0 = vmand %vm3193_vm10, %vm3229_vm2  ;;  %vm3005_vm11 = vcmp.ne.s32.totalorder %v2379_v7, 0  ;;  %vm3041_vm4 = vcmp.lt.s32.totalorder %v2379_v7, 0  ;;  %v3113_v51 = vadd.s32 18, %v2379_v7  ;;  %v2398_v43 = vadd.s32 %v2392_v55, %v2388_v13 }
 0x283   : > { %vm3077_vm12 = vmand %vm3041_vm4, %vm3005_vm11  ;;  %v6560_v18 = vadd.s32 128, %v5646_v31  ;;  %v3929_v22 = vsel %vm3265_vm0, 1.0, %v4311_v24  ;;  %v2636_v61 = vadd.s32 %v2635_v47, %v2625_v38  ;;  %v2397_v48 = vsel %vm2396_vm3, 1, %v4310_v30 }
 0x284   : > { %v3149_v2 = vsel %vm3077_vm12, %v3113_v51, %v2379_v7  ;;  %v2399_v29 = vadd.s32 %v2397_v48, %v2391_v36  ;;  %vm2400_vm8 = vc.u32 %v2398_v43, %v2394_v20  ;;  %v2395_v21 = vshrl.u32 %v2390_v39, 16 }
 0x285   : > { %vm3185_vm6 = vcmp.ge.s32.totalorder %v3149_v2, 1  ;;  %vm3221_vm13 = vcmp.le.s32.totalorder %v3149_v2, 16  ;;  %v2637_v41 = vadd.s32 %v2636_v61, %v2627_v28  ;;  %v2401_v4 = vsel %vm2400_vm8, 1, %v4310_v30 }
 0x286   : > { %vm3257_vm9 = vmand %vm3185_vm6, %vm3221_vm13  ;;  %v4019_v45 = vpack.c.bf16 %v6557_v46, %v6539_v12  ;;  %v2403_v49 = vadd.s32 %v2401_v4, %v2399_v29  ;;  %v2414_v58 = vand.u32 65535, %v6560_v18  ;;  %v2415_v27 = vshrl.u32 %v6560_v18, 16 }
 0x287   : > { %v3921_v8 = vsel %vm3257_vm9, 1.0, %v4311_v24  ;;  %v6572_v35 = vmul.f32 %v6543_v9, %v6472_v40  ;;  %v2638_v37 = vshrl.u32 %v2637_v41, 4  ;;  %v6577_v50 = vadd.s32 136, %v5646_v31 }
 0x288   : > { %v3437_v5 = vmul.f32 %v3921_v8, %v6539_v12  ;;  %4083 = vst [vmem:[%s5931_s7 + $0x38] sm:$0xff] %v4019_v45   ;;  %v2404_v13 = vadd.s32 %v2403_v49, %v2393_v42  ;;  %v2417_v23 = vmul.u32 14564, %v2414_v58  ;;  %v2418_v38 = vmul.u32 58254, %v2414_v58 }
 0x289   : > { %v6579_v62 = vpop.f32.mrf.mxu1  ;;  %v2419_v16 = vmul.u32 14564, %v2415_v27  ;;  %v6582_v33 = vmul.f32 %v3929_v22, %v6508_v19  ;;  %v2639_v39 = vmul.u32 18, %v2638_v37  ;;  %v2420_v6 = vmul.u32 58254, %v2415_v27 }
 0x28a   : > { %v6585_v1 = vadd.f32 %v6445_v14, %v3437_v5  ;;  %v3515_v9 = vmul.f32 %v3437_v5, %v6539_v12  ;;  %v2405_v57 = vadd.s32 %v2404_v13, %v2395_v21  ;;  %v2421_v28 = vshll.u32 %v2418_v38, 16 }
 0x28b   : > { %v2423_v53 = vshll.u32 %v2419_v16, 16  ;;  %v2640_v32 = vsub.s32 %v6517_v34, %v2639_v39  ;;  %v2422_v7 = vshrl.u32 %v2418_v38, 16  ;;  %v2443_v10 = vand.u32 65535, %v6577_v50 }
 0x28c   : > { %v6589_v55 = vadd.f32 %v6456_v15, %v3515_v9  ;;  %v2406_v56 = vshrl.u32 %v2405_v57, 4  ;;  %vm2425_vm5 = vc.u32 %v2417_v23, %v2421_v28  ;;  %v2427_v36 = vadd.s32 %v2421_v28, %v2417_v23 }
 0x28d   : > { %v2444_v14 = vshrl.u32 %v6577_v50, 16  ;;  %vm3014_vm14 = vcmp.ne.s32.totalorder %v2640_v32, 0  ;;  %vm3050_vm15 = vcmp.lt.s32.totalorder %v2640_v32, 0  ;;  %v3122_v12 = vadd.s32 18, %v2640_v32 }
 0x28e   : > { %v2426_v20 = vsel %vm2425_vm5, 1, %v4310_v30  ;;  %vm3086_vm1 = vmand %vm3050_vm15, %vm3014_vm14  ;;  %v2407_v51 = vmul.u32 18, %v2406_v56  ;;  %vm2429_vm7 = vc.u32 %v2427_v36, %v2423_v53  ;;  %v2446_v15 = vmul.u32 14564, %v2443_v10 }
 0x28f   : > { %v2428_v47 = vadd.s32 %v2426_v20, %v2420_v6  ;;  %v3158_v42 = vsel %vm3086_vm1, %v3122_v12, %v2640_v32  ;;  %v2430_v34 = vsel %vm2429_vm7, 1, %v4310_v30  ;;  %v2447_v43 = vmul.u32 58254, %v2443_v10 }
 0x290   : > { %v2448_v22 = vmul.u32 14564, %v2444_v14  ;;  %vm3194_vm10 = vcmp.ge.s32.totalorder %v3158_v42, 1  ;;  %vm3230_vm2 = vcmp.le.s32.totalorder %v3158_v42, 16  ;;  %v2408_v2 = vsub.s32 %v6520_v17, %v2407_v51 }
 0x291   : > { %v2432_v61 = vadd.s32 %v2430_v34, %v2428_v47  ;;  %vm3266_vm0 = vmand %vm3194_vm10, %vm3230_vm2  ;;  %v2424_v48 = vshrl.u32 %v2419_v16, 16  ;;  %v6597_v29 = vpop.f32.mrf.mxu1  ;;  %v2449_v41 = vmul.u32 58254, %v2444_v14  ;;  %v2450_v21 = vshll.u32 %v2447_v43, 16 }
 0x292   : > { %v6600_v4 = vadd.s32 192, %v5646_v31  ;;  %vm3006_vm11 = vcmp.ne.s32.totalorder %v2408_v2, 0  ;;  %vm3042_vm4 = vcmp.lt.s32.totalorder %v2408_v2, 0  ;;  %v3114_v45 = vadd.s32 18, %v2408_v2 }
 0x293   : > { %v2452_v8 = vshll.u32 %v2448_v22, 16  ;;  %v3930_v49 = vsel %vm3266_vm0, 1.0, %v4311_v24  ;;  %vm3078_vm12 = vmand %vm3042_vm4, %vm3006_vm11  ;;  %v2433_v58 = vadd.s32 %v2432_v61, %v2422_v7  ;;  %v2451_v17 = vshrl.u32 %v2447_v43, 16 }
 0x294   : > { %vm2454_vm3 = vc.u32 %v2446_v15, %v2450_v21  ;;  %v3150_v27 = vsel %vm3078_vm12, %v3114_v45, %v2408_v2  ;;  %v2456_v37 = vadd.s32 %v2450_v21, %v2446_v15  ;;  %v4024_v13 = vpack.c.bf16 %v6597_v29, %v6579_v62 }
 0x295   : > { %v2455_v5 = vsel %vm2454_vm3, 1, %v4310_v30  ;;  %vm3186_vm6 = vcmp.ge.s32.totalorder %v3150_v27, 1  ;;  %vm3222_vm13 = vcmp.le.s32.totalorder %v3150_v27, 16  ;;  %v2434_v23 = vadd.s32 %v2433_v58, %v2424_v48 }
 0x296   : > { %v2453_v38 = vshrl.u32 %v2448_v22, 16  ;;  %vm3258_vm8 = vmand %vm3186_vm6, %vm3222_vm13  ;;  %v2457_v16 = vadd.s32 %v2455_v5, %v2449_v41  ;;  %vm2458_vm9 = vc.u32 %v2456_v37, %v2452_v8  ;;  %4084 = vst [vmem:[%s5931_s7 + $0x40] sm:$0xff] %v4024_v13   ;;  %v2646_v9 = vand.u32 65535, %v6600_v4 }
 0x297   : > { %v2647_v39 = vshrl.u32 %v6600_v4, 16  ;;  %v3922_v57 = vsel %vm3258_vm8, 1.0, %v4311_v24  ;;  %v2435_v6 = vshrl.u32 %v2434_v23, 4  ;;  %v2459_v28 = vsel %vm2458_vm9, 1, %v4310_v30 }
 0x298   : > { %v6612_v53 = vadd.s32 240, %v5646_v31  ;;  %v3438_v32 = vmul.f32 %v3922_v57, %v6557_v46  ;;  %v2461_v7 = vadd.s32 %v2459_v28, %v2457_v16  ;;  %v2649_v10 = vmul.u32 14564, %v2646_v9 }
 0x299   : > { %v2650_v56 = vmul.u32 58254, %v2646_v9  ;;  %v2436_v36 = vmul.u32 18, %v2435_v6  ;;  %v2651_v14 = vmul.u32 14564, %v2647_v39  ;;  %v2652_v12 = vmul.u32 58254, %v2647_v39 }
 0x29a   : > { %v2820_v20 = vand.u32 65535, %v6612_v53  ;;  %v3473_v51 = vadd.f32 %v6585_v1, %v3438_v32  ;;  %v3516_v47 = vmul.f32 %v3438_v32, %v6557_v46  ;;  %v2462_v15 = vadd.s32 %v2461_v7, %v2451_v17 }
 0x29b   : > { %v2653_v42 = vshll.u32 %v2650_v56, 16  ;;  %v2437_v34 = vsub.s32 %v6560_v18, %v2436_v36  ;;  %v2654_v43 = vshrl.u32 %v2650_v56, 16  ;;  %v2655_v22 = vshll.u32 %v2651_v14, 16 }
 0x29c   : > { %v2656_v2 = vshrl.u32 %v2651_v14, 16  ;;  %v3551_v61 = vadd.f32 %v6589_v55, %v3516_v47  ;;  %v2463_v48 = vadd.s32 %v2462_v15, %v2453_v38  ;;  %v2821_v18 = vshrl.u32 %v6612_v53, 16 }
 0x29d   : > { %vm2657_vm5 = vc.u32 %v2649_v10, %v2653_v42  ;;  %v2659_v41 = vadd.s32 %v2653_v42, %v2649_v10  ;;  %vm3007_vm14 = vcmp.ne.s32.totalorder %v2437_v34, 0  ;;  %vm3043_vm15 = vcmp.lt.s32.totalorder %v2437_v34, 0 }
 0x29e   : > { %v3115_v21 = vadd.s32 18, %v2437_v34  ;;  %v6620_v45 = vpop.f32.mrf.mxu2  ;;  %v2658_v1 = vsel %vm2657_vm5, 1, %v4310_v30  ;;  %vm3079_vm1 = vmand %vm3043_vm15, %vm3007_vm14  ;;  %v2464_v46 = vshrl.u32 %v2463_v48, 4  ;;  %v2823_v55 = vmul.u32 14564, %v2820_v20 }
 0x29f   : > { %v2660_v8 = vadd.s32 %v2658_v1, %v2652_v12  ;;  %vm2661_vm7 = vc.u32 %v2659_v41, %v2655_v22  ;;  %v2824_v27 = vmul.u32 58254, %v2820_v20  ;;  %v6626_v13 = vmul.f32 %v3930_v49, %v6548_v25 }
 0x2a0   : > { %v3151_v58 = vsel %vm3079_vm1, %v3115_v21, %v2437_v34  ;;  %v2662_v17 = vsel %vm2661_vm7, 1, %v4310_v30  ;;  %v2465_v5 = vmul.u32 18, %v2464_v46  ;;  %v2825_v23 = vmul.u32 14564, %v2821_v18 }
 0x2a1   : > { %vm3187_vm10 = vcmp.ge.s32.totalorder %v3151_v58, 1  ;;  %vm3223_vm2 = vcmp.le.s32.totalorder %v3151_v58, 16  ;;  %v2664_v37 = vadd.s32 %v2662_v17, %v2660_v8  ;;  %v2826_v38 = vmul.u32 58254, %v2821_v18 }
 0x2a2   : > { %vm3259_vm0 = vmand %vm3187_vm10, %vm3223_vm2  ;;  %v2827_v16 = vshll.u32 %v2824_v27, 16  ;;  %v2466_v39 = vsub.s32 %v6577_v50, %v2465_v5  ;;  %v6631_v6 = vadd.s32 200, %v5646_v31  ;;  %v2828_v32 = vshrl.u32 %v2824_v27, 16 }
 0x2a3   : > { %v3923_v9 = vsel %vm3259_vm0, 1.0, %v4311_v24  ;;  %v2665_v57 = vadd.s32 %v2664_v37, %v2654_v43  ;;  %v2829_v7 = vshll.u32 %v2825_v23, 16  ;;  %v2830_v43 = vshrl.u32 %v2825_v23, 16 }
 0x2a4   : > { %v3439_v28 = vmul.f32 %v3923_v9, %v6579_v62  ;;  %vm2831_vm11 = vc.u32 %v2823_v55, %v2827_v16  ;;  %vm3008_vm4 = vcmp.ne.s32.totalorder %v2466_v39, 0  ;;  %vm3044_vm12 = vcmp.lt.s32.totalorder %v2466_v39, 0 }
 0x2a5   : > { %v3116_v49 = vadd.s32 18, %v2466_v39  ;;  %v2666_v10 = vadd.s32 %v2665_v57, %v2656_v2  ;;  %vm3080_vm3 = vmand %vm3044_vm12, %vm3008_vm4  ;;  %v2832_v14 = vsel %vm2831_vm11, 1, %v4310_v30  ;;  %v2833_v50 = vadd.s32 %v2827_v16, %v2823_v55 }
 0x2a6   : > { %v3474_v56 = vadd.f32 %v3473_v51, %v3439_v28  ;;  %v3517_v36 = vmul.f32 %v3439_v28, %v6579_v62  ;;  %v2834_v47 = vadd.s32 %v2832_v14, %v2826_v38  ;;  %v6636_v15 = vpop.f32.mrf.mxu2  ;;  %v2675_v42 = vand.u32 65535, %v6631_v6  ;;  %v6655_v28 = vpop.f32.mrf.mxu3 }
 0x2a7   : > { %v3152_v12 = vsel %vm3080_vm3, %v3116_v49, %v2466_v39  ;;  %v2667_v20 = vshrl.u32 %v2666_v10, 4  ;;  %vm2835_vm8 = vc.u32 %v2833_v50, %v2829_v7  ;;  %v2676_v22 = vshrl.u32 %v6631_v6, 16 }
 0x2a8   : > { %v3552_v34 = vadd.f32 %v3551_v61, %v3517_v36  ;;  %vm3188_vm6 = vcmp.ge.s32.totalorder %v3152_v12, 1  ;;  %vm3224_vm13 = vcmp.le.s32.totalorder %v3152_v12, 16  ;;  %v2836_v62 = vsel %vm2835_vm8, 1, %v4310_v30 }
 0x2a9   : > { %vm3260_vm9 = vmand %vm3188_vm6, %vm3224_vm13  ;;  %v2668_v51 = vmul.u32 18, %v2667_v20  ;;  %v2838_v48 = vadd.s32 %v2836_v62, %v2834_v47  ;;  %v2679_v41 = vmul.u32 58254, %v2675_v42  ;;  %v4044_v21 = vpack.c.bf16 %v6636_v15, %v6620_v45 }
 0x2aa   : > { %v3924_v2 = vsel %vm3260_vm9, 1.0, %v4311_v24  ;;  %v2678_v46 = vmul.u32 14564, %v2675_v42  ;;  %v6646_v8 = vmul.u32 14564, %v2676_v22  ;;  %v2681_v58 = vmul.u32 58254, %v2676_v22 }
 0x2ab   : > { %v3440_v61 = vmul.f32 %v3924_v2, %v6597_v29  ;;  %v2669_v1 = vsub.s32 %v6600_v4, %v2668_v51  ;;  %v2839_v18 = vadd.s32 %v2838_v48, %v2828_v32  ;;  %v2682_v17 = vshll.u32 %v2679_v41, 16  ;;  %4088 = vst [vmem:[%s5931_s7 + $0x60] sm:$0xff] %v4044_v21  }
 0x2ac   : > { %v6650_v55 = vadd.s32 248, %v5646_v31  ;;  %v2683_v38 = vshrl.u32 %v2679_v41, 16  ;;  %v2684_v4 = vshll.u32 %v6646_v8, 16  ;;  %vm3020_vm11 = vcmp.ne.s32.totalorder %v6546_v0, 0 }
 0x2ad   : > { %v3475_v27 = vadd.f32 %v3474_v56, %v3440_v61  ;;  %v3518_v5 = vmul.f32 %v3440_v61, %v6597_v29  ;;  %vm3015_vm5 = vcmp.ne.s32.totalorder %v2669_v1, 0  ;;  %vm3051_vm14 = vcmp.lt.s32.totalorder %v2669_v1, 0 }
 0x2ae   : > { %vm3087_vm15 = vmand %vm3051_vm14, %vm3015_vm5  ;;  %v3123_v37 = vadd.s32 18, %v2669_v1  ;;  %v2840_v23 = vadd.s32 %v2839_v18, %v2830_v43  ;;  %vm2686_vm1 = vc.u32 %v2678_v46, %v2682_v17  ;;  %v2688_v39 = vadd.s32 %v2682_v17, %v2678_v46 }
 0x2af   : > { %v3476_v16 = vadd.f32 %v3475_v27, %v6487_v54  ;;  %v3553_v9 = vadd.f32 %v3552_v34, %v3518_v5  ;;  %v2687_v7 = vsel %vm2686_vm1, 1, %v4310_v30  ;;  %v2849_v29 = vand.u32 65535, %v6650_v55 }
 0x2b0   : > { %v3159_v57 = vsel %vm3087_vm15, %v3123_v37, %v2669_v1  ;;  %v2841_v32 = vshrl.u32 %v2840_v23, 4  ;;  %v2689_v54 = vadd.s32 %v2687_v7, %v2681_v58  ;;  %vm2690_vm0 = vc.u32 %v2688_v39, %v2684_v4 }
 0x2b1   : > { %v3477_v49 = vadd.f32 %v3476_v16, %v6499_v11  ;;  %v3554_v10 = vadd.f32 %v3553_v9, %v6513_v59  ;;  %vm3195_vm7 = vcmp.ge.s32.totalorder %v3159_v57, 1  ;;  %vm3231_vm10 = vcmp.le.s32.totalorder %v3159_v57, 16 }
 0x2b2   : > { %vm3267_vm2 = vmand %vm3195_vm7, %vm3231_vm10  ;;  %v2842_v56 = vmul.u32 18, %v2841_v32  ;;  %v2850_v36 = vshrl.u32 %v6650_v55, 16  ;;  %v2691_v20 = vsel %vm2690_vm0, 1, %v4310_v30  ;;  %v2853_v51 = vmul.u32 58254, %v2849_v29 }
 0x2b3   : > { %v3478_v14 = vadd.f32 %v3477_v49, %v6502_v52  ;;  %v3555_v50 = vadd.f32 %v3554_v10, %v6524_v3  ;;  %v3931_v12 = vsel %vm3267_vm2, 1.0, %v4311_v24  ;;  %v2693_v47 = vadd.s32 %v2691_v20, %v2689_v54 }
 0x2b4   : > { %v3447_v11 = vmul.f32 %v3931_v12, %v6620_v45  ;;  %v2843_v59 = vsub.s32 %v6612_v53, %v2842_v56  ;;  %v2854_v43 = vmul.u32 14564, %v2850_v36  ;;  %vm3056_vm4 = vcmp.lt.s32.totalorder %v6546_v0, 0  ;;  %v6717_v56 = vpop.f32.mrf.mxu2 }
 0x2b5   : > { %v3556_v42 = vadd.f32 %v3555_v50, %v6528_v26  ;;  %v3479_v34 = vadd.f32 %v3478_v14, %v6506_v44  ;;  %v3523_v52 = vmul.f32 %v6582_v33, %v6508_v19  ;;  %v2685_v3 = vshrl.u32 %v6646_v8, 16  ;;  %v6682_v8 = vpop.f32.mrf.mxu3  ;;  %vm6688_vm13 = vmand %vm3056_vm4, %vm3020_vm11 }
 0x2b6   : > { %v2852_v62 = vmul.u32 14564, %v2849_v29  ;;  %v3524_v22 = vmul.f32 %v6626_v13, %v6548_v25  ;;  %v2694_v26 = vadd.s32 %v2693_v47, %v2683_v38  ;;  %v3525_v44 = vmul.f32 %v3447_v11, %v6620_v45 }
 0x2b7   : > { %v3480_v53 = vadd.f32 %v3479_v34, %v6582_v33  ;;  %v3557_v2 = vadd.f32 %v3556_v42, %v6536_v60  ;;  %v2855_v48 = vmul.u32 58254, %v2850_v36  ;;  %v2856_v41 = vshll.u32 %v2853_v51, 16 }
 0x2b8   : > { %v2858_v21 = vshll.u32 %v2854_v43, 16  ;;  %vm3021_vm12 = vcmp.ne.s32.totalorder %v2843_v59, 0  ;;  %vm3057_vm3 = vcmp.lt.s32.totalorder %v2843_v59, 0  ;;  %v3128_v19 = vadd.s32 18, %v6546_v0 }
 0x2b9   : > { %v3481_v61 = vadd.f32 %v3480_v53, %v6626_v13  ;;  %v3558_v1 = vadd.f32 %v3557_v2, %v3523_v52  ;;  %v2695_v46 = vadd.s32 %v2694_v26, %v2685_v3  ;;  %vm2860_vm6 = vc.u32 %v2852_v62, %v2856_v41  ;;  %vm3093_vm8 = vmand %vm3057_vm3, %vm3021_vm12 }
 0x2ba   : > { %v2862_v25 = vadd.s32 %v2856_v41, %v2852_v62  ;;  %v3129_v13 = vadd.s32 18, %v2843_v59  ;;  %v2861_v18 = vsel %vm2860_vm6, 1, %v4310_v30  ;;  %v2857_v17 = vshrl.u32 %v2853_v51, 16 }
 0x2bb   : > { %v6692_v33 = vadd.f32 %v3481_v61, %v3447_v11  ;;  %v3559_v45 = vadd.f32 %v3558_v1, %v3524_v22  ;;  %v2696_v58 = vshrl.u32 %v2695_v46, 4  ;;  %v2863_v27 = vadd.s32 %v2861_v18, %v2855_v48 }
 0x2bc   : > { %vm2864_vm9 = vc.u32 %v2862_v25, %v2858_v21  ;;  %v4059_v23 = vpack.c.bf16 %v6682_v8, %v6655_v28  ;;  %v6701_v38 = vadd.s32 208, %v5646_v31  ;;  %v2859_v16 = vshrl.u32 %v2854_v43, 16  ;;  %v6740_v18 = vpop.f32.mrf.mxu2 }
 0x2bd   : > { %v6695_v5 = vadd.f32 %v3559_v45, %v3525_v44  ;;  %v2865_v37 = vsel %vm2864_vm9, 1, %v4310_v30  ;;  %v2697_v4 = vmul.u32 18, %v2696_v58  ;;  %v6704_v39 = vadd.s32 256, %v5646_v31  ;;  %v6734_v1 = vpop.f32.mrf.mxu3 }
 0x2be   : > { %v2867_v9 = vadd.s32 %v2865_v37, %v2863_v27  ;;  %v6709_v57 = vsel %vm6688_vm13, %v3128_v19, %v6546_v0  ;;  %v6711_v32 = vsel %vm3093_vm8, %v3129_v13, %v2843_v59  ;;  %4091 = vst [vmem:[%s5931_s7 + $0x78] sm:$0xff] %v4059_v23   ;;  %v2704_v7 = vand.u32 65535, %v6701_v38 }
 0x2bf   : > { %v2705_v29 = vshrl.u32 %v6701_v38, 16  ;;  %v2698_v49 = vsub.s32 %v6631_v6, %v2697_v4  ;;  %v2878_v54 = vand.u32 65535, %v6704_v39  ;;  %v6721_v36 = vadd.s32 216, %v5646_v31 }
 0x2c0   : > { %v2868_v10 = vadd.s32 %v2867_v9, %v2857_v17  ;;  %v2707_v14 = vmul.u32 14564, %v2704_v7  ;;  %v2708_v0 = vmul.u32 58254, %v2704_v7  ;;  %v2879_v12 = vshrl.u32 %v6704_v39, 16 }
 0x2c1   : > { %v2709_v50 = vmul.u32 14564, %v2705_v29  ;;  %vm3200_vm5 = vcmp.ge.s32.totalorder %v6709_v57, 1  ;;  %vm3236_vm14 = vcmp.le.s32.totalorder %v6709_v57, 16  ;;  %vm3016_vm15 = vcmp.ne.s32.totalorder %v2698_v49, 0 }
 0x2c2   : > { %vm3052_vm1 = vcmp.lt.s32.totalorder %v2698_v49, 0  ;;  %v3124_v6 = vadd.s32 18, %v2698_v49  ;;  %v2869_v20 = vadd.s32 %v2868_v10, %v2859_v16  ;;  %v2710_v11 = vmul.u32 58254, %v2705_v29  ;;  %vm3272_vm8 = vmand %vm3200_vm5, %vm3236_vm14 }
 0x2c3   : > { %vm3088_vm7 = vmand %vm3052_vm1, %vm3016_vm15  ;;  %v2711_v59 = vshll.u32 %v2708_v0, 16  ;;  %v2713_v47 = vshll.u32 %v2709_v50, 16  ;;  %v6727_v42 = vadd.s32 264, %v5646_v31  ;;  %v2881_v43 = vmul.u32 14564, %v2878_v54 }
 0x2c4   : > { %v3160_v34 = vsel %vm3088_vm7, %v3124_v6, %v2698_v49  ;;  %v2870_v51 = vshrl.u32 %v2869_v20, 4  ;;  %v2882_v52 = vmul.u32 58254, %v2878_v54  ;;  %v2712_v22 = vshrl.u32 %v2708_v0, 16 }
 0x2c5   : > { %vm3196_vm10 = vcmp.ge.s32.totalorder %v3160_v34, 1  ;;  %vm3232_vm2 = vcmp.le.s32.totalorder %v3160_v34, 16  ;;  %vm2715_vm0 = vc.u32 %v2707_v14, %v2711_v59  ;;  %v2717_v3 = vadd.s32 %v2711_v59, %v2707_v14 }
 0x2c6   : > { %vm3268_vm11 = vmand %vm3196_vm10, %vm3232_vm2  ;;  %v2871_v62 = vmul.u32 18, %v2870_v51  ;;  %v2716_v53 = vsel %vm2715_vm0, 1, %v4310_v30  ;;  %v2883_v2 = vmul.u32 14564, %v2879_v12  ;;  %v2885_v48 = vshll.u32 %v2882_v52, 16  ;;  %v6764_v51 = vpop.f32.mrf.mxu3 }
 0x2c7   : > { %v3932_v26 = vsel %vm3268_vm11, 1.0, %v4311_v24  ;;  %v2718_v44 = vadd.s32 %v2716_v53, %v2710_v11  ;;  %vm2719_vm4 = vc.u32 %v2717_v3, %v2713_v47  ;;  %v2884_v19 = vmul.u32 58254, %v2879_v12 }
 0x2c8   : > { %v3448_v41 = vmul.f32 %v3932_v26, %v6636_v15  ;;  %v2872_v21 = vsub.s32 %v6650_v55, %v2871_v62  ;;  %v2720_v61 = vsel %vm2719_vm4, 1, %v4310_v30  ;;  %v2714_v46 = vshrl.u32 %v2709_v50, 16 }
 0x2c9   : > { %v2722_v25 = vadd.s32 %v2720_v61, %v2718_v44  ;;  %v2887_v60 = vshll.u32 %v2883_v2, 16  ;;  %vm2889_vm12 = vc.u32 %v2881_v43, %v2885_v48  ;;  %v2891_v27 = vadd.s32 %v2885_v48, %v2881_v43 }
 0x2ca   : > { %v6737_v45 = vadd.f32 %v6692_v33, %v3448_v41  ;;  %v3526_v13 = vmul.f32 %v3448_v41, %v6636_v15  ;;  %vm3022_vm3 = vcmp.ne.s32.totalorder %v2872_v21, 0  ;;  %vm3058_vm6 = vcmp.lt.s32.totalorder %v2872_v21, 0 }
 0x2cb   : > { %vm3094_vm13 = vmand %vm3058_vm6, %vm3022_vm3  ;;  %v3130_v55 = vadd.s32 18, %v2872_v21  ;;  %v2723_v58 = vadd.s32 %v2722_v25, %v2712_v22  ;;  %v2890_v17 = vsel %vm2889_vm12, 1, %v4310_v30  ;;  %v2733_v33 = vand.u32 65535, %v6721_v36 }
 0x2cc   : > { %v6744_v37 = vadd.f32 %v6695_v5, %v3526_v13  ;;  %v2892_v23 = vadd.s32 %v2890_v17, %v2884_v19  ;;  %v2734_v4 = vshrl.u32 %v6721_v36, 16  ;;  %v2886_v16 = vshrl.u32 %v2882_v52, 16 }
 0x2cd   : > { %v2724_v15 = vadd.s32 %v2723_v58, %v2714_v46  ;;  %vm2893_vm9 = vc.u32 %v2891_v27, %v2887_v60  ;;  %v4049_v9 = vpack.c.bf16 %v6740_v18, %v6717_v56  ;;  %v6754_v7 = vsel %vm3094_vm13, %v3130_v55, %v2872_v21 }
 0x2ce   : > { %v2888_v5 = vshrl.u32 %v2883_v2, 16  ;;  %v2894_v29 = vsel %vm2893_vm9, 1, %v4310_v30  ;;  %v2736_v49 = vmul.u32 14564, %v2733_v33  ;;  %v2737_v14 = vmul.u32 58254, %v2733_v33 }
 0x2cf   : > { %v2725_v10 = vshrl.u32 %v2724_v15, 4  ;;  %v2896_v54 = vadd.s32 %v2894_v29, %v2892_v23  ;;  %v2738_v0 = vmul.u32 14564, %v2734_v4  ;;  %4089 = vst [vmem:[%s5931_s7 + $0x68] sm:$0xff] %v4049_v9   ;;  %v3936_v57 = vsel %vm3272_vm8, 1.0, %v4311_v24 }
 0x2d0   : > { %vm3201_vm5 = vcmp.ge.s32.totalorder %v6711_v32, 1  ;;  %v2907_v50 = vand.u32 65535, %v6727_v42  ;;  %v2908_v12 = vshrl.u32 %v6727_v42, 16  ;;  %vm3237_vm14 = vcmp.le.s32.totalorder %v6711_v32, 16 }
 0x2d1   : > { %v2726_v6 = vmul.u32 18, %v2725_v10  ;;  %v2897_v20 = vadd.s32 %v2896_v54, %v2886_v16  ;;  %v2740_v11 = vshll.u32 %v2737_v14, 16  ;;  %vm3202_vm15 = vcmp.ge.s32.totalorder %v6754_v7, 1  ;;  %vm6778_vm13 = vmand %vm3201_vm5, %vm3237_vm14  ;;  %v6790_v16 = vpop.f32.mrf.mxu3 }
 0x2d2   : > { %v2739_v59 = vmul.u32 58254, %v2734_v4  ;;  %v2741_v47 = vshrl.u32 %v2737_v14, 16  ;;  %v2742_v34 = vshll.u32 %v2738_v0, 16  ;;  %v2910_v3 = vmul.u32 14564, %v2907_v50 }
 0x2d3   : > { %v2727_v43 = vsub.s32 %v6701_v38, %v2726_v6  ;;  %v2898_v52 = vadd.s32 %v2897_v20, %v2888_v5  ;;  %vm2744_vm1 = vc.u32 %v2736_v49, %v2740_v11  ;;  %v2746_v22 = vadd.s32 %v2740_v11, %v2736_v49 }
 0x2d4   : > { %v2745_v62 = vsel %vm2744_vm1, 1, %v4310_v30  ;;  %v2911_v53 = vmul.u32 58254, %v2907_v50  ;;  %v6768_v2 = vmul.u32 14564, %v2908_v12  ;;  %v2743_v48 = vshrl.u32 %v2738_v0, 16 }
 0x2d5   : > { %vm3017_vm7 = vcmp.ne.s32.totalorder %v2727_v43, 0  ;;  %vm3053_vm10 = vcmp.lt.s32.totalorder %v2727_v43, 0  ;;  %v3125_v26 = vadd.s32 18, %v2727_v43  ;;  %v2899_v44 = vshrl.u32 %v2898_v52, 4 }
 0x2d6   : > { %vm3089_vm2 = vmand %vm3053_vm10, %vm3017_vm7  ;;  %v2747_v41 = vadd.s32 %v2745_v62, %v2739_v59  ;;  %vm2748_vm0 = vc.u32 %v2746_v22, %v2742_v34  ;;  %v2914_v21 = vshll.u32 %v2911_v53, 16  ;;  %v2913_v46 = vmul.u32 58254, %v2908_v12 }
 0x2d7   : > { %v3161_v61 = vsel %vm3089_vm2, %v3125_v26, %v2727_v43  ;;  %v2900_v38 = vmul.u32 18, %v2899_v44  ;;  %v2749_v19 = vsel %vm2748_vm0, 1, %v4310_v30  ;;  %v2916_v60 = vshll.u32 %v6768_v2, 16 }
 0x2d8   : > { %vm3197_vm11 = vcmp.ge.s32.totalorder %v3161_v61, 1  ;;  %vm3233_vm4 = vcmp.le.s32.totalorder %v3161_v61, 16  ;;  %v2751_v25 = vadd.s32 %v2749_v19, %v2747_v41  ;;  %vm3238_vm12 = vcmp.le.s32.totalorder %v6754_v7, 16 }
 0x2d9   : > { %vm3269_vm3 = vmand %vm3197_vm11, %vm3233_vm4  ;;  %v2901_v13 = vsub.s32 %v6704_v39, %v2900_v38  ;;  %vm2918_vm6 = vc.u32 %v2910_v3, %v2914_v21  ;;  %v2920_v55 = vadd.s32 %v2914_v21, %v2910_v3  ;;  %v4064_v33 = vpack.c.bf16 %v6764_v51, %v6734_v1  ;;  %v6845_v19 = vpop.f32.mrf.mxu3 }
 0x2da   : > { %v3933_v17 = vsel %vm3269_vm3, 1.0, %v4311_v24  ;;  %v2752_v27 = vadd.s32 %v2751_v25, %v2741_v47  ;;  %v2919_v23 = vsel %vm2918_vm6, 1, %v4310_v30  ;;  %v6787_v39 = vmul.f32 %v3936_v57, %v6491_v63  ;;  %vm3274_vm14 = vmand %vm3202_vm15, %vm3238_vm12 }
 0x2db   : > { %vm3023_vm8 = vcmp.ne.s32.totalorder %v2901_v13, 0  ;;  %vm3059_vm9 = vcmp.lt.s32.totalorder %v2901_v13, 0  ;;  %v2915_v4 = vshrl.u32 %v2911_v53, 16  ;;  %v2921_v32 = vadd.s32 %v2919_v23, %v2913_v46  ;;  %4092 = vst [vmem:[%s5931_s7 + $0x80] sm:$0xff] %v4064_v33  }
 0x2dc   : > { %v2753_v15 = vadd.s32 %v2752_v27, %v2743_v48  ;;  %vm2922_vm5 = vc.u32 %v2920_v55, %v2916_v60  ;;  %v6793_v9 = vadd.s32 272, %v5646_v31  ;;  %v6797_v5 = vmul.f32 %v6572_v35, %v6472_v40  ;;  %vm3095_vm1 = vmand %vm3059_vm9, %vm3023_vm8 }
 0x2dd   : > { %v3937_v29 = vsel %vm6778_vm13, 1.0, %v4311_v24  ;;  %v3449_v49 = vmul.f32 %v3933_v17, %v6717_v56  ;;  %v2923_v10 = vsel %vm2922_vm5, 1, %v4310_v30  ;;  %v3131_v54 = vadd.s32 18, %v2901_v13 }
 0x2de   : > { %v2754_v14 = vshrl.u32 %v2753_v15, 4  ;;  %v2917_v0 = vshrl.u32 %v6768_v2, 16  ;;  %v2925_v57 = vadd.s32 %v2923_v10, %v2921_v32  ;;  %v6811_v40 = vmul.f32 %v6787_v39, %v6491_v63 }
 0x2df   : > { %v2936_v50 = vand.u32 65535, %v6793_v9  ;;  %v2937_v7 = vshrl.u32 %v6793_v9, 16  ;;  %v6818_v12 = vadd.s32 280, %v5646_v31  ;;  %v6822_v6 = vmul.f32 %v3937_v29, %v6655_v28 }
 0x2e0   : > { %v6825_v20 = vsel %vm3274_vm14, 1.0, %v4311_v24  ;;  %v2755_v11 = vmul.u32 18, %v2754_v14  ;;  %v2926_v63 = vadd.s32 %v2925_v57, %v2915_v4  ;;  %v3484_v59 = vadd.f32 %v6737_v45, %v3449_v49 }
 0x2e1   : > { %v2939_v47 = vmul.u32 14564, %v2936_v50  ;;  %v2940_v34 = vmul.u32 58254, %v2936_v50  ;;  %v6828_v43 = vmul.u32 14564, %v2937_v7  ;;  %v3527_v52 = vmul.f32 %v3449_v49, %v6717_v56 }
 0x2e2   : > { %v6831_v3 = vsel %vm3095_vm1, %v3131_v54, %v2901_v13  ;;  %v2756_v31 = vsub.s32 %v6721_v36, %v2755_v11  ;;  %v2927_v62 = vadd.s32 %v2926_v63, %v2917_v0  ;;  %v2942_v22 = vmul.u32 58254, %v2937_v7 }
 0x2e3   : > { %v2943_v53 = vshll.u32 %v2940_v34, 16  ;;  %v2945_v2 = vshll.u32 %v6828_v43, 16  ;;  %v2965_v26 = vand.u32 65535, %v6818_v12  ;;  %v2944_v36 = vshrl.u32 %v2940_v34, 16 }
 0x2e4   : > { %vm3018_vm15 = vcmp.ne.s32.totalorder %v2756_v31, 0  ;;  %vm3054_vm7 = vcmp.lt.s32.totalorder %v2756_v31, 0  ;;  %v3126_v56 = vadd.s32 18, %v2756_v31  ;;  %v2928_v45 = vshrl.u32 %v2927_v62, 4 }
 0x2e5   : > { %vm3090_vm10 = vmand %vm3054_vm7, %vm3018_vm15  ;;  %vm2947_vm2 = vc.u32 %v2939_v47, %v2943_v53  ;;  %v2949_v44 = vadd.s32 %v2943_v53, %v2939_v47  ;;  %v2966_v48 = vshrl.u32 %v6818_v12, 16  ;;  %v2946_v61 = vshrl.u32 %v6828_v43, 16 }
 0x2e6   : > { %v3162_v41 = vsel %vm3090_vm10, %v3126_v56, %v2756_v31  ;;  %v2929_v21 = vmul.u32 18, %v2928_v45  ;;  %v2948_v38 = vsel %vm2947_vm2, 1, %v4310_v30  ;;  %v6850_v13 = vmul.u32 58254, %v2965_v26 }
 0x2e7   : > { %vm3198_vm0 = vcmp.ge.s32.totalorder %v3162_v41, 1  ;;  %vm3234_vm11 = vcmp.le.s32.totalorder %v3162_v41, 16  ;;  %v2950_v46 = vadd.s32 %v2948_v38, %v2942_v22  ;;  %vm2951_vm4 = vc.u32 %v2949_v44, %v2945_v2 }
 0x2e8   : > { %vm3270_vm12 = vmand %vm3198_vm0, %vm3234_vm11  ;;  %v2930_v25 = vsub.s32 %v6727_v42, %v2929_v21  ;;  %v2952_v60 = vsel %vm2951_vm4, 1, %v4310_v30  ;;  %v6852_v55 = vmul.u32 14564, %v2966_v48  ;;  %v2968_v27 = vmul.u32 14564, %v2965_v26 }
 0x2e9   : > { %v3934_v58 = vsel %vm3270_vm12, 1.0, %v4311_v24  ;;  %v2954_v17 = vadd.s32 %v2952_v60, %v2950_v46  ;;  %v4069_v23 = vpack.c.bf16 %v6845_v19, %v6790_v16  ;;  %vm3203_vm13 = vcmp.ge.s32.totalorder %v6831_v3, 1 }
 0x2ea   : > { %v3450_v42 = vmul.f32 %v3934_v58, %v6740_v18  ;;  %vm3024_vm3 = vcmp.ne.s32.totalorder %v2930_v25, 0  ;;  %vm3060_vm6 = vcmp.lt.s32.totalorder %v2930_v25, 0  ;;  %v3132_v33 = vadd.s32 18, %v2930_v25 }
 0x2eb   : > { %vm6863_vm8 = vmand %vm3060_vm6, %vm3024_vm3  ;;  %v2955_v15 = vadd.s32 %v2954_v17, %v2944_v36  ;;  %v2971_v32 = vmul.u32 58254, %v2966_v48  ;;  %v2972_v29 = vshll.u32 %v6850_v13, 16  ;;  %4093 = vst [vmem:[%s5931_s7 + $0x88] sm:$0xff] %v4069_v23   ;;  %v3562_v49 = vadd.f32 %v6744_v37, %v3527_v52 }
 0x2ec   : > { %v3485_v10 = vadd.f32 %v3484_v59, %v3450_v42  ;;  %v3528_v54 = vmul.f32 %v3450_v42, %v6740_v18  ;;  %v2974_v14 = vshll.u32 %v6852_v55, 16 }
 0x2ed   : > { %4217 = shalt.err (!%p4214_p5)
}
 0x2ee   : > { %s4312_s7 = smov 4   ;;  %vm3239_vm9 = vcmp.le.s32.totalorder %v6831_v3, 16  ;;  %v3168_v18 = vsel %vm6863_vm8, %v3132_v33, %v2930_v25  ;;  %v2956_v37 = vadd.s32 %v2955_v15, %v2946_v61  ;;  %vm2976_vm5 = vc.u32 %v2968_v27, %v2972_v29  ;;  %s3945_s8 = sshll.u32 %s4292_s15, 1 }
 0x2ef   : > { %4112 = dma.vmem_to_hbm [thread:$0]  (%p4373_p4), %s6854_s19, 2304, %s6859_s21, %s3652_s23, %s4309_s11, %s4309_s11, %s4312_s7   ;;  %v3486_v0 = vadd.f32 %v3485_v10, %v6572_v35  ;;  %v3563_v57 = vadd.f32 %v3562_v49, %v3528_v54  ;;  %v2977_v50 = vsel %vm2976_vm5, 1, %v4310_v30  ;;  %v2978_v7 = vadd.s32 %v2972_v29, %v2968_v27  ;;  %vm3275_vm1 = vmand %vm3203_vm13, %vm3239_vm9 }
 0x2f0   : > { %v3531_v11 = vmul.f32 %v6822_v6, %v6655_v28  ;;  %v3454_v63 = vmul.f32 %v6825_v20, %v6682_v8  ;;  %v2957_v59 = vshrl.u32 %v2956_v37, 4  ;;  %v2979_v47 = vadd.s32 %v2977_v50, %v2971_v32  ;;  %s3803_s11 = sshll.u32 %s5895_s30, 1  ;;  %s3687_s18 = scalar_lea.hbm %s6964_s3, %s3945_s8 }
 0x2f1   : > { %v3487_v34 = vadd.f32 %v3486_v0, %v6787_v39  ;;  %v3564_v43 = vadd.f32 %v3563_v57, %v6797_v5  ;;  %v2973_v52 = vshrl.u32 %v6850_v13, 16  ;;  %vm2980_vm14 = vc.u32 %v2978_v7, %v2974_v14  ;;  %s190_s19 = scalar_lea.vmem [#allocation5], %s3803_s11  ;;  %s3691_s23 = sshll.u32 %s3687_s18, 4  ;;  %s3692_s23 = int_to_ptr.hbm [resolvable:$true] %s3691_s23 }
 0x2f2   : > { %vm3204_vm15 = vcmp.ge.s32.totalorder %v3168_v18, 1  ;;  %vm3240_vm7 = vcmp.le.s32.totalorder %v3168_v18, 16  ;;  %v2958_v35 = vmul.u32 18, %v2957_v59  ;;  %v2981_v28 = vsel %vm2980_vm14, 1, %v4310_v30  ;;  %s3689_s21 = sshll.u32 %s190_s19, 4  ;;  %s3657_s15 = scalar_lea.sflag [#allocation6], %s5895_s30  ;;  %s3690_s21 = int_to_ptr.vmem [resolvable:$true] %s3689_s21 }
 0x2f3   : > { %v3488_v20 = vadd.f32 %v3487_v34, %v6822_v6  ;;  %v3565_v31 = vadd.f32 %v3564_v43, %v6811_v40  ;;  %v2975_v39 = vshrl.u32 %v6852_v55, 16  ;;  %v2983_v5 = vadd.s32 %v2981_v28, %v2979_v47  ;;  %vm3276_vm10 = vmand %vm3204_vm15, %vm3240_vm7  ;;  %s4232_s26 = sshra.s32 %s3692_s23, 4  ;;  %s4238_s4 = scalar_lea.hbm %s6964_s3, 4  ;;  %s4233_s26 = int_to_ptr.hbm [resolvable:$true] %s4232_s26 }
 0x2f4   : > { %v3532_v62 = vmul.f32 %v3454_v63, %v6682_v8  ;;  %v2959_v22 = vsub.s32 %v6793_v9, %v2958_v35  ;;  %v3939_v53 = vsel %vm3275_vm1, 1.0, %v4311_v24  ;;  %v3940_v45 = vsel %vm3276_vm10, 1.0, %v4311_v24  ;;  %s4234_s27 = scalar_lea.hbm %s4233_s26, 2  ;;  %p4239_p10 = scmp.lt.s32.totalorder %s4233_s26, %s6964_s3 }
 0x2f5   : > { %v3566_v3 = vadd.f32 %v3565_v31, %v3531_v11  ;;  %v3489_v2 = vadd.f32 %v3488_v20, %v3454_v63  ;;  %v2984_v26 = vadd.s32 %v2983_v5, %v2973_v52  ;;  %v3455_v40 = vmul.f32 %v3939_v53, %v6734_v1  ;;  %p4235_p6 = scmp.ne.s32.totalorder %s4233_s26, %s4234_s27  ;;  %p4240_p11 = scmp.lt.s32.totalorder %s4238_s4, %s4234_s27 }
 0x2f6   : > { %vm3025_vm2 = vcmp.ne.s32.totalorder %v2959_v22, 0  ;;  %vm3061_vm0 = vcmp.lt.s32.totalorder %v2959_v22, 0  ;;  %v3133_v30 = vadd.s32 18, %v2959_v22  ;;  %v3456_v9 = vmul.f32 %v3940_v45, %v6764_v51 }
 0x2f7   : > { %v3567_v56 = vadd.f32 %v3566_v3, %v3532_v62  ;;  %vm3097_vm11 = vmand %vm3061_vm0, %vm3025_vm2  ;;  %v2985_v6 = vadd.s32 %v2984_v26, %v2975_v39  ;;  %v3490_v44 = vadd.f32 %v3489_v2, %v3455_v40  ;;  %v3533_v48 = vmul.f32 %v3455_v40, %v6734_v1  ;;  %p4236_p7 = pnand %p4235_p6, %p4373_p4  ;;  %p4241_p12 = por %p4240_p11, %p4239_p10 }
 0x2f8   : > { %v3169_v36 = vsel %vm3097_vm11, %v3133_v30, %v2959_v22  ;;  %v3534_v25 = vmul.f32 %v3456_v9, %v6764_v51 }
 0x2f9   : > { %vm3205_vm4 = vcmp.ge.s32.totalorder %v3169_v36, 1  ;;  %vm3241_vm12 = vcmp.le.s32.totalorder %v3169_v36, 16  ;;  %v2986_v8 = vshrl.u32 %v2985_v6, 4  ;;  %v3568_v61 = vadd.f32 %v3567_v56, %v3533_v48  ;;  %p4237_p9 = pneg %p4236_p7 }
 0x2fa   : > { %vm3277_vm3 = vmand %vm3205_vm4, %vm3241_vm12  ;;  %v3491_v46 = vadd.f32 %v3490_v44, %v3456_v9 }
 0x2fb   : > { %v2987_v41 = vmul.u32 18, %v2986_v8  ;;  %v3941_v21 = vsel %vm3277_vm3, 1.0, %v4311_v24  ;;  %v3569_v55 = vadd.f32 %v3568_v61, %v3534_v25  ;;  %p4242_p13 = pnand %p4241_p12, %p4237_p9 }
 0x2fc   : > { %v3457_v60 = vmul.f32 %v3941_v21, %v6790_v16 }
 0x2fd   : > { %v2988_v38 = vsub.s32 %v6818_v12, %v2987_v41 }
 0x2fe   : > { %v3492_v1 = vadd.f32 %v3491_v46, %v3457_v60  ;;  %v3535_v17 = vmul.f32 %v3457_v60, %v6790_v16 }
 0x2ff   : > { %vm3026_vm6 = vcmp.ne.s32.totalorder %v2988_v38, 0  ;;  %vm3062_vm13 = vcmp.lt.s32.totalorder %v2988_v38, 0  ;;  %v3134_v13 = vadd.s32 18, %v2988_v38 }
 0x300   : > { %vm3098_vm8 = vmand %vm3062_vm13, %vm3026_vm6  ;;  %v3570_v27 = vadd.f32 %v3569_v55, %v3535_v17 }
 0x301   : > { %v3170_v58 = vsel %vm3098_vm8, %v3134_v13, %v2988_v38 }
 0x302   : > { %vm3206_vm9 = vcmp.ge.s32.totalorder %v3170_v58, 1  ;;  %vm3242_vm5 = vcmp.le.s32.totalorder %v3170_v58, 16 }
 0x303   : > { %vm3278_vm14 = vmand %vm3206_vm9, %vm3242_vm5 }
 0x304   : > { %v3942_v12 = vsel %vm3278_vm14, 1.0, %v4311_v24 }
 0x305   : > { %v3458_v51 = vmul.f32 %v3942_v12, %v6845_v19 }
 0x307   : > { %v3493_v23 = vadd.f32 %v3492_v1, %v3458_v51  ;;  %v3536_v42 = vmul.f32 %v3458_v51, %v6845_v19 }
 0x309   : > { %v3494_v33 = vrot.slane %v3493_v23, 4  ;;  %v3571_v4 = vadd.f32 %v3570_v27, %v3536_v42 }
 0x30b   : > { %v3495_v15 = vadd.f32 %v3494_v33, %v3493_v23  ;;  %v3572_v32 = vrot.slane %v3571_v4, 4 }
 0x30d   : > { %v3496_v29 = vrot.slane %v3495_v15, 2  ;;  %v3573_v49 = vadd.f32 %v3572_v32, %v3571_v4 }
 0x30f   : > { %v3497_v10 = vadd.f32 %v3496_v29, %v3495_v15  ;;  %v3574_v16 = vrot.slane %v3573_v49, 2 }
 0x311   : > { %v3575_v24 = vadd.f32 %v3574_v16, %v3573_v49  ;;  %v3498_v54 = vrot.slane %v3497_v10, 1 }
 0x313   : > { %v3499_v19 = vadd.f32 %v3498_v54, %v3497_v10  ;;  %v3576_v14 = vrot.slane %v3575_v24, 1 }
 0x315   : > { %3500 = vst [vmem:[%s190_s19] sm:$0x1] %v3499_v19  ;;  %v3577_v18 = vadd.f32 %v3576_v14, %v3575_v24 }
 0x317   : > { %3578 = vst [vmem:[%s190_s19 + $0x1] sm:$0x1] %v3577_v18 }
 0x318   : > { %4245 = shalt.err (!%p4242_p13)
}
 0x319   : > { %4113 = dma.vmem_to_hbm [thread:$0]  (%p4373_p4), %s3690_s21, 32, %s3692_s23, %s3657_s15  }
 0x31a PF: > { %p4123_p0 = scmp.ge.s32.totalorder %s4300_s17, 2  ;;  %s3703_s30 = sand.u32 1, %s4280_s12  }
 0x31b   : > { %s3704_s7 = scalar_lea.sflag [#allocation4], %s3703_s30 }
 0x31c   : > { %p4117_p1 = pnand %p4123_p0, %p4380_p8 }
 0x31e   : > { %p4118_p2 = pneg %p4117_p1 }
 0x320   : > { %4271 = dma.done.wait (%p4118_p2), %s3704_s7, 2304  }
 0x321   : > { %4273 = vsyncadd (%p4118_p2), %s3704_s7, 4294964992  ;;  %s3714_s11 = scalar_lea.sflag [#allocation6], %s3703_s30 }
 0x322   : > { %4275 = dma.done.wait (%p4118_p2), %s3714_s11, 32  }
 0x323   : > { %4277 = vsyncadd (%p4118_p2), %s3714_s11, 4294967264  ;;  %s20_s17 = sadd.s32 1, %s4300_s17   ;;  %s7111_s12 = smov %s4284_s13 }
 0x324   : > { %p17_p3 = scmp.ge.s32.totalorder %s20_s17, 4   ;;  %s7112_s13 = smov %s4288_s14 }
 0x325   : > { %s7113_s14 = smov %s4386_s25  ;;  %s7114_s15 = smov %s4296_s16 }
 0x326   : > { %s7115_s16 = smov %s7117_s20  ;;  %19 = sbr.rel (!%p17_p3) target bundleno = 6 (0x6), region = 81 }
 0x32b   :  { %3720 = vsyncpa [#allocation4], 1 }
 0x32c   :  { %3722 = vsyncpa [#allocation4 + $0x1], 1 }
 0x32d   :  { %3723 = vsyncpa [#allocation6], 1 }
 0x32e   :  { %3725 = vsyncpa [#allocation6 + $0x1], 1 }

</bundles_post_ra>
